<compile_context>
chip_gen: v7x
topology: tpu7x:2x2x1
jax: 0.10.0
libtpu: 0.0.40
codegen_flags: <defaults>
</compile_context>

<pallas_src>
import jax
import jax.numpy as jnp
from jax.experimental import pallas as pl
from jax.experimental.pallas import tpu as pltpu


def basic_block_kernel(x_ref, w1_ref, b1_ref, w2_ref, b2_ref, out_ref,
                       xp_ref, y1p_ref):
    """One image of the fused BasicBlock.

    x_ref  : (1, H, W, Cin) f32   unpadded input image (also the f32 residual)
    w1_ref : (3*Cin, 3*C)   bf16  conv1 weights, BN1 scale folded (dx->K, dy->N)
    b1_ref : (1, C)         f32   folded BN1 bias
    w2_ref : (3*C, 3*C)     bf16  conv2 weights, BN2 scale folded (dx->K, dy->N)
    b2_ref : (1, C)         f32   folded BN2 bias
    out_ref: (1, H, W, C)         output image
    xp_ref : (H+2, Wp, Cin) bf16  scratch: zero-padded input plane (Wp = 16-aligned)
    y1p_ref: (H+2, Wp, C)   bf16  scratch: zero-padded conv1 activation plane
    """
    H, W = x_ref.shape[1], x_ref.shape[2]
    C = out_ref.shape[3]

    def stage_padded(dst_ref, v):
        # Zero the aligned padded plane with one full-slab store, then write the
        # interior once; the zero border provides the 3x3 conv's padding=1.
        # (Once per image, so the partial interior store is fully amortized.)
        dst_ref[...] = jnp.zeros(dst_ref.shape, dst_ref.dtype)
        dst_ref[1:H + 1, 1:W + 1, :] = v.astype(dst_ref.dtype)

    def conv3x3(src_ref, w_ref):
        # im2col with dx packed into K (K = 3*cin) and dy stacked along N
        # (N = 3*C): a single MXU matmul per conv (M=(H+2)*W, K=3*cin, N=3*C),
        # then three row-shifted lane-chunk adds on the VPU.  N = 384 fills the
        # 256-wide MXU on v6e/v7x (vs N = 128); only one slab build per conv.
        cin = src_ref.shape[-1]
        slab = jnp.concatenate(
            [src_ref[:, dx:dx + W, :] for dx in range(3)], axis=-1)
        slab = slab.reshape((H + 2) * W, 3 * cin)
        r = jnp.dot(slab, w_ref[...], preferred_element_type=jnp.float32)
        r = r.reshape(H + 2, W, 3 * C)
        return (r[0:H, :, 0:C]
                + r[1:H + 1, :, C:2 * C]
                + r[2:H + 2, :, 2 * C:3 * C])          # (H, W, C) f32

    # ---- in-kernel zero padding of the input (no padded HBM activation copy) --
    stage_padded(xp_ref, x_ref[0])

    # ---- conv1 (BN1 scale folded) + bias + ReLU ------------------------------
    y1 = jnp.maximum(conv3x3(xp_ref, w1_ref) + b1_ref[...], 0.0)
    stage_padded(y1p_ref, y1)

    # ---- conv2 (BN2 scale folded) + bias + f32 residual + ReLU ---------------
    identity = x_ref[0]                                  # f32, un-quantized skip
    y2 = conv3x3(y1p_ref, w2_ref) + b2_ref[...] + identity
    out_ref[...] = jnp.maximum(y2, 0.0).reshape(1, H, W, C).astype(out_ref.dtype)


def fold_bn_into_conv(w_oihw, gamma, beta, mean, var, eps):
    """Fold eval-mode BN into the conv; pack dx into K and stack dy along N.

    Returns w_stack of shape (3*Cin, 3*C) with
      w_stack[dx*Cin + i, dy*C + o] = scale[o] * w[o, i, dy, dx]
    and the folded bias (1, C).
    """
    scale = gamma / jnp.sqrt(var + eps)                      # (C,)
    bias = beta - mean * scale                               # (C,)
    w_hwio = jnp.transpose(w_oihw, (2, 3, 1, 0)) * scale     # (3, 3, Cin, C)
    kh, kw, ci, co = w_hwio.shape
    w_stack = jnp.transpose(w_hwio, (1, 2, 0, 3)).reshape(kw * ci, kh * co)
    return w_stack, bias.reshape(1, co)


def basic_block_pallas(x_nhwc, w1_stack, b1, w2_stack, b2, *, out_dtype=None):
    N, H, W, Cin = x_nhwc.shape
    C = b1.shape[-1]
    assert Cin == C, "downsample=None path requires in_channel == out_channel"
    assert W % 8 == 0, "W should be a multiple of 8 for a clean sublane layout"
    assert w1_stack.shape == (3 * Cin, 3 * C) and w2_stack.shape == (3 * C, 3 * C)
    if out_dtype is None:
        # For chained blocks pass out_dtype=jnp.bfloat16 to halve the writeback
        # and the next block's read; the test keeps f32 for a strict check.
        out_dtype = x_nhwc.dtype

    # Pad the scratch plane width to the bf16 sublane tile (16).
    Wp = -(-(W + 2) // 16) * 16

    x = x_nhwc.astype(jnp.float32)
    w1 = w1_stack.astype(jnp.bfloat16)
    w2 = w2_stack.astype(jnp.bfloat16)
    b1 = b1.reshape(1, C).astype(jnp.float32)
    b2 = b2.reshape(1, C).astype(jnp.float32)

    # VMEM budget from the whole-image tile footprint (double-buffered in/out
    # blocks + resident weights + padded scratch planes + im2col/matmul
    # temporaries), with 2x headroom and a cap well under v7x's 64 MiB.
    f4, bf2 = 4, 2
    out_item = jnp.dtype(out_dtype).itemsize
    footprint = (2 * H * W * Cin * f4                       # input block x2 buffers
                 + 2 * H * W * C * out_item                 # output block x2 buffers
                 + 2 * (3 * Cin) * (3 * C) * bf2            # w1 x2 buffers
                 + 2 * (3 * C) * (3 * C) * bf2              # w2 x2 buffers
                 + (H + 2) * Wp * (Cin + C) * bf2           # padded scratch planes
                 + 4 * (H + 2) * W * 3 * C * f4)            # slab + matmul result temps
    vmem_limit = int(min(max(2 * footprint, 16 << 20), 48 << 20))

    return pl.pallas_call(
        basic_block_kernel,
        out_shape=jax.ShapeDtypeStruct((N, H, W, C), out_dtype),
        grid=(N,),
        in_specs=[
            pl.BlockSpec((1, H, W, Cin), lambda n: (n, 0, 0, 0)),
            pl.BlockSpec((3 * Cin, 3 * C), lambda n: (0, 0)),
            pl.BlockSpec((1, C), lambda n: (0, 0)),
            pl.BlockSpec((3 * C, 3 * C), lambda n: (0, 0)),
            pl.BlockSpec((1, C), lambda n: (0, 0)),
        ],
        out_specs=pl.BlockSpec((1, H, W, C), lambda n: (n, 0, 0, 0)),
        scratch_shapes=[
            pltpu.VMEM((H + 2, Wp, Cin), jnp.bfloat16),
            pltpu.VMEM((H + 2, Wp, C), jnp.bfloat16),
        ],
        compiler_params=pltpu.CompilerParams(
            dimension_semantics=("parallel",),
            vmem_limit_bytes=vmem_limit),
    )(x, w1, b1, w2, b2)


# ---------------------------- plain-JAX reference (NCHW, f32) ----------------------------
def ref_basic_block(x, w1, bn1, w2, bn2, eps):
    def conv(v, w):
        return jax.lax.conv_general_dilated(
            v, w, (1, 1), [(1, 1), (1, 1)],
            dimension_numbers=("NCHW", "OIHW", "NCHW"))

    def bn(v, p):
        g, b, m, var = p
        return (g[None, :, None, None] * (v - m[None, :, None, None])
                / jnp.sqrt(var[None, :, None, None] + eps) + b[None, :, None, None])

    out = jax.nn.relu(bn(conv(x, w1), bn1))
    out = bn(conv(out, w2), bn2)
    return jax.nn.relu(out + x)


if __name__ == "__main__":
    key = jax.random.PRNGKey(0)
    # Small test shapes consistent with the module: a layer2-style BasicBlock
    # (stride=1, downsample=None) with lane-dense channels.
    N, H, W = 2, 16, 16
    C = 128
    eps = 1e-5

    ks = jax.random.split(key, 5)
    x_nchw = jax.random.normal(ks[0], (N, C, H, W), jnp.float32)
    wstd = (2.0 / (9 * C)) ** 0.5                     # kaiming fan_out
    w1 = jax.random.normal(ks[1], (C, C, 3, 3), jnp.float32) * wstd
    w2 = jax.random.normal(ks[2], (C, C, 3, 3), jnp.float32) * wstd

    def bn_params(k, c):
        kg, kb, km, kv = jax.random.split(k, 4)
        gamma = jax.random.uniform(kg, (c,), jnp.float32, 0.5, 1.5)
        beta = jax.random.normal(kb, (c,), jnp.float32) * 0.1
        mean = jax.random.normal(km, (c,), jnp.float32) * 0.1
        var = jax.random.uniform(kv, (c,), jnp.float32, 0.5, 1.5)
        return gamma, beta, mean, var

    bn1 = bn_params(ks[3], C)
    bn2 = bn_params(ks[4], C)

    # Kernel-side parameter prep: fold BN scale into the weights, pack dx into K,
    # stack dy along N.
    w1p, b1 = fold_bn_into_conv(w1, *bn1, eps)
    w2p, b2 = fold_bn_into_conv(w2, *bn2, eps)

    # NCHW -> NHWC (channels on lanes) for the kernel.
    x_nhwc = jnp.transpose(x_nchw, (0, 2, 3, 1))
    out_nhwc = basic_block_pallas(x_nhwc, w1p, b1, w2p, b2, out_dtype=jnp.float32)
    out_nhwc = jax.block_until_ready(out_nhwc)
    out_nchw = jnp.transpose(out_nhwc, (0, 3, 1, 2))

    ref = ref_basic_block(x_nchw, w1, bn1, w2, bn2, eps)
    max_err = float(jnp.max(jnp.abs(out_nchw - ref)))
    # bf16 MXU operands with f32 accumulation, two chained 3x3 convs
    # (effective K = 9*C = 1152 each): expected max abs error ~ a few times
    # sqrt(K) * 2^-9 * |activation| ~ 3-4e-2; 7e-2 atol gives ~2x margin while the
    # residual path stays exactly f32.
    assert jnp.allclose(out_nchw, ref, rtol=2e-2, atol=7e-2), \
        f"mismatch vs reference, max abs err = {max_err}"
    print("KERNEL_OK")
</pallas_src>

<mosaic_0001>
module attributes {stable_mosaic.version = 11 : i64} {
  func.func @basic_block_kernel(%arg0: i32, %arg1: memref<1x16x16x128xf32, #tpu.memory_space<vmem>>, %arg2: memref<384x384xbf16, #tpu.memory_space<vmem>>, %arg3: memref<1x128xf32, #tpu.memory_space<vmem>>, %arg4: memref<384x384xbf16, #tpu.memory_space<vmem>>, %arg5: memref<1x128xf32, #tpu.memory_space<vmem>>, %arg6: memref<1x16x16x128xf32, #tpu.memory_space<vmem>>, %arg7: memref<18x32x128xbf16, #tpu.memory_space<vmem>>, %arg8: memref<18x32x128xbf16, #tpu.memory_space<vmem>>) attributes {dimension_semantics = [#tpu.dimension_semantics<parallel>], iteration_bounds = array<i64: 2>, scalar_prefetch = 0 : i64, scratch_operands = 2 : i64, tpu.core_type = #tpu.core_type<tc>, window_params = [{transform_indices = @transform_0, window_bounds = array<i64: 1, 16, 16, 128>}, {pipeline_mode = #tpu.pipeline_mode<synchronous>, transform_indices = @transform_1, window_bounds = array<i64: 384, 384>}, {pipeline_mode = #tpu.pipeline_mode<synchronous>, transform_indices = @transform_2, window_bounds = array<i64: 1, 128>}, {pipeline_mode = #tpu.pipeline_mode<synchronous>, transform_indices = @transform_3, window_bounds = array<i64: 384, 384>}, {pipeline_mode = #tpu.pipeline_mode<synchronous>, transform_indices = @transform_4, window_bounds = array<i64: 1, 128>}, {transform_indices = @transform_5, window_bounds = array<i64: 1, 16, 16, 128>}]} {
    %c0 = arith.constant 0 : index
    %c0_0 = arith.constant 0 : index
    %c0_1 = arith.constant 0 : index
    %c0_2 = arith.constant 0 : index
    %0 = vector.load %arg1[%c0, %c0_0, %c0_1, %c0_2] : memref<1x16x16x128xf32, #tpu.memory_space<vmem>>, vector<1x16x16x128xf32>
    %1 = vector.shape_cast %0 : vector<1x16x16x128xf32> to vector<16x16x128xf32>
    %cst = arith.constant 0.000000e+00 : bf16
    %2 = vector.broadcast %cst : bf16 to vector<18x32x128xbf16>
    %c0_3 = arith.constant 0 : index
    %c0_4 = arith.constant 0 : index
    %c0_5 = arith.constant 0 : index
    %3 = vector.load %arg7[%c0_3, %c0_4, %c0_5] : memref<18x32x128xbf16, #tpu.memory_space<vmem>>, vector<18x32x128xbf16>
    tpu.vector_store %arg7[%c0_3, %c0_4, %c0_5], %2 {strides = array<i32>} : memref<18x32x128xbf16, #tpu.memory_space<vmem>>, vector<18x32x128xbf16>,
    %4 = arith.truncf %1 : vector<16x16x128xf32> to vector<16x16x128xbf16>
    %c1 = arith.constant 1 : index
    %c1_6 = arith.constant 1 : index
    %c0_7 = arith.constant 0 : index
    %5 = vector.load %arg7[%c1, %c1_6, %c0_7] : memref<18x32x128xbf16, #tpu.memory_space<vmem>>, vector<16x16x128xbf16>
    tpu.vector_store %arg7[%c1, %c1_6, %c0_7], %4 {strides = array<i32>} : memref<18x32x128xbf16, #tpu.memory_space<vmem>>, vector<16x16x128xbf16>,
    %c0_8 = arith.constant 0 : index
    %c0_9 = arith.constant 0 : index
    %c0_10 = arith.constant 0 : index
    %6 = vector.load %arg7[%c0_8, %c0_9, %c0_10] : memref<18x32x128xbf16, #tpu.memory_space<vmem>>, vector<18x16x128xbf16>
    %c0_11 = arith.constant 0 : index
    %c1_12 = arith.constant 1 : index
    %c0_13 = arith.constant 0 : index
    %7 = vector.load %arg7[%c0_11, %c1_12, %c0_13] : memref<18x32x128xbf16, #tpu.memory_space<vmem>>, vector<18x16x128xbf16>
    %c0_14 = arith.constant 0 : index
    %c2 = arith.constant 2 : index
    %c0_15 = arith.constant 0 : index
    %8 = vector.load %arg7[%c0_14, %c2, %c0_15] : memref<18x32x128xbf16, #tpu.memory_space<vmem>>, vector<18x16x128xbf16>
    %9 = tpu.concatenate %6, %7, %8 in 2 : vector<18x16x128xbf16>, vector<18x16x128xbf16>, vector<18x16x128xbf16> -> vector<18x16x384xbf16>
    %10 = vector.shape_cast %9 : vector<18x16x384xbf16> to vector<288x384xbf16>
    %c0_16 = arith.constant 0 : index
    %c0_17 = arith.constant 0 : index
    %11 = vector.load %arg2[%c0_16, %c0_17] : memref<384x384xbf16, #tpu.memory_space<vmem>>, vector<384x384xbf16>
    %cst_18 = arith.constant dense<0.000000e+00> : vector<288x384xf32>
    %12 = tpu.matmul %10, %11, %cst_18 {dimension_numbers = #tpu.dot_dimension_numbers<[1], [0], [0], [1], [0, 0, 1, 1], [], []>} : vector<288x384xbf16>, vector<384x384xbf16>, vector<288x384xf32> -> vector<288x384xf32>
    %13 = vector.shape_cast %12 : vector<288x384xf32> to vector<18x16x384xf32>
    %14 = vector.extract_strided_slice %13 {offsets = [0, 0, 0], sizes = [16, 16, 128], strides = [1, 1, 1]} : vector<18x16x384xf32> to vector<16x16x128xf32>
    %15 = vector.extract_strided_slice %13 {offsets = [1, 0, 128], sizes = [16, 16, 128], strides = [1, 1, 1]} : vector<18x16x384xf32> to vector<16x16x128xf32>
    %16 = arith.addf %14, %15 : vector<16x16x128xf32>
    %17 = vector.extract_strided_slice %13 {offsets = [2, 0, 256], sizes = [16, 16, 128], strides = [1, 1, 1]} : vector<18x16x384xf32> to vector<16x16x128xf32>
    %18 = arith.addf %16, %17 : vector<16x16x128xf32>
    %c0_19 = arith.constant 0 : index
    %c0_20 = arith.constant 0 : index
    %19 = vector.load %arg3[%c0_19, %c0_20] : memref<1x128xf32, #tpu.memory_space<vmem>>, vector<1x128xf32>
    %20 = vector.shape_cast %19 : vector<1x128xf32> to vector<1x1x128xf32>
    %21 = vector.broadcast %20 : vector<1x1x128xf32> to vector<16x16x128xf32>
    %22 = arith.addf %18, %21 : vector<16x16x128xf32>
    %cst_21 = arith.constant 0.000000e+00 : f32
    %23 = vector.broadcast %cst_21 : f32 to vector<16x16x128xf32>
    %24 = arith.maximumf %22, %23 : vector<16x16x128xf32>
    %cst_22 = arith.constant 0.000000e+00 : bf16
    %25 = vector.broadcast %cst_22 : bf16 to vector<18x32x128xbf16>
    %c0_23 = arith.constant 0 : index
    %c0_24 = arith.constant 0 : index
    %c0_25 = arith.constant 0 : index
    %26 = vector.load %arg8[%c0_23, %c0_24, %c0_25] : memref<18x32x128xbf16, #tpu.memory_space<vmem>>, vector<18x32x128xbf16>
    tpu.vector_store %arg8[%c0_23, %c0_24, %c0_25], %25 {strides = array<i32>} : memref<18x32x128xbf16, #tpu.memory_space<vmem>>, vector<18x32x128xbf16>,
    %27 = arith.truncf %24 : vector<16x16x128xf32> to vector<16x16x128xbf16>
    %c1_26 = arith.constant 1 : index
    %c1_27 = arith.constant 1 : index
    %c0_28 = arith.constant 0 : index
    %28 = vector.load %arg8[%c1_26, %c1_27, %c0_28] : memref<18x32x128xbf16, #tpu.memory_space<vmem>>, vector<16x16x128xbf16>
    tpu.vector_store %arg8[%c1_26, %c1_27, %c0_28], %27 {strides = array<i32>} : memref<18x32x128xbf16, #tpu.memory_space<vmem>>, vector<16x16x128xbf16>,
    %c0_29 = arith.constant 0 : index
    %c0_30 = arith.constant 0 : index
    %c0_31 = arith.constant 0 : index
    %c0_32 = arith.constant 0 : index
    %29 = vector.load %arg1[%c0_29, %c0_30, %c0_31, %c0_32] : memref<1x16x16x128xf32, #tpu.memory_space<vmem>>, vector<1x16x16x128xf32>
    %30 = vector.shape_cast %29 : vector<1x16x16x128xf32> to vector<16x16x128xf32>
    %c0_33 = arith.constant 0 : index
    %c0_34 = arith.constant 0 : index
    %c0_35 = arith.constant 0 : index
    %31 = vector.load %arg8[%c0_33, %c0_34, %c0_35] : memref<18x32x128xbf16, #tpu.memory_space<vmem>>, vector<18x16x128xbf16>
    %c0_36 = arith.constant 0 : index
    %c1_37 = arith.constant 1 : index
    %c0_38 = arith.constant 0 : index
    %32 = vector.load %arg8[%c0_36, %c1_37, %c0_38] : memref<18x32x128xbf16, #tpu.memory_space<vmem>>, vector<18x16x128xbf16>
    %c0_39 = arith.constant 0 : index
    %c2_40 = arith.constant 2 : index
    %c0_41 = arith.constant 0 : index
    %33 = vector.load %arg8[%c0_39, %c2_40, %c0_41] : memref<18x32x128xbf16, #tpu.memory_space<vmem>>, vector<18x16x128xbf16>
    %34 = tpu.concatenate %31, %32, %33 in 2 : vector<18x16x128xbf16>, vector<18x16x128xbf16>, vector<18x16x128xbf16> -> vector<18x16x384xbf16>
    %35 = vector.shape_cast %34 : vector<18x16x384xbf16> to vector<288x384xbf16>
    %c0_42 = arith.constant 0 : index
    %c0_43 = arith.constant 0 : index
    %36 = vector.load %arg4[%c0_42, %c0_43] : memref<384x384xbf16, #tpu.memory_space<vmem>>, vector<384x384xbf16>
    %cst_44 = arith.constant dense<0.000000e+00> : vector<288x384xf32>
    %37 = tpu.matmul %35, %36, %cst_44 {dimension_numbers = #tpu.dot_dimension_numbers<[1], [0], [0], [1], [0, 0, 1, 1], [], []>} : vector<288x384xbf16>, vector<384x384xbf16>, vector<288x384xf32> -> vector<288x384xf32>
    %38 = vector.shape_cast %37 : vector<288x384xf32> to vector<18x16x384xf32>
    %39 = vector.extract_strided_slice %38 {offsets = [0, 0, 0], sizes = [16, 16, 128], strides = [1, 1, 1]} : vector<18x16x384xf32> to vector<16x16x128xf32>
    %40 = vector.extract_strided_slice %38 {offsets = [1, 0, 128], sizes = [16, 16, 128], strides = [1, 1, 1]} : vector<18x16x384xf32> to vector<16x16x128xf32>
    %41 = arith.addf %39, %40 : vector<16x16x128xf32>
    %42 = vector.extract_strided_slice %38 {offsets = [2, 0, 256], sizes = [16, 16, 128], strides = [1, 1, 1]} : vector<18x16x384xf32> to vector<16x16x128xf32>
    %43 = arith.addf %41, %42 : vector<16x16x128xf32>
    %c0_45 = arith.constant 0 : index
    %c0_46 = arith.constant 0 : index
    %44 = vector.load %arg5[%c0_45, %c0_46] : memref<1x128xf32, #tpu.memory_space<vmem>>, vector<1x128xf32>
    %45 = vector.shape_cast %44 : vector<1x128xf32> to vector<1x1x128xf32>
    %46 = vector.broadcast %45 : vector<1x1x128xf32> to vector<16x16x128xf32>
    %47 = arith.addf %43, %46 : vector<16x16x128xf32>
    %48 = arith.addf %47, %30 : vector<16x16x128xf32>
    %cst_47 = arith.constant 0.000000e+00 : f32
    %49 = vector.broadcast %cst_47 : f32 to vector<16x16x128xf32>
    %50 = arith.maximumf %48, %49 : vector<16x16x128xf32>
    %51 = vector.shape_cast %50 : vector<16x16x128xf32> to vector<1x16x16x128xf32>
    %c0_48 = arith.constant 0 : index
    %c0_49 = arith.constant 0 : index
    %c0_50 = arith.constant 0 : index
    %c0_51 = arith.constant 0 : index
    %52 = vector.load %arg6[%c0_48, %c0_49, %c0_50, %c0_51] : memref<1x16x16x128xf32, #tpu.memory_space<vmem>>, vector<1x16x16x128xf32>
    tpu.vector_store %arg6[%c0_48, %c0_49, %c0_50, %c0_51], %51 {strides = array<i32>} : memref<1x16x16x128xf32, #tpu.memory_space<vmem>>, vector<1x16x16x128xf32>,
    return
  }
  func.func @transform_0(%arg0: i32) -> (i32, i32, i32, i32) {
    %c0_i32 = arith.constant 0 : i32
    %c0_i32_0 = arith.constant 0 : i32
    %c0_i32_1 = arith.constant 0 : i32
    %c0_i32_2 = arith.constant 0 : i32
    return %arg0, %c0_i32, %c0_i32_0, %c0_i32_1 : i32, i32, i32, i32
  }
  func.func @transform_1(%arg0: i32) -> (i32, i32) {
    %c0_i32 = arith.constant 0 : i32
    %c0_i32_0 = arith.constant 0 : i32
    %c0_i32_1 = arith.constant 0 : i32
    return %c0_i32, %c0_i32_0 : i32, i32
  }
  func.func @transform_2(%arg0: i32) -> (i32, i32) {
    %c0_i32 = arith.constant 0 : i32
    %c0_i32_0 = arith.constant 0 : i32
    %c0_i32_1 = arith.constant 0 : i32
    return %c0_i32, %c0_i32_0 : i32, i32
  }
  func.func @transform_3(%arg0: i32) -> (i32, i32) {
    %c0_i32 = arith.constant 0 : i32
    %c0_i32_0 = arith.constant 0 : i32
    %c0_i32_1 = arith.constant 0 : i32
    return %c0_i32, %c0_i32_0 : i32, i32
  }
  func.func @transform_4(%arg0: i32) -> (i32, i32) {
    %c0_i32 = arith.constant 0 : i32
    %c0_i32_0 = arith.constant 0 : i32
    %c0_i32_1 = arith.constant 0 : i32
    return %c0_i32, %c0_i32_0 : i32, i32
  }
  func.func @transform_5(%arg0: i32) -> (i32, i32, i32, i32) {
    %c0_i32 = arith.constant 0 : i32
    %c0_i32_0 = arith.constant 0 : i32
    %c0_i32_1 = arith.constant 0 : i32
    %c0_i32_2 = arith.constant 0 : i32
    return %arg0, %c0_i32, %c0_i32_0, %c0_i32_1 : i32, i32, i32, i32
  }
}

</mosaic_0001>

<bundles_post_ra>
// kernel: tpu_custom_call.1
= control target key start
LH: loop header
LB: loop body
LE: loop exit
PB: predicated region body
PF: predicated region fallthrough
CT: control target
= control target key end

     0   :  { %10 = vsyncpa [#allocation5], 0  ;;  %s7036_s0 = inlined_call_operand.hbm [shape: f32[2,16,16,128], index: 0, kind: input, shape index: {}]   ;;  %s7037_s1 = inlined_call_operand.hbm [shape: bf16[384,384], index: 1, kind: input, shape index: {}]   ;;  %s7038_s2 = inlined_call_operand.vmem [shape: f32[1,128], index: 2, kind: input, shape index: {}]   ;;  %s7039_s3 = inlined_call_operand.hbm [shape: bf16[384,384], index: 3, kind: input, shape index: {}]   ;;  %s7040_s4 = inlined_call_operand.vmem [shape: f32[1,128], index: 4, kind: input, shape index: {}]   ;;  %s7041_s5 = inlined_call_operand.hbm [shape: f32[2,16,16,128], index: 5, kind: output, shape index: {}]  }
   0x1   :  { %12 = vsyncpa [#allocation5 + $0x1], 0 }
   0x2   :  { %13 = vsyncpa [#allocation8], 0 }
   0x3   :  { %14 = vsyncpa [#allocation6], 0 }
   0x4   :  { %16 = vsyncpa [#allocation6 + $0x1], 0  ;;  %s5603_s18 = smov 0   ;;  %s5605_s19 = smov 0  }
   0x5   :  { %s5607_s20 = smov 0   ;;  %s5609_s21 = smov 0  }
   0x6 LB: > { %s5624_s22 = sadd.s32 4294967295, %s5560_s21   ;;  %s4671_s23 = sadd.s32 4294967294, %s5560_s21   ;;  %s5560_s21 = sphi %s5609_s21, %s7065_s21   ;;  %s5556_s20 = sphi %s5607_s20, %s7064_s20   ;;  %s5552_s19 = sphi %s5605_s19, %s7063_s19   ;;  %s5548_s18 = sphi %s5603_s18, %s7062_s18  }
   0x7   : > { %p42_p0 = scmp.ne.s32.totalorder %s5552_s19, %s5548_s18  ;;  %p7042_p1 = scmp.eq.s32.totalorder %s5624_s22, 0 }
   0x8   : > { %p156_p3 = scmp.eq.s32.totalorder %s4671_s23, 1  ;;  %p4672_p5 = scmp.ge.s32.totalorder %s5560_s21, 1 }
   0x9   : > { %p5633_p4 = por %p7042_p1, %p42_p0  ;;  %p163_p7 = scmp.lt.s32.totalorder %s5560_s21, 3 }
   0xa   : > { %p5638_p6 = por %p156_p3, %p42_p0  ;;  %s5562_s27 = smov [#allocation7]  }
   0xb   : > { %s7045_s24 = scalar_select %p5633_p4, 1, 0 }
   0xc   : > { %s7046_s25 = scalar_select %p5638_p6, 1, 0 }
   0xd   : > { %p5643_p8 = pnand %p4672_p5, %p163_p7  ;;  %s175_s28 = sshll.u32 %s5562_s27, 4  ;;  %s5647_s28 = int_to_ptr.vmem [resolvable:$true] %s175_s28 }
   0xe   : > { %s5563_s30 = smov [#allocation9]   ;;  %s5404_s9 = scalar_lea.hbm %s7037_s1, 9216 }
   0xf   : > { %p5141_p9 = pneg %p5643_p8  ;;  %s191_s6 = sshll.u32 %s5563_s30, 4  ;;  %s5658_s6 = int_to_ptr.vmem [resolvable:$true] %s191_s6 }
  0x10   : > { %p5405_p12 = scmp.ne.s32.totalorder %s7037_s1, %s5404_s9  ;;  %p5411_p5 = scmp.lt.u32.totalorder %s5404_s9, %s7037_s1 }
  0x11   : > { %p5654_p11 = pnand %p5141_p9, %p7042_p1 }
  0x13   : > { %p5406_p13 = pneg %p5654_p11 }
  0x15   : > { %p5407_p0 = pnand %p5406_p13, %p5405_p12 }
  0x17   : > { %p5408_p3 = pneg %p5407_p0 }
  0x19   : > { %p5413_p7 = pnand %p5411_p5, %p5408_p3 }
  0x1b   : > { %5416 = shalt.err (!%p5413_p7)
}
  0x1c   : > { %s5417_s14 = scalar_lea.vmem %s5647_s28, 9216  ;;  %p5425_p2 = scmp.lt.s32.totalorder %s5647_s28, %s5647_s28 }
  0x1d   : > { %p5418_p9 = scmp.ne.s32.totalorder %s5647_s28, %s5417_s14  ;;  %p5426_p12 = scmp.lt.s32.totalorder %s5417_s14, %s5417_s14 }
  0x1f   : > { %p5420_p10 = pnand %p5418_p9, %p5406_p13  ;;  %p5427_p0 = por %p5426_p12, %p5425_p2 }
  0x21   : > { %p5421_p1 = pneg %p5420_p10 }
  0x23   : > { %p5428_p6 = pnand %p5427_p0, %p5421_p1 }
  0x25   : > { %5431 = shalt.err (!%p5428_p6)
}
  0x26   : > { %s5564_s15 = smov 192   ;;  %s5565_s16 = smov 12  }
  0x27   : > { %5144 = dma.hbm_to_vmem [thread:$0]  (!%p5654_p11), %s7037_s1, 9216, %s5647_s28, [#allocation8], %s5564_s15, %s5564_s15, %s5565_s16  }
  0x28   : > { %s5432_s7 = scalar_lea.hbm %s7039_s3, 9216 }
  0x29   : > { %p5433_p2 = scmp.ne.s32.totalorder %s7039_s3, %s5432_s7  ;;  %p5439_p10 = scmp.lt.u32.totalorder %s5432_s7, %s7039_s3 }
  0x2b   : > { %p5435_p1 = pnand %p5433_p2, %p5406_p13 }
  0x2d   : > { %p5436_p6 = pneg %p5435_p1 }
  0x2f   : > { %p5441_p3 = pnand %p5439_p10, %p5436_p6 }
  0x31   : > { %5444 = shalt.err (!%p5441_p3)
}
  0x32   : > { %s5445_s28 = scalar_lea.vmem %s5658_s6, 9216  ;;  %p5453_p12 = scmp.lt.s32.totalorder %s5658_s6, %s5658_s6 }
  0x33   : > { %p5446_p5 = scmp.ne.s32.totalorder %s5658_s6, %s5445_s28  ;;  %p5454_p0 = scmp.lt.s32.totalorder %s5445_s28, %s5445_s28 }
  0x35   : > { %p5448_p7 = pnand %p5446_p5, %p5406_p13  ;;  %p5455_p2 = por %p5454_p0, %p5453_p12 }
  0x37   : > { %p5449_p9 = pneg %p5448_p7 }
  0x39   : > { %p5456_p1 = pnand %p5455_p2, %p5449_p9 }
  0x3b   : > { %5459 = shalt.err (!%p5456_p1)
}
  0x3c   : > { %5147 = dma.hbm_to_vmem [thread:$0]  (!%p5654_p11), %s7039_s3, 9216, %s5658_s6, [#allocation8], %s5564_s15, %s5564_s15, %s5565_s16  }
  0x3d   : > { %s5713_s14 = sadd.s32 1, %s5560_s21   ;;  %s29_s29 = sadd.s32 1, %s5556_s20 }
  0x3e   : > { %s26_s17 = ssub.s32 %s5560_s21, %s5713_s14  ;;  %p36_p13 = scmp.ne.s32.totalorder %s5556_s20, %s5552_s19 }
  0x3f   : > { %p27_p6 = scmp.eq.s32.totalorder %s26_s17, 0  ;;  %p37_p10 = scmp.eq.s32.totalorder %s5560_s21, 0 }
  0x40   : > { %p7049_p3 = scmp.eq.s32.totalorder %s5624_s22, 1  ;;  %p5158_p7 = scmp.lt.s32.totalorder %s5560_s21, 2 }
  0x41   : > { %s5729_s27 = scalar_select %p27_p6, %s5556_s20, %s29_s29  }
  0x42   : > { %p5723_p5 = por %p7049_p3, %p36_p13  ;;  %p38_p9 = por %p37_p10, %p36_p13 }
  0x43   : > { %s208_s30 = sand.u32 1, %s5556_s20   ;;  %s4835_s6 = sshll.u32 %s5560_s21, 12 }
  0x44   : > { %s7050_s23 = scalar_select %p5723_p5, 1, 0 }
  0x45   : > { %s4676_s7 = sshll.u32 %s208_s30, 8  ;;  %s5736_s8 = scalar_lea.hbm %s7036_s0, %s4835_s6 }
  0x46   : > { %s212_s9 = scalar_lea.vmem [#allocation4], %s4676_s7  ;;  %p5740_p11 = pnand %p5158_p7, %p38_p9 }
  0x47   : > { %s219_s10 = sshll.u32 %s212_s9, 4  ;;  %s5744_s28 = scalar_lea.sflag [#allocation5], %s208_s30  ;;  %s5738_s10 = int_to_ptr.vmem [resolvable:$true] %s219_s10 }
  0x48   : > { %s5460_s12 = scalar_lea.hbm %s5736_s8, 4096  ;;  %p5462_p0 = pneg %p5740_p11 }
  0x49   : > { %p5461_p12 = scmp.ne.s32.totalorder %s5736_s8, %s5460_s12  ;;  %s5465_s17 = scalar_lea.hbm %s7036_s0, 8192 }
  0x4a   : > { %p5466_p13 = scmp.lt.u32.totalorder %s5736_s8, %s7036_s0  ;;  %p5467_p6 = scmp.lt.u32.totalorder %s5465_s17, %s5460_s12 }
  0x4b   : > { %p5463_p2 = pnand %p5462_p0, %p5461_p12  ;;  %p5469_p3 = scmp.lt.u32.totalorder %s5460_s12, %s5736_s8 }
  0x4c   : > { %p5468_p10 = por %p5467_p6, %p5466_p13 }
  0x4d   : > { %p5464_p1 = pneg %p5463_p2 }
  0x4e   : > { %p5470_p7 = por %p5469_p3, %p5468_p10 }
  0x50   : > { %p5471_p9 = pnand %p5470_p7, %p5464_p1 }
  0x52   : > { %5474 = shalt.err (!%p5471_p9)
}
  0x53   : > { %s5475_s30 = scalar_lea.vmem %s5738_s10, 4096  ;;  %s5566_s15 = smov [#allocation4]  }
  0x54   : > { %p5476_p12 = scmp.ne.s32.totalorder %s5738_s10, %s5475_s30  ;;  %s5480_s16 = sshll.u32 %s5566_s15, 4  ;;  %s5481_s16 = int_to_ptr.vmem [resolvable:$false] %s5480_s16 }
  0x55   : > { %s5482_s9 = scalar_lea.vmem %s5481_s16, 8192  ;;  %p5483_p4 = scmp.lt.s32.totalorder %s5738_s10, %s5481_s16 }
  0x56   : > { %p5478_p2 = pnand %p5476_p12, %p5462_p0  ;;  %p5484_p13 = scmp.lt.s32.totalorder %s5482_s9, %s5475_s30 }
  0x58   : > { %p5479_p5 = pneg %p5478_p2  ;;  %p5485_p6 = por %p5484_p13, %p5483_p4 }
  0x5a   : > { %p5486_p10 = pnand %p5485_p6, %p5479_p5 }
  0x5c   : > { %5489 = shalt.err (!%p5486_p10)
}
  0x5d   : > { %s5567_s12 = smov 128   ;;  %s5568_s13 = smov 8  }
  0x5e   : > { %5151 = dma.hbm_to_vmem [thread:$0]  (!%p5740_p11), %s5736_s8, 4096, %s5738_s10, %s5744_s28, %s5567_s12, %s5567_s12, %s5568_s13  }
  0x5f   : > { %231 = sbr.rel (%p5643_p8) target bundleno = 1071 (0x42f), region = 40  ;;  %s5775_s29 = sand.u32 (!%p5643_p8), 1, %s5552_s19  }
  0x60   : > { %s4680_s17 = sshll.u32 (!%p5643_p8), %s5775_s29, 8  ;;  %s234_s7 = scalar_lea.sflag (!%p5643_p8), [#allocation5], %s5775_s29 }
  0x61   : > { %s5781_s6 = scalar_lea.vmem (!%p5643_p8), [#allocation4], %s4680_s17  ;;  %p7052_p4 = scmp.ne.s32.totalorder (!%p5643_p8), %s7045_s24, 0 }
  0x66   : > { %5535 = dma.done.wait (%p7052_p4), %s234_s7, 4096  }
  0x67   : > { %5537 = vsyncadd (%p7052_p4), %s234_s7, 4294963200  ;;  %p7053_p5 = scmp.eq.s32.totalorder %s5624_s22, 0 }
  0x69   : > { %5539 = dma.done.wait (%p7053_p5), [#allocation8], 18432   ;;  %p7054_p8 = pmov %p7053_p5 }
  0x6a   : > { %v5569_v0 = vmov 0   ;;  %v5203_v1 = vld [vmem:[#allocation7 + $0x4] ss:$12 sps:$4 sm:$0xff]   ;;  %v5205_v2 = vld [vmem:[#allocation7 + $0x8] ss:$12 sps:$4 sm:$0xff]   ;;  %vm502_vm1 = vcmask 1047552  }
  0x6b   : > { %5541 = vsyncadd (%p7054_p8), [#allocation8], 4294948864  ;;  %1910 = vmatprep.subr.bf16.mxu1 %v5569_v0  ;;  %305 = vst [vmem:[#allocation2] sm:$0xff] %v5569_v0  ;;  %1500 = vmatprep.subr.bf16.mxu0 %v5203_v1  ;;  %v5206_v3 = vld [vmem:[#allocation7] ss:$12 sps:$4 sm:$0xff]   ;;  %v682_v29 = vrot.slane %v5569_v0, 1 }
  0x6c   : > { %306 = vst [vmem:[#allocation2 + $0x8] sm:$0xff] %v5569_v0  ;;  %308 = vst [vmem:[#allocation2 + $0x18] sm:$0xff] %v5569_v0  ;;  %1911 = vmatpush1.bf16.msra.mxu1 %v5205_v2  ;;  %v5207_v4 = vld [vmem:[#allocation7 + $0x1c] ss:$12 sps:$4 sm:$0xff]   ;;  %1501 = vmatpush1.bf16.msra.mxu0 %v5206_v3  ;;  %v5209_v5 = vld [vmem:[#allocation7 + $0x20] ss:$12 sps:$4 sm:$0xff]  }
  0x6d   : > { %310 = vst [vmem:[#allocation2 + $0x28] sm:$0xff] %v5569_v0  ;;  %312 = vst [vmem:[#allocation2 + $0x38] sm:$0xff] %v5569_v0  ;;  %1912 = vmatprep.subr.bf16.mxu1 %v5569_v0  ;;  %v5210_v6 = vld [vmem:[#allocation7 + $0x18] ss:$12 sps:$4 sm:$0xff]   ;;  %1502 = vmatprep.subr.bf16.mxu0 %v5207_v4  ;;  %v5211_v7 = vld [vmem:[#allocation7 + $0x34] ss:$12 sps:$4 sm:$0xff]  }
  0x6e   : > { %314 = vst [vmem:[#allocation2 + $0x48] sm:$0xff] %v5569_v0  ;;  %316 = vst [vmem:[#allocation2 + $0x58] sm:$0xff] %v5569_v0  ;;  %v5213_v8 = vld [vmem:[#allocation7 + $0x38] ss:$12 sps:$4 sm:$0xff]   ;;  %v5214_v9 = vld [vmem:[#allocation7 + $0x30] ss:$12 sps:$4 sm:$0xff]  }
  0x6f   : > { %318 = vst [vmem:[#allocation2 + $0x68] sm:$0xff] %v5569_v0  ;;  %320 = vst [vmem:[#allocation2 + $0x78] sm:$0xff] %v5569_v0  ;;  %v5215_v10 = vld [vmem:[#allocation7 + $0x4c] ss:$12 sps:$4 sm:$0xff]   ;;  %v5217_v11 = vld [vmem:[#allocation7 + $0x50] ss:$12 sps:$4 sm:$0xff]  }
  0x70   : > { %322 = vst [vmem:[#allocation2 + $0x88] sm:$0xff] %v5569_v0  ;;  %324 = vst [vmem:[#allocation2 + $0x98] sm:$0xff] %v5569_v0  ;;  %1913 = vmatpush1.bf16.msra.mxu1 %v5209_v5  ;;  %1503 = vmatpush1.bf16.msra.mxu0 %v5210_v6  ;;  %v5218_v12 = vld [vmem:[#allocation7 + $0x48] ss:$12 sps:$4 sm:$0xff]   ;;  %v5219_v13 = vld [vmem:[#allocation7 + $0x64] ss:$12 sps:$4 sm:$0xff]  }
  0x71   : > { %326 = vst [vmem:[#allocation2 + $0xa8] sm:$0xff] %v5569_v0  ;;  %328 = vst [vmem:[#allocation2 + $0xb8] sm:$0xff] %v5569_v0  ;;  %1914 = vmatprep.subr.bf16.mxu1 %v5569_v0  ;;  %1504 = vmatprep.subr.bf16.mxu0 %v5211_v7  ;;  %v5221_v14 = vld [vmem:[#allocation7 + $0x68] ss:$12 sps:$4 sm:$0xff]   ;;  %v5222_v15 = vld [vmem:[#allocation7 + $0x60] ss:$12 sps:$4 sm:$0xff]  }
  0x72   : > { %330 = vst [vmem:[#allocation2 + $0xc8] sm:$0xff] %v5569_v0  ;;  %332 = vst [vmem:[#allocation2 + $0xd8] sm:$0xff] %v5569_v0  ;;  %v5223_v16 = vld [vmem:[#allocation7 + $0x7c] ss:$12 sps:$4 sm:$0xff]   ;;  %v5225_v17 = vld [vmem:[#allocation7 + $0x80] ss:$12 sps:$4 sm:$0xff]  }
  0x73   : > { %334 = vst [vmem:[#allocation2 + $0xe8] sm:$0xff] %v5569_v0  ;;  %336 = vst [vmem:[#allocation2 + $0xf8] sm:$0xff] %v5569_v0  ;;  %v5226_v18 = vld [vmem:[#allocation7 + $0x78] ss:$12 sps:$4 sm:$0xff]   ;;  %v5227_v19 = vld [vmem:[#allocation7 + $0x94] ss:$12 sps:$4 sm:$0xff]  }
  0x74   : > { %338 = vst [vmem:[#allocation2 + $0x108] sm:$0xff] %v5569_v0  ;;  %339 = vst [vmem:[#allocation2 + $0x110] sm:$0xff] %v5569_v0  ;;  %1915 = vmatpush1.bf16.msra.mxu1 %v5213_v8  ;;  %1505 = vmatpush1.bf16.msra.mxu0 %v5214_v9  ;;  %v5229_v20 = vld [vmem:[#allocation7 + $0x98] ss:$12 sps:$4 sm:$0xff]   ;;  %v5230_v21 = vld [vmem:[#allocation7 + $0x90] ss:$12 sps:$4 sm:$0xff]  }
  0x75   : > { %340 = vst [vmem:[#allocation2 + $0x118] sm:$0xff] %v5569_v0  ;;  %2391 = vst [vmem:[#allocation3] sm:$0xff] %v5569_v0  ;;  %1916 = vmatprep.subr.bf16.mxu1 %v5569_v0  ;;  %1506 = vmatprep.subr.bf16.mxu0 %v5215_v10  ;;  %v5231_v22 = vld [vmem:[#allocation7 + $0xac] ss:$12 sps:$4 sm:$0xff]   ;;  %v5233_v23 = vld [vmem:[#allocation7 + $0xb0] ss:$12 sps:$4 sm:$0xff]  }
  0x76   : > { %2392 = vst [vmem:[#allocation3 + $0x8] sm:$0xff] %v5569_v0  ;;  %2394 = vst [vmem:[#allocation3 + $0x18] sm:$0xff] %v5569_v0  ;;  %v5234_v24 = vld [vmem:[#allocation7 + $0xa8] ss:$12 sps:$4 sm:$0xff]   ;;  %v5235_v25 = vld [vmem:[#allocation7 + $0xc4] ss:$12 sps:$4 sm:$0xff]  }
  0x77   : > { %2396 = vst [vmem:[#allocation3 + $0x28] sm:$0xff] %v5569_v0  ;;  %2398 = vst [vmem:[#allocation3 + $0x38] sm:$0xff] %v5569_v0  ;;  %v5237_v26 = vld [vmem:[#allocation7 + $0xc8] ss:$12 sps:$4 sm:$0xff]   ;;  %v5238_v27 = vld [vmem:[#allocation7 + $0xc0] ss:$12 sps:$4 sm:$0xff]  }
  0x78   : > { %2400 = vst [vmem:[#allocation3 + $0x48] sm:$0xff] %v5569_v0  ;;  %2402 = vst [vmem:[#allocation3 + $0x58] sm:$0xff] %v5569_v0  ;;  %1917 = vmatpush1.bf16.msra.mxu1 %v5217_v11  ;;  %1507 = vmatpush1.bf16.msra.mxu0 %v5218_v12  ;;  %v5239_v28 = vld [vmem:[#allocation7 + $0xdc] ss:$12 sps:$4 sm:$0xff]   ;;  %v5241_v30 = vld [vmem:[#allocation7 + $0xe0] ss:$12 sps:$4 sm:$0xff]  }
  0x79   : > { %2404 = vst [vmem:[#allocation3 + $0x68] sm:$0xff] %v5569_v0  ;;  %2406 = vst [vmem:[#allocation3 + $0x78] sm:$0xff] %v5569_v0  ;;  %1918 = vmatprep.subr.bf16.mxu1 %v5569_v0  ;;  %1508 = vmatprep.subr.bf16.mxu0 %v5219_v13  ;;  %vm676_vm0 = vsmask.f32 7424  ;;  %v5242_v31 = vld [vmem:[#allocation7 + $0xd8] ss:$12 sps:$4 sm:$0xff]  }
  0x7a   : > { %2408 = vst [vmem:[#allocation3 + $0x88] sm:$0xff] %v5569_v0  ;;  %2410 = vst [vmem:[#allocation3 + $0x98] sm:$0xff] %v5569_v0  ;;  %v5243_v32 = vld [vmem:[#allocation7 + $0xf4] ss:$12 sps:$4 sm:$0xff]   ;;  %v623_v33 = vld [vmem:[#allocation2 + $0x8] sm:$0x1] }
  0x7b   : > { %2412 = vst [vmem:[#allocation3 + $0xa8] sm:$0xff] %v5569_v0  ;;  %2414 = vst [vmem:[#allocation3 + $0xb8] sm:$0xff] %v5569_v0  ;;  %v5245_v34 = vld [vmem:[#allocation7 + $0xf8] ss:$12 sps:$4 sm:$0xff]   ;;  %v685_v35 = vshll.u32 %v623_v33, 16  ;;  %v274_v40 = vld [vmem:[%s5781_s6 + $0x8] sm:$0xff] }
  0x7c   : > { %2416 = vst [vmem:[#allocation3 + $0xc8] sm:$0xff] %v5569_v0  ;;  %2418 = vst [vmem:[#allocation3 + $0xd8] sm:$0xff] %v5569_v0  ;;  %1919 = vmatpush1.bf16.msra.mxu1 %v5221_v14  ;;  %1509 = vmatpush1.bf16.msra.mxu0 %v5222_v15  ;;  %vm503_vm2 = vsmask.f32 7938  ;;  %v5246_v36 = vld [vmem:[#allocation7 + $0xf0] ss:$12 sps:$4 sm:$0xff]  }
  0x7d   : > { %2420 = vst [vmem:[#allocation3 + $0xe8] sm:$0xff] %v5569_v0  ;;  %2422 = vst [vmem:[#allocation3 + $0xf8] sm:$0xff] %v5569_v0  ;;  %1920 = vmatprep.subr.bf16.mxu1 %v5569_v0  ;;  %1510 = vmatprep.subr.bf16.mxu0 %v5223_v16  ;;  %v5247_v37 = vld [vmem:[#allocation7 + $0x10c] ss:$12 sps:$4 sm:$0xff]   ;;  %v687_v38 = vrot.slane %v685_v35, 1  ;;  %v273_v39 = vld [vmem:[%s5781_s6] sm:$0xff] }
  0x7e   : > { %2424 = vst [vmem:[#allocation3 + $0x108] sm:$0xff] %v5569_v0  ;;  %2425 = vst [vmem:[#allocation3 + $0x110] sm:$0xff] %v5569_v0  ;;  %vm508_vm3 = vcmask 1040384   ;;  %v5249_v41 = vld [vmem:[#allocation7 + $0x110] ss:$12 sps:$4 sm:$0xff]   ;;  %v341_v42 = vpack.c.bf16 %v274_v40, %v273_v39  ;;  %v277_v59 = vld [vmem:[%s5781_s6 + $0x20] sm:$0xff] }
  0x7f   : > { %2426 = vst [vmem:[#allocation3 + $0x118] sm:$0xff] %v5569_v0  ;;  %vm509_vm4 = vsmask.f32 256  ;;  %v275_v43 = vld [vmem:[%s5781_s6 + $0x10] sm:$0xff]  ;;  %v276_v44 = vld [vmem:[%s5781_s6 + $0x18] sm:$0xff]  ;;  %v688_v46 = vsel %vm676_vm0, %v682_v29, %v687_v38  ;;  %vm5850_vm5 = vmand %vm502_vm1, %vm503_vm2  ;;  %vm947_vm7 = vcmask 1046528  }
  0x80   : > { %1921 = vmatpush1.bf16.msra.mxu1 %v5225_v17  ;;  %1511 = vmatpush1.bf16.msra.mxu0 %v5226_v18  ;;  %v5250_v45 = vld [vmem:[#allocation7 + $0x108] ss:$12 sps:$4 sm:$0xff]   ;;  %v342_v47 = vpack.c.bf16 %v276_v44, %v275_v43  ;;  %v5251_v48 = vld [vmem:[#allocation7 + $0x124] ss:$12 sps:$4 sm:$0xff]   ;;  %v358_v49 = vshrl.u32 %v341_v42, 16  ;;  %v361_v50 = vshll.u32 %v341_v42, 16  ;;  %vm5856_vm6 = vmand %vm508_vm3, %vm509_vm4 }
  0x81   : > { %1922 = vmatprep.subr.bf16.mxu1 %v5569_v0  ;;  %1512 = vmatprep.subr.bf16.mxu0 %v5227_v19  ;;  %v511_v53 = vld [vmem:[#allocation2 + $0x18] sm:$0x1]  ;;  %v5253_v56 = vld [vmem:[#allocation7 + $0x128] ss:$12 sps:$4 sm:$0xff]   ;;  %v5254_v61 = vld [vmem:[#allocation7 + $0x120] ss:$12 sps:$4 sm:$0xff]  }
  0x82   : > { %1942 = vmatprep.mubr.bf16.mxu1 %v688_v46  ;;  %v365_v54 = vshrl.u32 %v342_v47, 16  ;;  %v368_v55 = vshll.u32 %v342_v47, 16  ;;  %1532 = vmatprep.mubr.bf16.mxu0 %v688_v46  ;;  %v360_v57 = vrot.slane %v358_v49, 7  ;;  %v517_v58 = vld [vmem:[#allocation2 + $0x28] sm:$0x1]  ;;  %v279_v1 = vld [vmem:[%s5781_s6 + $0x30] sm:$0xff] }
  0x83   : > { %v278_v60 = vld [vmem:[%s5781_s6 + $0x28] sm:$0xff]  ;;  %v280_v2 = vld [vmem:[%s5781_s6 + $0x38] sm:$0xff]  ;;  %v281_v18 = vld [vmem:[%s5781_s6 + $0x40] sm:$0xff]  ;;  %s6798_s30 = scalar_lea.vmem [#allocation10], %s4680_s17  ;;  %s4836_s15 = sshll.u32 %s5624_s22, 12 }
  0x84   : > { %1923 = vmatpush1.bf16.msra.mxu1 %v5229_v20  ;;  %1513 = vmatpush1.bf16.msra.mxu0 %v5230_v21  ;;  %v367_v62 = vrot.slane %v365_v54, 7  ;;  %v343_v63 = vpack.c.bf16 %v278_v60, %v277_v59  ;;  %v5255_v3 = vld [vmem:[#allocation7 + $0x13c] ss:$12 sps:$4 sm:$0xff]   ;;  %v363_v4 = vor.u32 %v361_v50, %v360_v57  ;;  %v512_v5 = vsel %vm5856_vm6, %v360_v57, %v511_v53  ;;  %v523_v11 = vld [vmem:[#allocation2 + $0x38] sm:$0x1]  ;;  %v283_v20 = vld [vmem:[%s5781_s6 + $0x50] sm:$0xff]  ;;  %s6988_s13 = scalar_lea.hbm %s7041_s5, %s4836_s15 }
  0x85   : > { %1924 = vmatprep.subr.bf16.mxu1 %v5569_v0  ;;  %1514 = vmatprep.subr.bf16.mxu0 %v5231_v22  ;;  %v344_v6 = vpack.c.bf16 %v280_v2, %v279_v1  ;;  %513 = vst [vmem:[#allocation2 + $0x18] sm:$0x1] %v512_v5  ;;  %v529_v15 = vld [vmem:[#allocation2 + $0x48] sm:$0x1]  ;;  %v5257_v21 = vld [vmem:[#allocation7 + $0x140] ss:$12 sps:$4 sm:$0xff]  }
  0x86   : > { %v370_v7 = vor.u32 %v368_v55, %v367_v62  ;;  %v518_v8 = vsel %vm5856_vm6, %v367_v62, %v517_v58  ;;  %v372_v9 = vshrl.u32 %v343_v63, 16  ;;  %v375_v10 = vshll.u32 %v343_v63, 16  ;;  %v282_v19 = vld [vmem:[%s5781_s6 + $0x48] sm:$0xff]  ;;  %v5259_v29 = vld [vmem:[#allocation7 + $0x154] ss:$12 sps:$4 sm:$0xff]   ;;  %s4579_s16 = sshll.u32 %s6798_s30, 4  ;;  %s6990_s16 = int_to_ptr.vmem [resolvable:$true] %s4579_s16 }
  0x87   : > { %v5871_v12 = vsel %vm5850_vm5, %v363_v4, 0  ;;  %519 = vst [vmem:[#allocation2 + $0x28] sm:$0x1] %v518_v8  ;;  %v379_v13 = vshrl.u32 %v344_v6, 16  ;;  %v382_v14 = vshll.u32 %v344_v6, 16  ;;  %v285_v38 = vld [vmem:[%s5781_s6 + $0x60] sm:$0xff] }
  0x88   : > { %1925 = vmatpush1.bf16.msra.mxu1 %v5233_v23  ;;  %1515 = vmatpush1.bf16.msra.mxu0 %v5234_v24  ;;  %507 = vst [vmem:[#allocation2 + $0x10] sm:$0xff] %v5871_v12  ;;  %v5876_v16 = vsel %vm5850_vm5, %v370_v7, 0  ;;  %v374_v17 = vrot.slane %v372_v9, 7  ;;  %v345_v23 = vpack.c.bf16 %v282_v19, %v281_v18  ;;  %v284_v24 = vld [vmem:[%s5781_s6 + $0x58] sm:$0xff]  ;;  %v286_v42 = vld [vmem:[%s5781_s6 + $0x68] sm:$0xff]  ;;  %v690_v44 = vshrl.u32 %v5871_v12, 16 }
  0x89   : > { %1926 = vmatprep.subr.bf16.mxu1 %v5569_v0  ;;  %1516 = vmatprep.subr.bf16.mxu0 %v5235_v25  ;;  %516 = vst [vmem:[#allocation2 + $0x20] sm:$0xff] %v5876_v16  ;;  %v381_v22 = vrot.slane %v379_v13, 7  ;;  %v5258_v25 = vld [vmem:[#allocation7 + $0x138] ss:$12 sps:$4 sm:$0xff]   ;;  %v5262_v35 = vld [vmem:[#allocation7 + $0x150] ss:$12 sps:$4 sm:$0xff]   ;;  %v347_v55 = vpack.c.bf16 %v286_v42, %v285_v38 }
  0x8a   : > { %v386_v33 = vshrl.u32 %v345_v23, 16  ;;  %v5263_v43 = vld [vmem:[#allocation7 + $0x16c] ss:$12 sps:$4 sm:$0xff]   ;;  %v5265_v50 = vld [vmem:[#allocation7 + $0x170] ss:$12 sps:$4 sm:$0xff]   ;;  %v704_v58 = vshll.u32 %v5876_v16, 16 }
  0x8b   : > { %v541_v54 = vld [vmem:[#allocation2 + $0x68] sm:$0x1]  ;;  %v5269_v57 = vld [vmem:[#allocation7 + $0x184] ss:$12 sps:$4 sm:$0xff]   ;;  %v400_v1 = vshrl.u32 %v347_v55, 16  ;;  %v288_v7 = vld [vmem:[%s5781_s6 + $0x78] sm:$0xff] }
  0x8c   : > { %1927 = vmatpush1.bf16.msra.mxu1 %v5237_v26  ;;  %1517 = vmatpush1.bf16.msra.mxu0 %v5238_v27  ;;  %v377_v26 = vor.u32 %v375_v10, %v374_v17  ;;  %v524_v27 = vsel %vm5856_vm6, %v374_v17, %v523_v11  ;;  %v625_v39 = vld [vmem:[#allocation2 + $0x18] sm:$0x1]  ;;  %v287_v2 = vld [vmem:[%s5781_s6 + $0x70] sm:$0xff]  ;;  %v5267_v8 = vld [vmem:[#allocation7 + $0x180] ss:$12 sps:$4 sm:$0xff]   ;;  %s4566_s22 = scalar_lea.sflag [#allocation6], %s5775_s29 }
  0x8d   : > { %1928 = vmatprep.subr.bf16.mxu1 %v5569_v0  ;;  %1518 = vmatprep.subr.bf16.mxu0 %v5239_v28  ;;  %v346_v28 = vpack.c.bf16 %v284_v24, %v283_v20  ;;  %525 = vst [vmem:[#allocation2 + $0x38] sm:$0x1] %v524_v27  ;;  %v697_v47 = vshll.u32 %v625_v39, 16  ;;  %v547_v10 = vld [vmem:[#allocation2 + $0x78] sm:$0x1]  ;;  %v289_v11 = vld [vmem:[%s5781_s6 + $0x80] sm:$0xff] }
  0x8e   : > { %v5907_v62 = vld [vmem:[#allocation2 + $0x28] sm:$0x1]  ;;  %v402_v18 = vrot.slane %v400_v1, 7  ;;  %v5274_v20 = vld [vmem:[#allocation7 + $0x1a0] ss:$12 sps:$4 sm:$0xff]   ;;  %v292_v27 = vld [vmem:[%s5781_s6 + $0x98] sm:$0xff] }
  0x8f   : > { %v396_v53 = vshll.u32 %v346_v28, 16  ;;  %v699_v4 = vrot.slane %v697_v47, 1  ;;  %v290_v13 = vld [vmem:[%s5781_s6 + $0x88] sm:$0xff]  ;;  %v709_v19 = vshll.u32 %v5907_v62, 16  ;;  %v559_v39 = vld [vmem:[#allocation2 + $0x98] sm:$0x1] }
  0x90   : > { %1929 = vmatpush1.bf16.msra.mxu1 %v5241_v30  ;;  %1519 = vmatpush1.bf16.msra.mxu0 %v5242_v31  ;;  %v692_v30 = vshll.u32 %v5871_v12, 16  ;;  %v384_v31 = vor.u32 %v382_v14, %v381_v22  ;;  %v702_v14 = vshrl.u32 %v5876_v16, 16  ;;  %v5273_v17 = vld [vmem:[#allocation7 + $0x19c] ss:$12 sps:$4 sm:$0xff]   ;;  %v548_v24 = vsel %vm5856_vm6, %v402_v18, %v547_v10  ;;  %v5277_v47 = vld [vmem:[#allocation7 + $0x1b4] ss:$12 sps:$4 sm:$0xff]  }
  0x91   : > { %1930 = vmatprep.subr.bf16.mxu1 %v5569_v0  ;;  %1520 = vmatprep.subr.bf16.mxu0 %v5243_v32  ;;  %v530_v32 = vsel %vm5856_vm6, %v381_v22, %v529_v15  ;;  %v706_v15 = vrot.slane %v704_v58, 1  ;;  %v348_v22 = vpack.c.bf16 %v288_v7, %v287_v2  ;;  %549 = vst [vmem:[#allocation2 + $0x78] sm:$0x1] %v548_v24  ;;  %v5282_v1 = vld [vmem:[#allocation7 + $0x1d0] ss:$12 sps:$4 sm:$0xff]   ;;  %v297_v10 = vld [vmem:[%s5781_s6 + $0xc0] sm:$0xff] }
  0x92   : > { %531 = vst [vmem:[#allocation2 + $0x48] sm:$0x1] %v530_v32  ;;  %v5897_v40 = vsel %vm5850_vm5, %v384_v31, 0  ;;  %v694_v46 = vrot.slane %v692_v30, 1  ;;  %v5934_v30 = vld [vmem:[#allocation7 + $0x1b8] ss:$12 sps:$4 sm:$0xff]  }
  0x93   : > { %528 = vst [vmem:[#allocation2 + $0x40] sm:$0xff] %v5897_v40  ;;  %v407_v32 = vshrl.u32 %v348_v22, 16  ;;  %v295_v7 = vld [vmem:[%s5781_s6 + $0xb0] sm:$0xff]  ;;  %s5490_s17 = scalar_lea.vmem %s6990_s16, 4096  ;;  %p7059_p0 = scmp.ne.s32.totalorder %s7050_s23, 0 }
  0x94   : > { %1931 = vmatpush1.bf16.msra.mxu1 %v5245_v34  ;;  %1521 = vmatpush1.bf16.msra.mxu0 %v5246_v36  ;;  %v5261_v34 = vld [vmem:[#allocation7 + $0x158] ss:$12 sps:$4 sm:$0xff]   ;;  %v5891_v36 = vsel %vm5850_vm5, %v377_v26, 0  ;;  %v291_v26 = vld [vmem:[%s5781_s6 + $0x90] sm:$0xff]  ;;  %p5491_p11 = scmp.ne.s32.totalorder %s6990_s16, %s5490_s17  ;;  %s5570_s7 = smov [#allocation10]  }
  0x95   : > { %1932 = vmatprep.subr.bf16.mxu1 %v5569_v0  ;;  %1522 = vmatprep.subr.bf16.mxu0 %v5247_v37  ;;  %v393_v37 = vshrl.u32 %v346_v28, 16  ;;  %522 = vst [vmem:[#allocation2 + $0x30] sm:$0xff] %v5891_v36  ;;  %v5271_v28 = vld [vmem:[#allocation7 + $0x198] ss:$12 sps:$4 sm:$0xff]  }
  0x96   : > { %v5285_v24 = vld [vmem:[#allocation7 + $0x1e4] ss:$12 sps:$4 sm:$0xff]   ;;  %p5492_p1 = pnand %p5491_p11, %p7059_p0 }
  0x97   : > { %v395_v49 = vrot.slane %v393_v37, 7 }
  0x98   : > { %1933 = vmatpush1.bf16.msra.mxu1 %v5249_v41  ;;  %1523 = vmatpush1.bf16.msra.mxu0 %v5250_v45  ;;  %v389_v41 = vshll.u32 %v345_v23, 16  ;;  %v535_v45 = vld [vmem:[#allocation2 + $0x58] sm:$0x1]  ;;  %p5493_p3 = pneg %p5492_p1 }
  0x99   : > { %1934 = vmatprep.subr.bf16.mxu1 %v5569_v0  ;;  %1524 = vmatprep.subr.bf16.mxu0 %v5251_v48  ;;  %v388_v48 = vrot.slane %v386_v33, 7  ;;  %v398_v63 = vor.u32 %v396_v53, %v395_v49  ;;  %v542_v6 = vsel %vm5856_vm6, %v395_v49, %v541_v54  ;;  %v553_v33 = vld [vmem:[#allocation2 + $0x88] sm:$0x1]  ;;  %v714_v49 = vshrl.u32 %v5891_v36, 16 }
  0x9a   : > { %543 = vst [vmem:[#allocation2 + $0x68] sm:$0x1] %v542_v6 }
  0x9b   : > { %v391_v59 = vor.u32 %v389_v41, %v388_v48  ;;  %v536_v60 = vsel %vm5856_vm6, %v388_v48, %v535_v45  ;;  %v5920_v9 = vsel %vm5850_vm5, %v398_v63, 0  ;;  %v711_v41 = vrot.slane %v709_v19, 1  ;;  %v293_v45 = vld [vmem:[%s5781_s6 + $0xa0] sm:$0xff] }
  0x9c   : > { %1935 = vmatpush1.bf16.msra.mxu1 %v5253_v56  ;;  %1525 = vmatpush1.bf16.msra.mxu0 %v5254_v61  ;;  %v5266_v56 = vld [vmem:[#allocation7 + $0x168] ss:$12 sps:$4 sm:$0xff]   ;;  %537 = vst [vmem:[#allocation2 + $0x58] sm:$0x1] %v536_v60  ;;  %540 = vst [vmem:[#allocation2 + $0x60] sm:$0xff] %v5920_v9 }
  0x9d   : > { %1936 = vmatprep.subr.bf16.mxu1 %v5569_v0  ;;  %1526 = vmatprep.subr.bf16.mxu0 %v5255_v3  ;;  %v5270_v61 = vld [vmem:[#allocation7 + $0x188] ss:$12 sps:$4 sm:$0xff]   ;;  %v695_v3 = vor.u32 %v694_v46, %v690_v44  ;;  %v5912_v5 = vsel %vm5850_vm5, %v391_v59, 0  ;;  %v350_v44 = vpack.c.bf16 %v292_v27, %v291_v26 }
  0x9e   : > { %534 = vst [vmem:[#allocation2 + $0x50] sm:$0xff] %v5912_v5  ;;  %v294_v46 = vld [vmem:[%s5781_s6 + $0xa8] sm:$0xff] }
  0x9f   : > { %v700_v23 = vsel %vm676_vm0, %v695_v3, %v699_v4  ;;  %v421_v58 = vshrl.u32 %v350_v44, 16  ;;  %v351_v59 = vpack.c.bf16 %v294_v46, %v293_v45  ;;  %v565_v3 = vld [vmem:[#allocation2 + $0xa8] sm:$0x1]  ;;  %v424_v6 = vshll.u32 %v350_v44, 16  ;;  %v299_v45 = vld [vmem:[%s5781_s6 + $0xd0] sm:$0xff] }
  0xa0   : > { %1937 = vmatpush1.bf16.msra.mxu1 %v5257_v21  ;;  %1527 = vmatpush1.bf16.msra.mxu0 %v5258_v25  ;;  %v403_v21 = vshll.u32 %v347_v55, 16  ;;  %v349_v25 = vpack.c.bf16 %v290_v13, %v289_v11  ;;  %v5281_v55 = vld [vmem:[#allocation7 + $0x1cc] ss:$12 sps:$4 sm:$0xff]   ;;  %v728_v11 = vshll.u32 %v5897_v40, 16  ;;  %v5279_v13 = vld [vmem:[#allocation7 + $0x1c8] ss:$12 sps:$4 sm:$0xff]  }
  0xa1   : > { %1938 = vmatprep.subr.bf16.mxu1 %v5569_v0  ;;  %1528 = vmatprep.subr.bf16.mxu0 %v5259_v29  ;;  %v716_v29 = vshll.u32 %v5891_v36, 16  ;;  %v431_v19 = vshll.u32 %v351_v59, 16  ;;  %v577_v44 = vld [vmem:[#allocation2 + $0xc8] sm:$0x1]  ;;  %v740_v46 = vshll.u32 %v5912_v5, 16 }
  0xa2   : > { %v405_v31 = vor.u32 %v403_v21, %v402_v18  ;;  %v414_v37 = vshrl.u32 %v349_v25, 16  ;;  %v417_v38 = vshll.u32 %v349_v25, 16  ;;  %v428_v18 = vshrl.u32 %v351_v59, 16 }
  0xa4   : > { %1939 = vmatpush1.bf16.msra.mxu1 %v5261_v34  ;;  %1529 = vmatpush1.bf16.msra.mxu0 %v5262_v35  ;;  %v707_v34 = vor.u32 %v706_v15, %v702_v14  ;;  %v410_v35 = vshll.u32 %v348_v22, 16  ;;  %v5939_v42 = vsel %vm5850_vm5, %v405_v31, 0  ;;  %v416_v48 = vrot.slane %v414_v37, 7  ;;  %v298_v14 = vld [vmem:[%s5781_s6 + $0xc8] sm:$0xff]  ;;  %v571_v22 = vld [vmem:[#allocation2 + $0xb8] sm:$0x1] }
  0xa5   : > { %1940 = vmatprep.subr.bf16.mxu1 %v5569_v0  ;;  %1530 = vmatprep.subr.bf16.mxu0 %v5263_v43  ;;  %v409_v43 = vrot.slane %v407_v32, 7  ;;  %546 = vst [vmem:[#allocation2 + $0x70] sm:$0xff] %v5939_v42  ;;  %v5971_v15 = vld [vmem:[#allocation2 + $0x48] sm:$0x1]  ;;  %v430_v26 = vrot.slane %v428_v18, 7  ;;  %v353_v27 = vpack.c.bf16 %v298_v14, %v297_v10  ;;  %v738_v10 = vshrl.u32 %v5912_v5, 16 }
  0xa6   : > { %v712_v60 = vsel %vm676_vm0, %v707_v34, %v711_v41  ;;  %v733_v31 = vshll.u32 %v5971_v15, 16  ;;  %v5286_v32 = vld [vmem:[#allocation7 + $0x1e8] ss:$12 sps:$4 sm:$0xff]   ;;  %v5283_v34 = vld [vmem:[#allocation7 + $0x1e0] ss:$12 sps:$4 sm:$0xff]  }
  0xa7   : > { %v412_v53 = vor.u32 %v410_v35, %v409_v43  ;;  %v554_v54 = vsel %vm5856_vm6, %v409_v43, %v553_v33  ;;  %v433_v35 = vor.u32 %v431_v19, %v430_v26  ;;  %v572_v37 = vsel %vm5856_vm6, %v430_v26, %v571_v22  ;;  %v5289_v41 = vld [vmem:[#allocation7 + $0x1fc] ss:$12 sps:$4 sm:$0xff]   ;;  %v5294_v14 = vld [vmem:[#allocation7 + $0x218] ss:$12 sps:$4 sm:$0xff]  }
  0xa8   : > { %1941 = vmatpush1.bf16.msra.mxu1 %v5265_v50  ;;  %1531 = vmatpush1.bf16.msra.mxu0 %v5266_v56  ;;  %v5275_v50 = vld [vmem:[#allocation7 + $0x1b0] ss:$12 sps:$4 sm:$0xff]   ;;  %555 = vst [vmem:[#allocation2 + $0x88] sm:$0x1] %v554_v54  ;;  %v419_v56 = vor.u32 %v417_v38, %v416_v48  ;;  %573 = vst [vmem:[#allocation2 + $0xb8] sm:$0x1] %v572_v37 }
  0xa9   : > { %4889 = vmatprep.subr.bf16.mxu1 %v5270_v61  ;;  %1705 = vmatprep.subr.bf16.mxu0 %v5269_v57  ;;  %v560_v57 = vsel %vm5856_vm6, %v416_v48, %v559_v39  ;;  %v5956_v2 = vsel %vm5850_vm5, %v412_v53, 0  ;;  %v442_v48 = vshrl.u32 %v353_v27, 16  ;;  %v5994_v53 = vld [vmem:[#allocation2 + $0x58] sm:$0x1]  ;;  %v5290_v54 = vld [vmem:[#allocation7 + $0x200] ss:$12 sps:$4 sm:$0xff]  }
  0xaa   : > { %561 = vst [vmem:[#allocation2 + $0x98] sm:$0x1] %v560_v57  ;;  %552 = vst [vmem:[#allocation2 + $0x80] sm:$0xff] %v5956_v2  ;;  %v5961_v4 = vsel %vm5850_vm5, %v419_v56, 0  ;;  %v5287_v56 = vld [vmem:[#allocation7 + $0x1f8] ss:$12 sps:$4 sm:$0xff]  }
  0xab   : > { %1943 = vmatmul.mubr.bf16.vlgmr.msra.gmra.mrb[0].mxu1 %v5569_v0  ;;  %1533 = vmatmul.mubr.bf16.vlgmr.msra.gmra.mrb[0].mxu0 %v5569_v0  ;;  %v5943_v0 = vld [vmem:[#allocation2 + $0x38] sm:$0x1]  ;;  %558 = vst [vmem:[#allocation2 + $0x90] sm:$0xff] %v5961_v4  ;;  %v444_v59 = vrot.slane %v442_v48, 7  ;;  %v5291_v19 = vld [vmem:[#allocation7 + $0x210] ss:$12 sps:$4 sm:$0xff]  }
  0xac   : > { %4890 = vmatpush3.bf16.msra.mxu1 %v5270_v61  ;;  %1706 = vmatpush1.bf16.msra.mxu0 %v5267_v8  ;;  %v718_v61 = vrot.slane %v716_v29, 1  ;;  %v721_v63 = vshll.u32 %v5943_v0, 16  ;;  %v296_v8 = vld [vmem:[%s5781_s6 + $0xb8] sm:$0xff]  ;;  %v730_v29 = vrot.slane %v728_v11, 1  ;;  %v742_v11 = vrot.slane %v740_v46, 1 }
  0xad   : > { %1948 = vmatprep.mubr.bf16.mxu1 %v700_v23  ;;  %1540 = vmatprep.mubr.bf16.mxu0 %v700_v23  ;;  %v352_v23 = vpack.c.bf16 %v296_v8, %v295_v7  ;;  %v5293_v8 = vld [vmem:[#allocation7 + $0x214] ss:$12 sps:$4 sm:$0xff]   ;;  %v595_v26 = vld [vmem:[#allocation2 + $0xf8] sm:$0x1] }
  0xae   : > { %1707 = vmatprep.subr.bf16.mxu0 %v5273_v17  ;;  %4891 = vmatprep.subr.bf16.mxu1 %v5274_v20  ;;  %v423_v17 = vrot.slane %v421_v58, 7  ;;  %v723_v21 = vrot.slane %v721_v63, 1 }
  0xaf   : > { %v435_v33 = vshrl.u32 %v352_v23, 16  ;;  %v438_v38 = vshll.u32 %v352_v23, 16  ;;  %v303_v23 = vld [vmem:[%s5781_s6 + $0xf0] sm:$0xff] }
  0xb0   : > { %4892 = vmatpush3.bf16.msra.mxu1 %v5274_v20  ;;  %1708 = vmatpush1.bf16.msra.mxu0 %v5271_v28  ;;  %v719_v20 = vor.u32 %v718_v61, %v714_v49  ;;  %v426_v25 = vor.u32 %v424_v6, %v423_v17  ;;  %v726_v28 = vshrl.u32 %v5897_v40, 16  ;;  %v445_v49 = vshll.u32 %v353_v27, 16  ;;  %v302_v61 = vld [vmem:[%s5781_s6 + $0xe8] sm:$0xff] }
  0xb1   : > { %4893 = vmatprep.subr.bf16.mxu1 %v5934_v30  ;;  %1709 = vmatprep.subr.bf16.mxu0 %v5277_v47  ;;  %v437_v43 = vrot.slane %v435_v33, 7  ;;  %v5990_v47 = vsel %vm5850_vm5, %v433_v35, 0  ;;  %v5297_v27 = vld [vmem:[#allocation7 + $0x22c] ss:$12 sps:$4 sm:$0xff]  }
  0xb2   : > { %v724_v39 = vsel %vm676_vm0, %v719_v20, %v723_v21  ;;  %570 = vst [vmem:[#allocation2 + $0xb0] sm:$0xff] %v5990_v47  ;;  %v731_v63 = vor.u32 %v730_v29, %v726_v28  ;;  %v447_v6 = vor.u32 %v445_v49, %v444_v59 }
  0xb3   : > { %1949 = vmatmul.mubr.bf16.gmra.mrb[4].mxu1 %v5871_v12  ;;  %1541 = vmatmul.mubr.bf16.gmra.mrb[4].mxu0 %v5871_v12  ;;  %v566_v12 = vsel %vm5856_vm6, %v423_v17, %v565_v3  ;;  %v440_v57 = vor.u32 %v438_v38, %v437_v43  ;;  %v578_v58 = vsel %vm5856_vm6, %v437_v43, %v577_v44  ;;  %v6011_v17 = vld [vmem:[#allocation2] sm:$0xff]  ;;  %v752_v43 = vshll.u32 %v5920_v9, 16  ;;  %v5295_v44 = vld [vmem:[#allocation7 + $0x228] ss:$12 sps:$4 sm:$0xff]  }
  0xb4   : > { %1954 = vmatprep.mubr.bf16.mxu1 %v712_v60  ;;  %1550 = vmatprep.mubr.bf16.mxu0 %v712_v60  ;;  %567 = vst [vmem:[#allocation2 + $0xa8] sm:$0x1] %v566_v12  ;;  %v301_v60 = vld [vmem:[%s5781_s6 + $0xe0] sm:$0xff]  ;;  %579 = vst [vmem:[#allocation2 + $0xc8] sm:$0x1] %v578_v58  ;;  %v6016_v18 = vsel %vm5850_vm5, %v447_v6, %v6011_v17  ;;  %v764_v6 = vshll.u32 %v5939_v42, 16 }
  0xb5   : > { %1710 = vmatpush1.bf16.msra.mxu0 %v5275_v50  ;;  %4894 = vmatpush3.bf16.msra.mxu1 %v5934_v30  ;;  %v5980_v30 = vsel %vm5850_vm5, %v426_v25, 0  ;;  %v300_v50 = vld [vmem:[%s5781_s6 + $0xd8] sm:$0xff]  ;;  %v355_v22 = vpack.c.bf16 %v302_v61, %v301_v60  ;;  %582 = vst [vmem:[#allocation2 + $0xd0] sm:$0xff] %v6016_v18  ;;  %v589_v12 = vld [vmem:[#allocation2 + $0xe8] sm:$0x1]  ;;  %v754_v58 = vrot.slane %v752_v43, 1 }
  0xb6   : > { %1711 = vmatprep.subr.bf16.mxu0 %v5281_v55  ;;  %4895 = vmatprep.subr.bf16.mxu1 %v5282_v1  ;;  %564 = vst [vmem:[#allocation2 + $0xa0] sm:$0xff] %v5980_v30  ;;  %v583_v55 = vld [vmem:[#allocation2 + $0xd8] sm:$0x1]  ;;  %v354_v3 = vpack.c.bf16 %v300_v50, %v299_v45  ;;  %v601_v50 = vld [vmem:[#allocation2 + $0x108] sm:$0x1] }
  0xb7   : > { %v584_v7 = vsel %vm5856_vm6, %v444_v59, %v583_v55  ;;  %v456_v29 = vshrl.u32 %v355_v22, 16 }
  0xb8   : > { %585 = vst [vmem:[#allocation2 + $0xd8] sm:$0x1] %v584_v7  ;;  %v449_v20 = vshrl.u32 %v354_v3, 16  ;;  %v452_v21 = vshll.u32 %v354_v3, 16  ;;  %v6058_v7 = vld [vmem:[#allocation2 + $0x78] sm:$0x1] }
  0xb9   : > { %1712 = vmatpush1.bf16.msra.mxu0 %v5279_v13  ;;  %4896 = vmatpush3.bf16.msra.mxu1 %v5282_v1  ;;  %v735_v1 = vrot.slane %v733_v31, 1  ;;  %v745_v13 = vshll.u32 %v5994_v53, 16  ;;  %v459_v31 = vshll.u32 %v355_v22, 16  ;;  %v458_v38 = vrot.slane %v456_v29, 7 }
  0xba   : > { %1713 = vmatprep.subr.bf16.mxu0 %v5285_v24  ;;  %4897 = vmatprep.subr.bf16.mxu1 %v5286_v32  ;;  %v304_v24 = vld [vmem:[%s5781_s6 + $0xf8] sm:$0xff]  ;;  %v451_v28 = vrot.slane %v449_v20, 7  ;;  %v6066_v20 = vld [vmem:[#allocation2 + $0x88] sm:$0x1] }
  0xbb   : > { %1955 = vmatmul.mubr.bf16.gmra.mrb[8].mxu1 %v5876_v16  ;;  %1551 = vmatmul.mubr.bf16.gmra.mrb[8].mxu0 %v5876_v16  ;;  %v6004_v16 = vsel %vm5850_vm5, %v440_v57, 0  ;;  %v736_v25 = vsel %vm676_vm0, %v731_v63, %v735_v1  ;;  %v356_v33 = vpack.c.bf16 %v304_v24, %v303_v23  ;;  %v461_v46 = vor.u32 %v459_v31, %v458_v38 }
  0xbc   : > { %1962 = vmatprep.mubr.bf16.mxu1 %v724_v39  ;;  %1560 = vmatprep.mubr.bf16.mxu0 %v724_v39  ;;  %576 = vst [vmem:[#allocation2 + $0xc0] sm:$0xff] %v6004_v16  ;;  %v454_v35 = vor.u32 %v452_v21, %v451_v28  ;;  %v590_v37 = vsel %vm5856_vm6, %v451_v28, %v589_v12  ;;  %v750_v57 = vshrl.u32 %v5920_v9, 16  ;;  %v774_v21 = vshrl.u32 %v5956_v2, 16 }
  0xbd   : > { %1714 = vmatpush1.bf16.msra.mxu0 %v5283_v34  ;;  %4898 = vmatpush3.bf16.msra.mxu1 %v5286_v32  ;;  %v5298_v32 = vld [vmem:[#allocation7 + $0x230] ss:$12 sps:$4 sm:$0xff]   ;;  %v6024_v34 = vld [vmem:[#allocation2 + $0x68] sm:$0x1]  ;;  %v743_v39 = vor.u32 %v742_v11, %v738_v10  ;;  %591 = vst [vmem:[#allocation2 + $0xe8] sm:$0x1] %v590_v37  ;;  %v596_v48 = vsel %vm5856_vm6, %v458_v38, %v595_v26 }
  0xbe   : > { %1715 = vmatprep.subr.bf16.mxu0 %v5289_v41  ;;  %4899 = vmatprep.subr.bf16.mxu1 %v5290_v54  ;;  %v747_v41 = vrot.slane %v745_v13, 1  ;;  %v463_v45 = vshrl.u32 %v356_v33, 16  ;;  %v466_v49 = vshll.u32 %v356_v33, 16  ;;  %597 = vst [vmem:[#allocation2 + $0xf8] sm:$0x1] %v596_v48  ;;  %v757_v59 = vshll.u32 %v6024_v34, 16 }
  0xbf   : > { %v755_v1 = vor.u32 %v754_v58, %v750_v57  ;;  %v769_v11 = vshll.u32 %v6058_v7, 16  ;;  %v776_v13 = vshll.u32 %v5956_v2, 16  ;;  %v781_v23 = vshll.u32 %v6066_v20, 16  ;;  %v6074_v26 = vld [vmem:[#allocation2 + $0x98] sm:$0x1] }
  0xc0   : > { %v465_v55 = vrot.slane %v463_v45, 7  ;;  %v759_v3 = vrot.slane %v757_v59, 1  ;;  %v793_v31 = vshll.u32 %v6074_v26, 16  ;;  %v798_v37 = vshrl.u32 %v5980_v30, 16  ;;  %v6090_v45 = vld [vmem:[#allocation2 + $0xb8] sm:$0x1] }
  0xc1   : > { %1716 = vmatpush1.bf16.msra.mxu0 %v5287_v56  ;;  %4900 = vmatpush3.bf16.msra.mxu1 %v5290_v54  ;;  %v6040_v54 = vsel %vm5850_vm5, %v461_v46, %v6011_v17  ;;  %v748_v56 = vsel %vm676_vm0, %v743_v39, %v747_v41  ;;  %v778_v22 = vrot.slane %v776_v13, 1  ;;  %v783_v12 = vrot.slane %v781_v23, 1  ;;  %v6098_v57 = vld [vmem:[#allocation2 + $0xc8] sm:$0x1] }
  0xc2   : > { %1717 = vmatprep.subr.bf16.mxu0 %v5293_v8  ;;  %4901 = vmatprep.subr.bf16.mxu1 %v5294_v14  ;;  %594 = vst [vmem:[#allocation2 + $0xf0] sm:$0xff] %v6040_v54  ;;  %v468_v60 = vor.u32 %v466_v49, %v465_v55  ;;  %v602_v61 = vsel %vm5856_vm6, %v465_v55, %v601_v50  ;;  %v762_v8 = vshrl.u32 %v5939_v42, 16  ;;  %v795_v33 = vrot.slane %v793_v31, 1 }
  0xc3   : > { %1963 = vmatmul.mubr.bf16.gmra.mrb[12].mxu1 %v5891_v36  ;;  %1561 = vmatmul.mubr.bf16.gmra.mrb[12].mxu0 %v5891_v36  ;;  %v6032_v36 = vsel %vm5850_vm5, %v454_v35, %v6011_v17  ;;  %603 = vst [vmem:[#allocation2 + $0x108] sm:$0x1] %v602_v61  ;;  %v760_v10 = vsel %vm676_vm0, %v755_v1, %v759_v3  ;;  %v6082_v35 = vld [vmem:[#allocation2 + $0xa8] sm:$0x1]  ;;  %v810_v48 = vshrl.u32 %v5990_v47, 16  ;;  %v817_v50 = vshll.u32 %v6090_v45, 16 }
  0xc4   : > { %1970 = vmatprep.mubr.bf16.mxu1 %v736_v25  ;;  %1570 = vmatprep.mubr.bf16.mxu0 %v736_v25  ;;  %588 = vst [vmem:[#allocation2 + $0xe0] sm:$0xff] %v6032_v36  ;;  %v6054_v63 = vsel %vm5850_vm5, %v468_v60, %v6011_v17  ;;  %v779_v25 = vor.u32 %v778_v22, %v774_v21  ;;  %v805_v41 = vshll.u32 %v6082_v35, 16  ;;  %v822_v59 = vshrl.u32 %v6004_v16, 16 }
  0xc5   : > { %1718 = vmatpush1.bf16.msra.mxu0 %v5291_v19  ;;  %4902 = vmatpush3.bf16.msra.mxu1 %v5294_v14  ;;  %600 = vst [vmem:[#allocation2 + $0x100] sm:$0xff] %v6054_v63  ;;  %v771_v19 = vrot.slane %v769_v11, 1  ;;  %v819_v55 = vrot.slane %v817_v50, 1  ;;  %v829_v61 = vshll.u32 %v6098_v57, 16  ;;  %v836_v3 = vshll.u32 %v6016_v18, 16 }
  0xc6   : > { %1719 = vmatprep.subr.bf16.mxu0 %v5297_v27  ;;  %4903 = vmatprep.subr.bf16.mxu1 %v5298_v32  ;;  %v786_v27 = vshrl.u32 %v5961_v4, 16  ;;  %v784_v29 = vsel %vm676_vm0, %v779_v25, %v783_v12  ;;  %v807_v43 = vrot.slane %v805_v41, 1  ;;  %v846_v22 = vshrl.u32 %v6032_v36, 16  ;;  %v6122_v12 = vld [vmem:[#allocation2 + $0xf8] sm:$0x1] }
  0xc7   : > { %v831_v1 = vrot.slane %v829_v61, 1  ;;  %v860_v25 = vshll.u32 %v6040_v54, 16  ;;  %v865_v31 = vshll.u32 %v6122_v12, 16 }
  0xc9   : > { %1720 = vmatpush1.bf16.msra.mxu0 %v5295_v44  ;;  %4904 = vmatpush3.bf16.msra.mxu1 %v5298_v32  ;;  %v812_v44 = vshll.u32 %v5990_v47, 16 }
  0xca   : > { %4020 = vmatprep.subr.bf16.mxu0 %v6011_v17 }
  0xcb   : > { %1971 = vmatmul.mubr.bf16.gmra.mrb[16].mxu1 %v5897_v40  ;;  %1571 = vmatmul.mubr.bf16.gmra.mrb[16].mxu0 %v5897_v40  ;;  %v766_v40 = vrot.slane %v764_v6, 1  ;;  %v814_v49 = vrot.slane %v812_v44, 1  ;;  %v6106_v6 = vld [vmem:[#allocation2 + $0xd8] sm:$0x1] }
  0xcc   : > { %1978 = vmatprep.mubr.bf16.mxu1 %v748_v56  ;;  %1580 = vmatprep.mubr.bf16.mxu0 %v748_v56  ;;  %v824_v56 = vshll.u32 %v6004_v16, 16  ;;  %v841_v11 = vshll.u32 %v6106_v6, 16  ;;  %v6138_v44 = vld [vmem:[#allocation2 + $0x118] sm:$0x1] }
  0xcd   : > { %v767_v14 = vor.u32 %v766_v40, %v762_v8  ;;  %v838_v40 = vrot.slane %v836_v3, 1  ;;  %v889_v50 = vshll.u32 %v6138_v44, 16 }
  0xce   : > { %v826_v60 = vrot.slane %v824_v56, 1  ;;  %v843_v13 = vrot.slane %v841_v11, 1  ;;  %v658_v56 = vld [vmem:[#allocation2] sm:$0xfe] }
  0xcf   : > { %v772_v24 = vsel %vm676_vm0, %v767_v14, %v771_v19  ;;  %v848_v14 = vshll.u32 %v6032_v36, 16  ;;  %v6114_v19 = vld [vmem:[#allocation2 + $0xe8] sm:$0x1] }
  0xd1   : > { %v850_v23 = vrot.slane %v848_v14, 1 }
  0xd3   : > { %1979 = vmatmul.mubr.bf16.gmra.mrb[20].mxu1 %v5912_v5  ;;  %1581 = vmatmul.mubr.bf16.gmra.mrb[20].mxu0 %v5912_v5  ;;  %v788_v5 = vshll.u32 %v5961_v4, 16 }
  0xd4   : > { %1986 = vmatprep.mubr.bf16.mxu1 %v760_v10  ;;  %1590 = vmatprep.mubr.bf16.mxu0 %v760_v10  ;;  %v834_v10 = vshrl.u32 %v6016_v18, 16 }
  0xd5   : > { %v790_v28 = vrot.slane %v788_v5, 1 }
  0xd7   : > { %v791_v32 = vor.u32 %v790_v28, %v786_v27  ;;  %v858_v28 = vshrl.u32 %v6040_v54, 16 }
  0xd9   : > { %v796_v39 = vsel %vm676_vm0, %v791_v32, %v795_v33  ;;  %v872_v32 = vshll.u32 %v6054_v63, 16  ;;  %v6130_v33 = vld [vmem:[#allocation2 + $0x108] sm:$0x1] }
  0xda   : > { %v877_v41 = vshll.u32 %v6130_v33, 16 }
  0xdb   : > { %1987 = vmatmul.mubr.bf16.gmra.mrb[24].mxu1 %v5920_v9  ;;  %1591 = vmatmul.mubr.bf16.gmra.mrb[24].mxu0 %v5920_v9  ;;  %v800_v9 = vshll.u32 %v5980_v30, 16 }
  0xdc   : > { %1994 = vmatprep.mubr.bf16.mxu1 %v772_v24  ;;  %1600 = vmatprep.mubr.bf16.mxu0 %v772_v24  ;;  %v853_v24 = vshll.u32 %v6114_v19, 16 }
  0xdd   : > { %v802_v38 = vrot.slane %v800_v9, 1  ;;  %v867_v9 = vrot.slane %v865_v31, 1  ;;  %v665_v31 = vld [vmem:[#allocation2 + $0x70] sm:$0xfe] }
  0xde   : > { %v855_v5 = vrot.slane %v853_v24, 1 }
  0xe3   : > { %1995 = vmatmul.mubr.bf16.gmra.mrb[28].mxu1 %v5939_v42  ;;  %1601 = vmatmul.mubr.bf16.gmra.mrb[28].mxu0 %v5939_v42  ;;  %v803_v42 = vor.u32 %v802_v38, %v798_v37  ;;  %v870_v38 = vshrl.u32 %v6054_v63, 16 }
  0xe4   : > { %2002 = vmatprep.mubr.bf16.mxu1 %v784_v29  ;;  %1610 = vmatprep.mubr.bf16.mxu0 %v784_v29  ;;  %v862_v29 = vrot.slane %v860_v25, 1 }
  0xe5   : > { %v808_v46 = vsel %vm676_vm0, %v803_v42, %v807_v43  ;;  %v879_v42 = vrot.slane %v877_v41, 1  ;;  %v884_v43 = vshll.u32 %v6011_v17, 16  ;;  %v668_v41 = vld [vmem:[#allocation2 + $0xa0] sm:$0xfe] }
  0xeb   : > { %2003 = vmatmul.mubr.bf16.gmra.mrb[32].mxu1 %v5956_v2  ;;  %1611 = vmatmul.mubr.bf16.gmra.mrb[32].mxu0 %v5956_v2  ;;  %v815_v2 = vor.u32 %v814_v49, %v810_v48  ;;  %v882_v48 = vshrl.u32 %v6011_v17, 16  ;;  %v886_v49 = vrot.slane %v884_v43, 1 }
  0xec   : > { %2010 = vmatprep.mubr.bf16.mxu1 %v796_v39  ;;  %1620 = vmatprep.mubr.bf16.mxu0 %v796_v39  ;;  %v874_v39 = vrot.slane %v872_v32, 1  ;;  %v970_v32 = vrot.slane %v6058_v7, 1  ;;  %v976_v7 = vrot.slane %v6074_v26, 1  ;;  %v982_v26 = vrot.slane %v6090_v45, 1 }
  0xed   : > { %v820_v58 = vsel %vm676_vm0, %v815_v2, %v819_v55  ;;  %v891_v2 = vrot.slane %v889_v50, 1 }
  0xf3   : > { %2011 = vmatmul.mubr.bf16.gmra.mrb[36].mxu1 %v5961_v4  ;;  %1621 = vmatmul.mubr.bf16.gmra.mrb[36].mxu0 %v5961_v4  ;;  %v827_v4 = vor.u32 %v826_v60, %v822_v59  ;;  %v5396_v59 = vld [vmem:[#allocation2 + $0x8] sm:$0x1] }
  0xf4   : > { %2018 = vmatprep.mubr.bf16.mxu1 %v808_v46  ;;  %1630 = vmatprep.mubr.bf16.mxu0 %v808_v46  ;;  %v949_v60 = vrot.slane %v5396_v59, 1  ;;  %v672_v59 = vld [vmem:[#allocation2 + $0xe0] sm:$0xfe] }
  0xf5   : > { %v832_v8 = vsel %vm676_vm0, %v827_v4, %v831_v1  ;;  %v660_v4 = vld [vmem:[#allocation2 + $0x20] sm:$0xfe]  ;;  %v5397_v1 = vld [vmem:[#allocation2 + $0x18] sm:$0x1] }
  0xf6   : > { %v952_v3 = vrot.slane %v5397_v1, 1  ;;  %v673_v1 = vld [vmem:[#allocation2 + $0xf0] sm:$0xfe] }
  0xfb   : > { %2019 = vmatmul.mubr.bf16.gmra.mrb[40].mxu1 %v5980_v30  ;;  %1631 = vmatmul.mubr.bf16.gmra.mrb[40].mxu0 %v5980_v30  ;;  %v839_v30 = vor.u32 %v838_v40, %v834_v10  ;;  %v955_v10 = vrot.slane %v5907_v62, 1 }
  0xfc   : > { %2026 = vmatprep.mubr.bf16.mxu1 %v820_v58  ;;  %1640 = vmatprep.mubr.bf16.mxu0 %v820_v58  ;;  %v948_v58 = vrot.slane %v658_v56, 1  ;;  %v671_v56 = vld [vmem:[#allocation2 + $0xd0] sm:$0xfe] }
  0xfd   : > { %v844_v21 = vsel %vm676_vm0, %v839_v30, %v843_v13  ;;  %v661_v30 = vld [vmem:[#allocation2 + $0x30] sm:$0xfe]  ;;  %v662_v13 = vld [vmem:[#allocation2 + $0x40] sm:$0xfe]  ;;  %v987_v45 = vrot.slane %v671_v56, 1 }
  0xfe   : > { %v950_v61 = vsel %vm947_vm7, %v948_v58, %v949_v60  ;;  %v957_v14 = vrot.slane %v661_v30, 1  ;;  %v5299_v58 = vld [vmem:[#allocation9 + $0x8] ss:$12 sps:$4 sm:$0xff]   ;;  %v988_v60 = vrot.slane %v6106_v6, 1  ;;  %v993_v6 = vrot.slane %v673_v1, 1 }
  0xff   : > { %v5342_v1 = vld [vmem:[#allocation9 + $0xf8] ss:$12 sps:$4 sm:$0xff]  }
 0x103   : > { %2027 = vmatmul.mubr.bf16.gmra.mrb[44].mxu1 %v5990_v47  ;;  %1641 = vmatmul.mubr.bf16.gmra.mrb[44].mxu0 %v5990_v47  ;;  %v851_v47 = vor.u32 %v850_v23, %v846_v22  ;;  %v960_v22 = vrot.slane %v662_v13, 1  ;;  %v961_v23 = vrot.slane %v5971_v15, 1 }
 0x104   : > { %2034 = vmatprep.mubr.bf16.mxu1 %v832_v8  ;;  %1650 = vmatprep.mubr.bf16.mxu0 %v832_v8 }
 0x105   : > { %v856_v27 = vsel %vm676_vm0, %v851_v47, %v855_v5  ;;  %v962_v62 = vsel %vm947_vm7, %v960_v22, %v961_v23  ;;  %v663_v47 = vld [vmem:[#allocation2 + $0x50] sm:$0xfe]  ;;  %v664_v5 = vld [vmem:[#allocation2 + $0x60] sm:$0xfe]  ;;  %v5306_v22 = vld [vmem:[#allocation9 + $0x1c] ss:$12 sps:$4 sm:$0xff]  }
 0x106   : > { %v963_v25 = vrot.slane %v663_v47, 1  ;;  %v1000_v23 = vrot.slane %v6138_v44, 1 }
 0x10b   : > { %2035 = vmatmul.mubr.bf16.gmra.mrb[48].mxu1 %v6004_v16  ;;  %1651 = vmatmul.mubr.bf16.gmra.mrb[48].mxu0 %v6004_v16  ;;  %v863_v16 = vor.u32 %v862_v29, %v858_v28  ;;  %v967_v28 = vrot.slane %v6024_v34, 1 }
 0x10c   : > { %2042 = vmatprep.mubr.bf16.mxu1 %v844_v21  ;;  %1660 = vmatprep.mubr.bf16.mxu0 %v844_v21  ;;  %v958_v21 = vrot.slane %v5943_v0, 1  ;;  %v966_v0 = vrot.slane %v664_v5, 1  ;;  %v5311_v5 = vld [vmem:[#allocation9 + $0x48] ss:$12 sps:$4 sm:$0xff]  }
 0x10d   : > { %v868_v37 = vsel %vm676_vm0, %v863_v16, %v867_v9  ;;  %v666_v16 = vld [vmem:[#allocation2 + $0x80] sm:$0xfe]  ;;  %v969_v9 = vrot.slane %v665_v31, 1 }
 0x10e   : > { %v959_v24 = vsel %vm947_vm7, %v957_v14, %v958_v21  ;;  %v968_v15 = vsel %vm947_vm7, %v966_v0, %v967_v28  ;;  %v675_v14 = vld [vmem:[#allocation2 + $0x110] sm:$0xfe]  ;;  %v5304_v21 = vld [vmem:[#allocation9 + $0x18] ss:$12 sps:$4 sm:$0xff]   ;;  %v5314_v0 = vld [vmem:[#allocation9 + $0x60] ss:$12 sps:$4 sm:$0xff]  }
 0x10f   : > { %v5316_v28 = vld [vmem:[#allocation9 + $0x64] ss:$12 sps:$4 sm:$0xff]  }
 0x113   : > { %2043 = vmatmul.mubr.bf16.gmra.mrb[52].mxu1 %v6016_v18  ;;  %1661 = vmatmul.mubr.bf16.gmra.mrb[52].mxu0 %v6016_v18  ;;  %v875_v18 = vor.u32 %v874_v39, %v870_v38  ;;  %v6169_v38 = vsel %vm947_vm7, %v969_v9, %v970_v32  ;;  %v667_v39 = vld [vmem:[#allocation2 + $0x90] sm:$0xfe]  ;;  %v5318_v9 = vld [vmem:[#allocation9 + $0x78] ss:$12 sps:$4 sm:$0xff]   ;;  %v5320_v32 = vld [vmem:[#allocation9 + $0x7c] ss:$12 sps:$4 sm:$0xff]  }
 0x114   : > { %2050 = vmatprep.mubr.bf16.mxu1 %v856_v27  ;;  %1670 = vmatprep.mubr.bf16.mxu0 %v856_v27  ;;  %v964_v27 = vrot.slane %v5994_v53, 1  ;;  %v972_v53 = vrot.slane %v666_v16, 1 }
 0x115   : > { %v880_v46 = vsel %vm676_vm0, %v875_v18, %v879_v42  ;;  %v975_v18 = vrot.slane %v667_v39, 1  ;;  %v978_v42 = vrot.slane %v668_v41, 1  ;;  %v5322_v39 = vld [vmem:[#allocation9 + $0x90] ss:$12 sps:$4 sm:$0xff]   ;;  %v5329_v41 = vld [vmem:[#allocation9 + $0x98] ss:$12 sps:$4 sm:$0xff]  }
 0x116   : > { %v965_v29 = vsel %vm947_vm7, %v963_v25, %v964_v27  ;;  %v5313_v25 = vld [vmem:[#allocation9 + $0x4c] ss:$12 sps:$4 sm:$0xff]   ;;  %v5317_v27 = vld [vmem:[#allocation9 + $0x50] ss:$12 sps:$4 sm:$0xff]  }
 0x117   : > { %v6180_v43 = vsel %vm947_vm7, %v975_v18, %v976_v7 }
 0x11b   : > { %2051 = vmatmul.mubr.bf16.gmra.mrb[56].mxu1 %v6032_v36  ;;  %1671 = vmatmul.mubr.bf16.gmra.mrb[56].mxu0 %v6032_v36  ;;  %v887_v36 = vor.u32 %v886_v49, %v882_v48  ;;  %v669_v48 = vld [vmem:[#allocation2 + $0xb0] sm:$0xfe]  ;;  %v670_v49 = vld [vmem:[#allocation2 + $0xc0] sm:$0xfe] }
 0x11c   : > { %2058 = vmatprep.mubr.bf16.mxu1 %v868_v37  ;;  %1680 = vmatprep.mubr.bf16.mxu0 %v868_v37  ;;  %v973_v37 = vrot.slane %v6066_v20, 1  ;;  %v979_v20 = vrot.slane %v6082_v35, 1  ;;  %v981_v50 = vrot.slane %v669_v48, 1  ;;  %v985_v35 = vrot.slane %v6098_v57, 1 }
 0x11d   : > { %v892_v55 = vsel %vm676_vm0, %v887_v36, %v891_v2  ;;  %v984_v36 = vrot.slane %v670_v49, 1  ;;  %v990_v57 = vrot.slane %v672_v59, 1  ;;  %v5332_v49 = vld [vmem:[#allocation9 + $0xc4] ss:$12 sps:$4 sm:$0xff]   ;;  %v5341_v59 = vld [vmem:[#allocation9 + $0xe0] ss:$12 sps:$4 sm:$0xff]  }
 0x11e   : > { %v6172_v34 = vsel %vm947_vm7, %v972_v53, %v973_v37  ;;  %v6191_v2 = vsel %vm947_vm7, %v981_v50, %v982_v26  ;;  %v5325_v53 = vld [vmem:[#allocation9 + $0x80] ss:$12 sps:$4 sm:$0xff]  }
 0x11f   : > { %v5330_v26 = vld [vmem:[#allocation9 + $0xc0] ss:$12 sps:$4 sm:$0xff]  }
 0x123   : > { %2059 = vmatmul.mubr.bf16.gmra.mrb[60].mxu1 %v6040_v54  ;;  %1681 = vmatmul.mubr.bf16.gmra.mrb[60].mxu0 %v6040_v54  ;;  %v659_v54 = vld [vmem:[#allocation2 + $0x10] sm:$0xfe] }
 0x124   : > { %2066 = vmatprep.mubr.bf16.mxu1 %v880_v46  ;;  %1690 = vmatprep.mubr.bf16.mxu0 %v880_v46  ;;  %v951_v8 = vrot.slane %v659_v54, 1  ;;  %v6183_v46 = vsel %vm947_vm7, %v978_v42, %v979_v20  ;;  %v6203_v54 = vsel %vm947_vm7, %v987_v45, %v988_v60  ;;  %v5326_v42 = vld [vmem:[#allocation9 + $0xa8] ss:$12 sps:$4 sm:$0xff]   ;;  %v5328_v20 = vld [vmem:[#allocation9 + $0xac] ss:$12 sps:$4 sm:$0xff]  }
 0x125   : > { %v5340_v60 = vld [vmem:[#allocation9 + $0xf4] ss:$12 sps:$4 sm:$0xff]  }
 0x126   : > { %v953_v40 = vsel %vm947_vm7, %v951_v8, %v952_v3  ;;  %v5300_v3 = vld [vmem:[#allocation9] ss:$12 sps:$4 sm:$0xff]   ;;  %v5302_v8 = vld [vmem:[#allocation9 + $0x4] ss:$12 sps:$4 sm:$0xff]  }
 0x127   : > { %3610 = vmatprep.subr.bf16.mxu1 %v5302_v8 }
 0x12b   : > { %2067 = vmatmul.mubr.bf16.gmra.mrb[64].mxu1 %v6054_v63  ;;  %1691 = vmatmul.mubr.bf16.gmra.mrb[64].mxu0 %v6054_v63  ;;  %v954_v63 = vrot.slane %v660_v4, 1 }
 0x12c   : > { %2074 = vmatprep.mubr.bf16.mxu1 %v892_v55  ;;  %1698 = vmatprep.mubr.bf16.mxu0 %v892_v55  ;;  %v6194_v55 = vsel %vm947_vm7, %v984_v36, %v985_v35  ;;  %v5337_v36 = vld [vmem:[#allocation9 + $0xc8] ss:$12 sps:$4 sm:$0xff]  }
 0x12d   : > { %v956_v11 = vsel %vm947_vm7, %v954_v63, %v955_v10  ;;  %v674_v63 = vld [vmem:[#allocation2 + $0x100] sm:$0xfe] }
 0x12e   : > { %v996_v10 = vrot.slane %v674_v63, 1  ;;  %v5343_v63 = vld [vmem:[#allocation9 + $0x108] ss:$12 sps:$4 sm:$0xff]  }
 0x133   : > { %2075 = vmatmul.mubr.bf16.gmra.mrb[68].mxu1 %v6011_v17  ;;  %1699 = vmatmul.mubr.bf16.gmra.mrb[68].mxu0 %v6011_v17 }
 0x134   : > { %4905 = vmatprep.mubr.bf16.mxu1 %v950_v61  ;;  %1737 = vmatprep.mubr.bf16.mxu0 %v6011_v17 }
 0x13b   : > { %4906 = vmatmul.mubr.bf16.vlgmr.msra.gmra.mrb[72].mxu1 %v953_v40  ;;  %1738 = vmatmul.mubr.bf16.vlgmr.msra.gmra.mrb[0].mxu0 %v950_v61  ;;  %v991_v61 = vrot.slane %v6114_v19, 1  ;;  %v994_v19 = vrot.slane %v6122_v12, 1  ;;  %v5309_v12 = vld [vmem:[#allocation9 + $0x34] ss:$12 sps:$4 sm:$0xff]  }
 0x13c   : > { %4909 = vmatprep.mubr.bf16.mxu1 %v956_v11  ;;  %1745 = vmatprep.mubr.bf16.mxu0 %v6011_v17 }
 0x13d   : > { %4021 = vmatpush1.bf16.msra.mxu0 %v5299_v58  ;;  %v6206_v4 = vsel %vm947_vm7, %v990_v57, %v991_v61  ;;  %3611 = vmatpush1.bf16.msra.mxu1 %v5300_v3  ;;  %v6214_v30 = vsel %vm947_vm7, %v993_v6, %v994_v19  ;;  %v5334_v58 = vld [vmem:[#allocation9 + $0xd8] ss:$12 sps:$4 sm:$0xff]   ;;  %v5338_v61 = vld [vmem:[#allocation9 + $0xf0] ss:$12 sps:$4 sm:$0xff]  }
 0x13e   : > { %4022 = vmatprep.subr.bf16.mxu0 %v6011_v17  ;;  %3612 = vmatprep.subr.bf16.mxu1 %v5306_v22  ;;  %v5346_v6 = vld [vmem:[#allocation9 + $0x110] ss:$12 sps:$4 sm:$0xff]   ;;  %v6255_v19 = vld [vmem:[#allocation2] sm:$0xff] }
 0x141   : > { %3613 = vmatpush1.bf16.msra.mxu1 %v5304_v21  ;;  %v5350_v21 = vld [vmem:[#allocation9 + $0x128] ss:$12 sps:$4 sm:$0xff]  }
 0x142   : > { %3614 = vmatprep.subr.bf16.mxu1 %v5309_v12  ;;  %v5351_v12 = vld [vmem:[#allocation9 + $0x138] ss:$12 sps:$4 sm:$0xff]  }
 0x143   : > { %4910 = vmatmul.mubr.bf16.gmra.mrb[76].mxu1 %v959_v24  ;;  %1746 = vmatmul.mubr.bf16.gmra.mrb[4].mxu0 %v953_v40  ;;  %v997_v40 = vrot.slane %v6130_v33, 1  ;;  %v999_v33 = vrot.slane %v675_v14, 1  ;;  %v5347_v14 = vld [vmem:[#allocation9 + $0x120] ss:$12 sps:$4 sm:$0xff]  }
 0x144   : > { %4913 = vmatprep.mubr.bf16.mxu1 %v962_v62  ;;  %1755 = vmatprep.mubr.bf16.mxu0 %v6011_v17 }
 0x145   : > { %v6217_v13 = vsel %vm947_vm7, %v996_v10, %v997_v40  ;;  %v6226_v47 = vsel %vm947_vm7, %v999_v33, %v1000_v23  ;;  %v5349_v40 = vld [vmem:[#allocation9 + $0x124] ss:$12 sps:$4 sm:$0xff]   ;;  %v5354_v33 = vld [vmem:[#allocation9 + $0x140] ss:$12 sps:$4 sm:$0xff]  }
 0x14b   : > { %4914 = vmatmul.mubr.bf16.gmra.mrb[80].mxu1 %v965_v29  ;;  %1756 = vmatmul.mubr.bf16.gmra.mrb[8].mxu0 %v956_v11  ;;  %v5303_v11 = vld [vmem:[#allocation9 + $0x20] ss:$12 sps:$4 sm:$0xff]  }
 0x14c   : > { %4917 = vmatprep.mubr.bf16.mxu1 %v968_v15  ;;  %1765 = vmatprep.mubr.bf16.mxu0 %v6011_v17 }
 0x14d   : > { %4023 = vmatpush1.bf16.msra.mxu0 %v5303_v11 }
 0x14e   : > { %4024 = vmatprep.subr.bf16.mxu0 %v6011_v17 }
 0x153   : > { %4918 = vmatmul.mubr.bf16.gmra.mrb[84].mxu1 %v6169_v38  ;;  %1766 = vmatmul.mubr.bf16.gmra.mrb[12].mxu0 %v959_v24  ;;  %v5307_v24 = vld [vmem:[#allocation9 + $0x30] ss:$12 sps:$4 sm:$0xff]  }
 0x154   : > { %4921 = vmatprep.mubr.bf16.mxu1 %v6172_v34  ;;  %1775 = vmatprep.mubr.bf16.mxu0 %v6011_v17 }
 0x155   : > { %3615 = vmatpush1.bf16.msra.mxu1 %v5307_v24 }
 0x156   : > { %3616 = vmatprep.subr.bf16.mxu1 %v5313_v25  ;;  %v5355_v25 = vld [vmem:[#allocation9 + $0x150] ss:$12 sps:$4 sm:$0xff]  }
 0x159   : > { %3617 = vmatpush1.bf16.msra.mxu1 %v5311_v5 }
 0x15a   : > { %3618 = vmatprep.subr.bf16.mxu1 %v5316_v28  ;;  %v5361_v28 = vld [vmem:[#allocation9 + $0x16c] ss:$12 sps:$4 sm:$0xff]  }
 0x15b   : > { %4922 = vmatmul.mubr.bf16.gmra.mrb[88].mxu1 %v6180_v43  ;;  %1776 = vmatmul.mubr.bf16.gmra.mrb[16].mxu0 %v962_v62  ;;  %v5310_v62 = vld [vmem:[#allocation9 + $0x38] ss:$12 sps:$4 sm:$0xff]  }
 0x15c   : > { %4925 = vmatprep.mubr.bf16.mxu1 %v6183_v46  ;;  %1785 = vmatprep.mubr.bf16.mxu0 %v6011_v17 }
 0x15d   : > { %4025 = vmatpush1.bf16.msra.mxu0 %v5310_v62  ;;  %3619 = vmatpush1.bf16.msra.mxu1 %v5314_v0  ;;  %v5357_v62 = vld [vmem:[#allocation9 + $0x154] ss:$12 sps:$4 sm:$0xff]   ;;  %v2735_v0 = vld [vmem:[#allocation3 + $0x8] sm:$0x1] }
 0x15e   : > { %4026 = vmatprep.subr.bf16.mxu0 %v6011_v17  ;;  %3620 = vmatprep.subr.bf16.mxu1 %v5320_v32 }
 0x161   : > { %4027 = vmatpush1.bf16.msra.mxu0 %v5317_v27  ;;  %3621 = vmatpush1.bf16.msra.mxu1 %v5318_v9  ;;  %v5362_v9 = vld [vmem:[#allocation9 + $0x170] ss:$12 sps:$4 sm:$0xff]  }
 0x162   : > { %4028 = vmatprep.subr.bf16.mxu0 %v6011_v17 }
 0x163   : > { %4926 = vmatmul.mubr.bf16.gmra.mrb[92].mxu1 %v6191_v2  ;;  %1786 = vmatmul.mubr.bf16.gmra.mrb[20].mxu0 %v965_v29 }
 0x164   : > { %4929 = vmatprep.mubr.bf16.mxu1 %v6194_v55  ;;  %1795 = vmatprep.mubr.bf16.mxu0 %v6011_v17 }
 0x16b   : > { %4930 = vmatmul.mubr.bf16.gmra.mrb[96].mxu1 %v6203_v54  ;;  %1796 = vmatmul.mubr.bf16.gmra.mrb[24].mxu0 %v968_v15  ;;  %v5321_v15 = vld [vmem:[#allocation9 + $0x68] ss:$12 sps:$4 sm:$0xff]  }
 0x16c   : > { %4933 = vmatprep.mubr.bf16.mxu1 %v6206_v4  ;;  %1805 = vmatprep.mubr.bf16.mxu0 %v6011_v17 }
 0x16d   : > { %4029 = vmatpush1.bf16.msra.mxu0 %v5321_v15 }
 0x16e   : > { %4030 = vmatprep.subr.bf16.mxu0 %v6011_v17 }
 0x171   : > { %4031 = vmatpush1.bf16.msra.mxu0 %v5325_v53 }
 0x172   : > { %4032 = vmatprep.subr.bf16.mxu0 %v6011_v17 }
 0x173   : > { %4934 = vmatmul.mubr.bf16.gmra.mrb[100].mxu1 %v6214_v30  ;;  %1806 = vmatmul.mubr.bf16.gmra.mrb[28].mxu0 %v6169_v38  ;;  %v5324_v38 = vld [vmem:[#allocation9 + $0x94] ss:$12 sps:$4 sm:$0xff]  }
 0x174   : > { %4937 = vmatprep.mubr.bf16.mxu1 %v6217_v13  ;;  %1815 = vmatprep.mubr.bf16.mxu0 %v6011_v17 }
 0x175   : > { %3622 = vmatprep.subr.bf16.mxu1 %v5324_v38  ;;  %4033 = vmatpush1.bf16.msra.mxu0 %v5329_v41 }
 0x176   : > { %3623 = vmatpush1.bf16.msra.mxu1 %v5322_v39  ;;  %4034 = vmatprep.subr.bf16.mxu0 %v6011_v17 }
 0x177   : > { %3624 = vmatprep.subr.bf16.mxu1 %v5328_v20 }
 0x17a   : > { %3625 = vmatpush1.bf16.msra.mxu1 %v5326_v42 }
 0x17b   : > { %4938 = vmatmul.mubr.bf16.gmra.mrb[104].mxu1 %v6226_v47  ;;  %1816 = vmatmul.mubr.bf16.gmra.mrb[32].mxu0 %v6172_v34 }
 0x17c   : > { %1825 = vmatprep.mubr.bf16.mxu0 %v6011_v17  ;;  %3626 = vmatprep.subr.bf16.mxu1 %v5332_v49 }
 0x17e   : > { %v1944_v44 = vpop.f32.mrb[0].mxu1  ;;  %3627 = vmatpush1.bf16.msra.mxu1 %v5330_v26  ;;  %v5365_v26 = vld [vmem:[#allocation9 + $0x184] ss:$12 sps:$4 sm:$0xff]  }
 0x17f   : > { %v1945_v29 = vpop.f32.mrb[1].mxu1  ;;  %v5358_v44 = vld [vmem:[#allocation9 + $0x158] ss:$12 sps:$4 sm:$0xff]  }
 0x180   : > { %v1946_v31 = vpop.f32.mrb[2].mxu1  ;;  %v2789_v29 = vshrl.u32 %v6255_v19, 16 }
 0x181   : > { %v1947_v16 = vpop.f32.mrb[3].mxu1  ;;  %v2796_v31 = vshll.u32 %v2735_v0, 16 }
 0x182   : > { %v5359_v16 = vld [vmem:[#allocation9 + $0x168] ss:$12 sps:$4 sm:$0xff]  }
 0x183   : > { %1826 = vmatmul.mubr.bf16.gmra.mrb[36].mxu0 %v6180_v43  ;;  %v5333_v43 = vld [vmem:[#allocation9 + $0xb0] ss:$12 sps:$4 sm:$0xff]   ;;  %v2798_v53 = vrot.slane %v2796_v31, 1  ;;  %v5374_v31 = vld [vmem:[#allocation9 + $0x1cc] ss:$12 sps:$4 sm:$0xff]  }
 0x184   : > { %1835 = vmatprep.mubr.bf16.mxu0 %v6011_v17  ;;  %4035 = vmatpush1.bf16.msra.mxu0 %v5333_v43 }
 0x185   : > { %4036 = vmatprep.subr.bf16.mxu0 %v6011_v17 }
 0x186   : > { %v1950_v37 = vpop.f32.mrb[4].mxu1 }
 0x187   : > { %v1951_v34 = vpop.f32.mrb[5].mxu1 }
 0x188   : > { %v1952_v18 = vpop.f32.mrb[6].mxu1  ;;  %4037 = vmatpush1.bf16.msra.mxu0 %v5337_v36 }
 0x189   : > { %v1953_v7 = vpop.f32.mrb[7].mxu1  ;;  %4038 = vmatprep.subr.bf16.mxu0 %v6011_v17 }
 0x18b   : > { %1836 = vmatmul.mubr.bf16.gmra.mrb[40].mxu0 %v6183_v46  ;;  %v5336_v46 = vld [vmem:[#allocation9 + $0xdc] ss:$12 sps:$4 sm:$0xff]  }
 0x18c   : > { %1845 = vmatprep.mubr.bf16.mxu0 %v6011_v17  ;;  %3628 = vmatprep.subr.bf16.mxu1 %v5336_v46 }
 0x18d   : > { %3629 = vmatpush1.bf16.msra.mxu1 %v5334_v58  ;;  %4039 = vmatpush1.bf16.msra.mxu0 %v5341_v59 }
 0x18e   : > { %v6240_v48 = vpop.f32.mrb[8].mxu1  ;;  %4040 = vmatprep.subr.bf16.mxu0 %v6011_v17  ;;  %3630 = vmatprep.subr.bf16.mxu1 %v5340_v60 }
 0x18f   : > { %v1958_v50 = vpop.f32.mrb[9].mxu1 }
 0x190   : > { %v6243_v35 = vpop.f32.mrb[10].mxu1 }
 0x191   : > { %v1961_v56 = vpop.f32.mrb[11].mxu1  ;;  %3631 = vmatpush1.bf16.msra.mxu1 %v5338_v61  ;;  %4041 = vmatpush1.bf16.msra.mxu0 %v5342_v1  ;;  %v5368_v61 = vld [vmem:[#allocation9 + $0x19c] ss:$12 sps:$4 sm:$0xff]  }
 0x192   : > { %4042 = vmatprep.subr.bf16.mxu0 %v6011_v17 }
 0x193   : > { %1846 = vmatmul.mubr.bf16.gmra.mrb[44].mxu0 %v6191_v2  ;;  %v5345_v2 = vld [vmem:[#allocation9 + $0x10c] ss:$12 sps:$4 sm:$0xff]  }
 0x194   : > { %1855 = vmatprep.mubr.bf16.mxu0 %v6011_v17  ;;  %3632 = vmatprep.subr.bf16.mxu1 %v5345_v2 }
 0x195   : > { %3633 = vmatpush1.bf16.msra.mxu1 %v5343_v63  ;;  %4043 = vmatpush1.bf16.msra.mxu0 %v5346_v6 }
 0x196   : > { %v6248_v45 = vpop.f32.mrb[12].mxu1  ;;  %4044 = vmatprep.subr.bf16.mxu0 %v6255_v19  ;;  %3634 = vmatprep.subr.bf16.mxu1 %v5349_v40 }
 0x197   : > { %v1966_v57 = vpop.f32.mrb[13].mxu1 }
 0x198   : > { %v6251_v3 = vpop.f32.mrb[14].mxu1 }
 0x199   : > { %v1969_v8 = vpop.f32.mrb[15].mxu1  ;;  %3635 = vmatpush1.bf16.msra.mxu1 %v5347_v14  ;;  %4045 = vmatpush1.bf16.msra.mxu0 %v5350_v21  ;;  %v5369_v21 = vld [vmem:[#allocation9 + $0x1b0] ss:$12 sps:$4 sm:$0xff]  }
 0x19a   : > { %4046 = vmatprep.subr.bf16.mxu0 %v6255_v19 }
 0x19b   : > { %1856 = vmatmul.mubr.bf16.gmra.mrb[48].mxu0 %v6194_v55  ;;  %v5353_v55 = vld [vmem:[#allocation9 + $0x13c] ss:$12 sps:$4 sm:$0xff]  }
 0x19c   : > { %1865 = vmatprep.mubr.bf16.mxu0 %v6255_v19  ;;  %3636 = vmatprep.subr.bf16.mxu1 %v5353_v55 }
 0x19d   : > { %3637 = vmatpush1.bf16.msra.mxu1 %v5351_v12  ;;  %4047 = vmatpush1.bf16.msra.mxu0 %v5354_v33 }
 0x19e   : > { %v6258_v10 = vpop.f32.mrb[16].mxu1  ;;  %4048 = vmatprep.subr.bf16.mxu0 %v6255_v19  ;;  %3638 = vmatprep.subr.bf16.mxu1 %v5357_v62 }
 0x19f   : > { %v1974_v11 = vpop.f32.mrb[17].mxu1 }
 0x1a0   : > { %v6261_v22 = vpop.f32.mrb[18].mxu1 }
 0x1a1   : > { %v1977_v17 = vpop.f32.mrb[19].mxu1  ;;  %3639 = vmatpush1.bf16.msra.mxu1 %v5355_v25  ;;  %4049 = vmatpush1.bf16.msra.mxu0 %v5358_v44 }
 0x1a2   : > { %4050 = vmatprep.subr.bf16.mxu0 %v6255_v19  ;;  %3640 = vmatprep.subr.bf16.mxu1 %v5361_v28  ;;  %v5371_v17 = vld [vmem:[#allocation9 + $0x1b4] ss:$12 sps:$4 sm:$0xff]  }
 0x1a3   : > { %1866 = vmatmul.mubr.bf16.gmra.mrb[52].mxu0 %v6203_v54  ;;  %v2791_v54 = vshll.u32 %v6255_v19, 16 }
 0x1a4   : > { %1875 = vmatprep.mubr.bf16.mxu0 %v6255_v19 }
 0x1a5   : > { %v2793_v15 = vrot.slane %v2791_v54, 1  ;;  %3641 = vmatpush1.bf16.msra.mxu1 %v5359_v16  ;;  %4051 = vmatpush1.bf16.msra.mxu0 %v5362_v9 }
 0x1a6   : > { %v6266_v23 = vpop.f32.mrb[20].mxu1  ;;  %3815 = vmatprep.subr.bf16.mxu1 %v5365_v26 }
 0x1a7   : > { %v1982_v24 = vpop.f32.mrb[21].mxu1  ;;  %v2794_v32 = vor.u32 %v2793_v15, %v2789_v29  ;;  %v5372_v15 = vld [vmem:[#allocation9 + $0x1c8] ss:$12 sps:$4 sm:$0xff]  }
 0x1a8   : > { %v6269_v5 = vpop.f32.mrb[22].mxu1 }
 0x1a9   : > { %v1985_v27 = vpop.f32.mrb[23].mxu1  ;;  %v2799_v34 = vsel %vm676_vm0, %v2794_v32, %v2798_v53 }
 0x1aa   : > { %3642 = vmatprep.mubr.bf16.mxu1 %v2799_v34 }
 0x1ab   : > { %1876 = vmatmul.mubr.bf16.gmra.mrb[56].mxu0 %v6206_v4  ;;  %3643 = vmatmul.mubr.bf16.vlgmr.msra.gmra.mrb[108].mxu1 %v6255_v19 }
 0x1ac   : > { %1885 = vmatprep.mubr.bf16.mxu0 %v6255_v19 }
 0x1ae   : > { %v6276_v37 = vpop.f32.mrb[24].mxu1 }
 0x1af   : > { %v1990_v38 = vpop.f32.mrb[25].mxu1 }
 0x1b0   : > { %v6279_v39 = vpop.f32.mrb[26].mxu1  ;;  %v5375_v38 = vld [vmem:[#allocation9 + $0x188] ss:$12 sps:$4 sm:$0xff]  }
 0x1b1   : > { %v1993_v4 = vpop.f32.mrb[27].mxu1  ;;  %4941 = vmatprep.subr.bf16.mxu0 %v5375_v38 }
 0x1b3   : > { %1886 = vmatmul.mubr.bf16.gmra.mrb[60].mxu0 %v6214_v30  ;;  %v5363_v30 = vld [vmem:[#allocation9 + $0x180] ss:$12 sps:$4 sm:$0xff]  }
 0x1b4   : > { %1895 = vmatprep.mubr.bf16.mxu0 %v6255_v19  ;;  %3816 = vmatpush1.bf16.msra.mxu1 %v5363_v30 }
 0x1b5   : > { %3817 = vmatprep.subr.bf16.mxu1 %v5368_v61 }
 0x1b6   : > { %v6284_v41 = vpop.f32.mrb[28].mxu1 }
 0x1b7   : > { %v1998_v18 = vpop.f32.mrb[29].mxu1 }
 0x1b8   : > { %v6286_v7 = vpop.f32.mrb[30].mxu1 }
 0x1b9   : > { %v2001_v42 = vpop.f32.mrb[31].mxu1 }
 0x1bb   : > { %1896 = vmatmul.mubr.bf16.gmra.mrb[64].mxu0 %v6217_v13 }
 0x1bc   : > { %1903 = vmatprep.mubr.bf16.mxu0 %v6255_v19 }
 0x1be   : > { %v6290_v20 = vpop.f32.mrb[32].mxu1 }
 0x1bf   : > { %v2006_v43 = vpop.f32.mrb[33].mxu1 }
 0x1c0   : > { %v6292_v49 = vpop.f32.mrb[34].mxu1 }
 0x1c1   : > { %v2009_v50 = vpop.f32.mrb[35].mxu1 }
 0x1c3   : > { %1904 = vmatmul.mubr.bf16.gmra.mrb[72].mxu0 %v6226_v47  ;;  %v5366_v47 = vld [vmem:[#allocation9 + $0x198] ss:$12 sps:$4 sm:$0xff]  }
 0x1c4   : > { %4052 = vmatprep.mubr.bf16.mxu0 %v2799_v34  ;;  %3818 = vmatpush1.bf16.msra.mxu1 %v5366_v47 }
 0x1c5   : > { %3819 = vmatprep.subr.bf16.mxu1 %v5371_v17 }
 0x1c6   : > { %v6295_v36 = vpop.f32.mrb[36].mxu1 }
 0x1c7   : > { %v2014_v56 = vpop.f32.mrb[37].mxu1 }
 0x1c8   : > { %v6297_v58 = vpop.f32.mrb[38].mxu1  ;;  %3820 = vmatpush1.bf16.msra.mxu1 %v5369_v21  ;;  %v5376_v56 = vld [vmem:[#allocation9 + $0x1e0] ss:$12 sps:$4 sm:$0xff]  }
 0x1c9   : > { %v2017_v13 = vpop.f32.mrb[39].mxu1  ;;  %3821 = vmatprep.subr.bf16.mxu1 %v5374_v31  ;;  %v5379_v21 = vld [vmem:[#allocation9 + $0x1a0] ss:$12 sps:$4 sm:$0xff]  }
 0x1ca   : > { %v5378_v13 = vld [vmem:[#allocation9 + $0x1e4] ss:$12 sps:$4 sm:$0xff]  }
 0x1cb   : > { %4053 = vmatmul.mubr.bf16.vlgmr.msra.gmra.mrb[76].mxu0 %v6255_v19 }
 0x1cc   : > { %3822 = vmatpush1.bf16.msra.mxu1 %v5372_v15  ;;  %4942 = vmatpush3.bf16.msra.mxu0 %v5375_v38  ;;  %v6338_v38 = vld [vmem:[%s7038_s2] ss:$0 sm:$0xff] }
 0x1cd   : > { %3823 = vmatprep.subr.bf16.mxu1 %v5378_v13  ;;  %4943 = vmatprep.subr.bf16.mxu0 %v5379_v21 }
 0x1ce   : > { %v6300_v46 = vpop.f32.mrb[40].mxu1 }
 0x1cf   : > { %v2022_v59 = vpop.f32.mrb[41].mxu1 }
 0x1d0   : > { %v6302_v60 = vpop.f32.mrb[42].mxu1  ;;  %3824 = vmatpush1.bf16.msra.mxu1 %v5376_v56  ;;  %4944 = vmatpush3.bf16.msra.mxu0 %v5379_v21 }
 0x1d1   : > { %v2025_v57 = vpop.f32.mrb[43].mxu1 }
 0x1d6   : > { %v6304_v1 = vpop.f32.mrb[44].mxu1 }
 0x1d7   : > { %v2030_v8 = vpop.f32.mrb[45].mxu1 }
 0x1d8   : > { %v6306_v2 = vpop.f32.mrb[46].mxu1 }
 0x1d9   : > { %v2033_v63 = vpop.f32.mrb[47].mxu1 }
 0x1de   : > { %v6308_v6 = vpop.f32.mrb[48].mxu1 }
 0x1df   : > { %v2038_v40 = vpop.f32.mrb[49].mxu1 }
 0x1e0   : > { %v6310_v11 = vpop.f32.mrb[50].mxu1 }
 0x1e1   : > { %v2041_v14 = vpop.f32.mrb[51].mxu1 }
 0x1e6   : > { %v6312_v55 = vpop.f32.mrb[52].mxu1 }
 0x1e7   : > { %v2046_v12 = vpop.f32.mrb[53].mxu1 }
 0x1e8   : > { %v6314_v33 = vpop.f32.mrb[54].mxu1 }
 0x1e9   : > { %v2049_v24 = vpop.f32.mrb[55].mxu1 }
 0x1ee   : > { %v6316_v62 = vpop.f32.mrb[56].mxu1 }
 0x1ef   : > { %v2054_v25 = vpop.f32.mrb[57].mxu1 }
 0x1f0   : > { %v6318_v27 = vpop.f32.mrb[58].mxu1 }
 0x1f1   : > { %v2057_v44 = vpop.f32.mrb[59].mxu1 }
 0x1f6   : > { %v6320_v54 = vpop.f32.mrb[60].mxu1 }
 0x1f7   : > { %v2062_v0 = vpop.f32.mrb[61].mxu1 }
 0x1f8   : > { %v6322_v28 = vpop.f32.mrb[62].mxu1 }
 0x1f9   : > { %v2065_v29 = vpop.f32.mrb[63].mxu1 }
 0x1fe   : > { %v6324_v16 = vpop.f32.mrb[64].mxu1 }
 0x1ff   : > { %v2070_v9 = vpop.f32.mrb[65].mxu1 }
 0x200   : > { %v6326_v32 = vpop.f32.mrb[66].mxu1 }
 0x201   : > { %v2073_v53 = vpop.f32.mrb[67].mxu1 }
 0x206   : > { %v6328_v34 = vpop.f32.mrb[68].mxu1  ;;  %v1700_v4 = vpop.f32.mrb[68].mxu0 }
 0x207   : > { %v2078_v18 = vpop.f32.mrb[69].mxu1  ;;  %v1701_v42 = vpop.f32.mrb[69].mxu0 }
 0x208   : > { %v6330_v43 = vpop.f32.mrb[70].mxu1  ;;  %v1702_v50 = vpop.f32.mrb[70].mxu0 }
 0x209   : > { %v2081_v30 = vpop.f32.mrb[71].mxu1  ;;  %v1703_v26 = vpop.f32.mrb[71].mxu0  ;;  %v5380_v50 = vld [vmem:[#allocation9 + $0x1f8] ss:$12 sps:$4 sm:$0xff]  }
 0x20a   : > { %v5382_v30 = vld [vmem:[#allocation9 + $0x1fc] ss:$12 sps:$4 sm:$0xff]  }
 0x20b   : > { %3825 = vmatprep.subr.bf16.mxu1 %v5382_v30 }
 0x20c   : > { %3826 = vmatpush1.bf16.msra.mxu1 %v5380_v50  ;;  %v2591_v50 = vld [vmem:[#allocation3 + $0x18] sm:$0x1] }
 0x20e   : > { %v4907_v59 = vpop.f32.mrb[72].mxu1  ;;  %v1739_v57 = vpop.f32.mrb[0].mxu0 }
 0x20f   : > { %v2117_v47 = vpop.f32.mrb[73].mxu1  ;;  %v1741_v61 = vpop.f32.mrb[1].mxu0 }
 0x210   : > { %v4908_v8 = vpop.f32.mrb[74].mxu1  ;;  %v1742_v63 = vpop.f32.mrb[2].mxu0 }
 0x211   : > { %v2119_v40 = vpop.f32.mrb[75].mxu1  ;;  %v1744_v14 = vpop.f32.mrb[3].mxu0 }
 0x216   : > { %v4911_v17 = vpop.f32.mrb[76].mxu1  ;;  %v1747_v24 = vpop.f32.mrb[4].mxu0 }
 0x217   : > { %v2138_v12 = vadd.f32 %v4911_v17, %v6248_v45  ;;  %v2129_v25 = vpop.f32.mrb[77].mxu1  ;;  %v1749_v0 = vpop.f32.mrb[5].mxu0 }
 0x218   : > { %v2130_v44 = vadd.f32 %v2129_v25, %v6240_v48  ;;  %v4912_v29 = vpop.f32.mrb[78].mxu1  ;;  %v2256_v15 = vadd.f32 %v1749_v0, %v1739_v57  ;;  %v1751_v9 = vpop.f32.mrb[6].mxu0 }
 0x219   : > { %v2141_v31 = vadd.f32 %v4912_v29, %v6251_v3  ;;  %v2132_v53 = vpop.f32.mrb[79].mxu1  ;;  %v1753_v45 = vpop.f32.mrb[7].mxu0 }
 0x21a   : > { %v2133_v4 = vadd.f32 %v2132_v53, %v6243_v35  ;;  %v2288_v18 = vadd.f32 %v2256_v15, %v2130_v44  ;;  %v2257_v42 = vadd.f32 %v1753_v45, %v1742_v63  ;;  %v5383_v15 = vld [vmem:[#allocation9 + $0x1b8] ss:$12 sps:$4 sm:$0xff]   ;;  %v5384_v53 = vld [vmem:[#allocation9 + $0x210] ss:$12 sps:$4 sm:$0xff]  }
 0x21b   : > { %4945 = vmatprep.subr.bf16.mxu0 %v5383_v15 }
 0x21c   : > { %v2327_v48 = vadd.f32 %v6338_v38, %v2288_v18  ;;  %v2289_v26 = vadd.f32 %v2257_v42, %v2133_v4  ;;  %v5386_v4 = vld [vmem:[#allocation9 + $0x214] ss:$12 sps:$4 sm:$0xff]   ;;  %v5387_v42 = vld [vmem:[#allocation9 + $0x1d0] ss:$12 sps:$4 sm:$0xff]   ;;  %4946 = vmatpush3.bf16.msra.mxu0 %v5383_v15 }
 0x21d   : > { %3827 = vmatprep.subr.bf16.mxu1 %v5386_v4  ;;  %4947 = vmatprep.subr.bf16.mxu0 %v5387_v42 }
 0x21e   : > { %v4915_v56 = vpop.f32.mrb[80].mxu1  ;;  %v2328_v3 = vadd.f32 %v6338_v38, %v2289_v26  ;;  %v1757_v59 = vpop.f32.mrb[8].mxu0  ;;  %v2359_v8 = vmax.f32 %v2327_v48, 0.0  ;;  %3828 = vmatpush1.bf16.msra.mxu1 %v5384_v53 }
 0x21f   : > { %v6344_v13 = vadd.f32 %v4915_v56, %v6266_v23  ;;  %v2145_v57 = vpop.f32.mrb[81].mxu1  ;;  %v1759_v47 = vpop.f32.mrb[9].mxu0 }
 0x220   : > { %v2146_v35 = vadd.f32 %v2145_v57, %v6258_v10  ;;  %v4916_v61 = vpop.f32.mrb[82].mxu1  ;;  %v2360_v63 = vmax.f32 %v2328_v3, 0.0  ;;  %v2258_v40 = vadd.f32 %v1759_v47, %v1747_v24  ;;  %v1761_v21 = vpop.f32.mrb[10].mxu0  ;;  %v5388_v57 = vld [vmem:[#allocation9 + $0x228] ss:$12 sps:$4 sm:$0xff]   ;;  %4948 = vmatpush3.bf16.msra.mxu0 %v5387_v42 }
 0x221   : > { %v6348_v14 = vadd.f32 %v4916_v61, %v6269_v5  ;;  %v2148_v17 = vpop.f32.mrb[83].mxu1  ;;  %v1763_v44 = vpop.f32.mrb[11].mxu0  ;;  %v5390_v47 = vld [vmem:[#allocation9 + $0x22c] ss:$12 sps:$4 sm:$0xff]   ;;  %v5391_v42 = vld [vmem:[#allocation9 + $0x1e8] ss:$12 sps:$4 sm:$0xff]  }
 0x222   : > { %v2149_v25 = vadd.f32 %v2148_v17, %v6261_v22  ;;  %v2427_v23 = vpack.c.bf16 %v2360_v63, %v2359_v8  ;;  %v2290_v0 = vadd.f32 %v2258_v40, %v2138_v12  ;;  %v2259_v29 = vadd.f32 %v1763_v44, %v1751_v9  ;;  %3829 = vmatprep.subr.bf16.mxu1 %v5390_v47 }
 0x223   : > { %3830 = vmatpush1.bf16.msra.mxu1 %v5388_v57  ;;  %4949 = vmatprep.subr.bf16.mxu0 %v5391_v42 }
 0x224   : > { %v2444_v10 = vshrl.u32 %v2427_v23, 16  ;;  %v2329_v45 = vadd.f32 %v6338_v38, %v2290_v0  ;;  %v2291_v18 = vadd.f32 %v2259_v29, %v2141_v31  ;;  %v2447_v24 = vshll.u32 %v2427_v23, 16  ;;  %4950 = vmatpush3.bf16.msra.mxu0 %v5391_v42 }
 0x226   : > { %v4919_v5 = vpop.f32.mrb[84].mxu1  ;;  %v2446_v30 = vrot.slane %v2444_v10, 7  ;;  %v2361_v48 = vmax.f32 %v2329_v45, 0.0  ;;  %v2330_v22 = vadd.f32 %v6338_v38, %v2291_v18  ;;  %v1767_v9 = vpop.f32.mrb[12].mxu0  ;;  %v2597_v10 = vld [vmem:[#allocation3 + $0x28] sm:$0x1] }
 0x227   : > { %v6354_v12 = vadd.f32 %v4919_v5, %v6284_v41  ;;  %v2161_v26 = vpop.f32.mrb[85].mxu1  ;;  %v1769_v31 = vpop.f32.mrb[13].mxu0 }
 0x228   : > { %v6357_v56 = vadd.f32 %v2161_v26, %v6276_v37  ;;  %v4920_v3 = vpop.f32.mrb[86].mxu1  ;;  %v2449_v61 = vor.u32 %v2447_v24, %v2446_v30  ;;  %v2592_v8 = vsel %vm5856_vm6, %v2446_v30, %v2591_v50  ;;  %v2362_v63 = vmax.f32 %v2330_v22, 0.0  ;;  %v1771_v41 = vpop.f32.mrb[14].mxu0 }
 0x229   : > { %v2260_v40 = vadd.f32 %v1769_v31, %v1757_v59  ;;  %v2164_v17 = vpop.f32.mrb[87].mxu1  ;;  %2593 = vst [vmem:[#allocation3 + $0x18] sm:$0x1] %v2592_v8  ;;  %v6362_v44 = vadd.f32 %v4920_v3, %v6286_v7  ;;  %v1773_v23 = vpop.f32.mrb[15].mxu0 }
 0x22a   : > { %v6365_v37 = vadd.f32 %v2164_v17, %v6279_v39  ;;  %v6370_v0 = vsel %vm5850_vm5, %v2449_v61, %v6255_v19  ;;  %v2428_v29 = vpack.c.bf16 %v2362_v63, %v2361_v48  ;;  %v2261_v53 = vadd.f32 %v1773_v23, %v1761_v21 }
 0x22b   : > { %v2292_v15 = vadd.f32 %v2260_v40, %v2146_v35  ;;  %2590 = vst [vmem:[#allocation3 + $0x10] sm:$0xff] %v6370_v0  ;;  %v2803_v59 = vshll.u32 %v6370_v0, 16  ;;  %v2801_v23 = vshrl.u32 %v6370_v0, 16 }
 0x22c   : > { %v2451_v7 = vshrl.u32 %v2428_v29, 16  ;;  %v2293_v4 = vadd.f32 %v2261_v53, %v2149_v25  ;;  %v2454_v24 = vshll.u32 %v2428_v29, 16  ;;  %v5392_v25 = vld [vmem:[#allocation9 + $0x200] ss:$12 sps:$4 sm:$0xff]  }
 0x22d   : > { %v2331_v39 = vadd.f32 %v6338_v38, %v2292_v15  ;;  %v2805_v31 = vrot.slane %v2803_v59, 1  ;;  %4951 = vmatprep.subr.bf16.mxu0 %v5392_v25 }
 0x22e   : > { %v4923_v45 = vpop.f32.mrb[88].mxu1  ;;  %v2453_v18 = vrot.slane %v2451_v7, 7  ;;  %v2332_v50 = vadd.f32 %v6338_v38, %v2293_v4  ;;  %v1777_v35 = vpop.f32.mrb[16].mxu0  ;;  %4952 = vmatpush3.bf16.msra.mxu0 %v5392_v25 }
 0x22f   : > { %v6377_v5 = vadd.f32 %v4923_v45, %v6295_v36  ;;  %v2177_v21 = vpop.f32.mrb[89].mxu1  ;;  %v2363_v30 = vmax.f32 %v2331_v39, 0.0  ;;  %v1779_v22 = vpop.f32.mrb[17].mxu0  ;;  %v2603_v45 = vld [vmem:[#allocation3 + $0x38] sm:$0x1] }
 0x230   : > { %v6380_v48 = vadd.f32 %v2177_v21, %v6290_v20  ;;  %v4924_v26 = vpop.f32.mrb[90].mxu1  ;;  %v2456_v3 = vor.u32 %v2454_v24, %v2453_v18  ;;  %v2598_v57 = vsel %vm5856_vm6, %v2453_v18, %v2597_v10  ;;  %v2364_v47 = vmax.f32 %v2332_v50, 0.0  ;;  %v1781_v8 = vpop.f32.mrb[18].mxu0  ;;  %v2737_v63 = vld [vmem:[#allocation3 + $0x18] sm:$0x1] }
 0x231   : > { %v2262_v61 = vadd.f32 %v1779_v22, %v1767_v9  ;;  %v2180_v36 = vpop.f32.mrb[91].mxu1  ;;  %2599 = vst [vmem:[#allocation3 + $0x28] sm:$0x1] %v2598_v57  ;;  %v6385_v40 = vadd.f32 %v4924_v26, %v6297_v58  ;;  %v1783_v17 = vpop.f32.mrb[19].mxu0  ;;  %v2808_v29 = vshll.u32 %v2737_v63, 16  ;;  %v2806_v58 = vor.u32 %v2805_v31, %v2801_v23 }
 0x232   : > { %v6388_v20 = vadd.f32 %v2180_v36, %v6292_v49  ;;  %v6394_v9 = vsel %vm5850_vm5, %v2456_v3, %v6255_v19  ;;  %v2429_v15 = vpack.c.bf16 %v2364_v47, %v2363_v30  ;;  %v2263_v59 = vadd.f32 %v1783_v17, %v1771_v41  ;;  %v5393_v22 = vld [vmem:[#allocation9 + $0x218] ss:$12 sps:$4 sm:$0xff]   ;;  %v5394_v57 = vld [vmem:[#allocation9 + $0x230] ss:$12 sps:$4 sm:$0xff]  }
 0x233   : > { %v2294_v53 = vadd.f32 %v2262_v61, %v6344_v13  ;;  %2596 = vst [vmem:[#allocation3 + $0x20] sm:$0xff] %v6394_v9  ;;  %v2810_v49 = vrot.slane %v2808_v29, 1  ;;  %v2815_v7 = vshll.u32 %v6394_v9, 16  ;;  %4953 = vmatprep.subr.bf16.mxu0 %v5393_v22 }
 0x234   : > { %v2458_v39 = vshrl.u32 %v2429_v15, 16  ;;  %v2295_v10 = vadd.f32 %v2263_v59, %v6348_v14  ;;  %v2461_v13 = vshll.u32 %v2429_v15, 16  ;;  %v2813_v15 = vshrl.u32 %v6394_v9, 16  ;;  %4954 = vmatpush3.bf16.msra.mxu0 %v5393_v22 }
 0x235   : > { %v2333_v4 = vadd.f32 %v6338_v38, %v2294_v53  ;;  %v2811_v24 = vsel %vm676_vm0, %v2806_v58, %v2810_v49  ;;  %v2817_v25 = vrot.slane %v2815_v7, 1  ;;  %4955 = vmatprep.subr.bf16.mxu0 %v5394_v57 }
 0x236   : > { %v4927_v18 = vpop.f32.mrb[92].mxu1  ;;  %v2460_v50 = vrot.slane %v2458_v39, 7  ;;  %v2334_v41 = vadd.f32 %v6338_v38, %v2295_v10  ;;  %v1787_v42 = vpop.f32.mrb[20].mxu0  ;;  %3650 = vmatprep.mubr.bf16.mxu1 %v2811_v24  ;;  %4058 = vmatprep.mubr.bf16.mxu0 %v2811_v24 }
 0x237   : > { %v6404_v21 = vadd.f32 %v4927_v18, %v6304_v1  ;;  %v2193_v30 = vpop.f32.mrb[93].mxu1  ;;  %v2365_v26 = vmax.f32 %v2333_v4, 0.0  ;;  %v1789_v31 = vpop.f32.mrb[21].mxu0  ;;  %3651 = vmatmul.mubr.bf16.gmra.mrb[112].mxu1 %v6370_v0  ;;  %4059 = vmatmul.mubr.bf16.gmra.mrb[80].mxu0 %v6370_v0 }
 0x238   : > { %v6407_v14 = vadd.f32 %v2193_v30, %v6300_v46  ;;  %v4928_v3 = vpop.f32.mrb[94].mxu1  ;;  %v2463_v47 = vor.u32 %v2461_v13, %v2460_v50  ;;  %v2604_v1 = vsel %vm5856_vm6, %v2460_v50, %v2603_v45  ;;  %v2366_v61 = vmax.f32 %v2334_v41, 0.0  ;;  %v1791_v63 = vpop.f32.mrb[22].mxu0  ;;  %v2739_v23 = vld [vmem:[#allocation3 + $0x28] sm:$0x1]  ;;  %4956 = vmatpush3.bf16.msra.mxu0 %v5394_v57 }
 0x239   : > { %v2264_v36 = vadd.f32 %v1789_v31, %v1777_v35  ;;  %v2196_v17 = vpop.f32.mrb[95].mxu1  ;;  %2605 = vst [vmem:[#allocation3 + $0x38] sm:$0x1] %v2604_v1  ;;  %v6414_v46 = vadd.f32 %v4928_v3, %v6306_v2  ;;  %v1793_v0 = vpop.f32.mrb[23].mxu0  ;;  %v2820_v53 = vshll.u32 %v2739_v23, 16  ;;  %v2818_v2 = vor.u32 %v2817_v25, %v2813_v15 }
 0x23a   : > { %v6417_v29 = vadd.f32 %v2196_v17, %v6302_v60  ;;  %v6423_v35 = vsel %vm5850_vm5, %v2463_v47, %v6255_v19  ;;  %v2430_v59 = vpack.c.bf16 %v2366_v61, %v2365_v26  ;;  %v2265_v49 = vadd.f32 %v1793_v0, %v1781_v8  ;;  %v2609_v45 = vld [vmem:[#allocation3 + $0x48] sm:$0x1] }
 0x23b   : > { %v2296_v58 = vadd.f32 %v2264_v36, %v6357_v56  ;;  %2602 = vst [vmem:[#allocation3 + $0x30] sm:$0xff] %v6423_v35  ;;  %v2822_v60 = vrot.slane %v2820_v53, 1  ;;  %v2827_v7 = vshll.u32 %v6423_v35, 16 }
 0x23c   : > { %v2465_v39 = vshrl.u32 %v2430_v59, 16  ;;  %v2297_v10 = vadd.f32 %v2265_v49, %v6365_v37  ;;  %v2468_v56 = vshll.u32 %v2430_v59, 16 }
 0x23d   : > { %v2335_v4 = vadd.f32 %v6338_v38, %v2296_v58  ;;  %v2823_v24 = vsel %vm676_vm0, %v2818_v2, %v2822_v60  ;;  %v2829_v3 = vrot.slane %v2827_v7, 1  ;;  %v2615_v7 = vld [vmem:[#allocation3 + $0x58] sm:$0x1] }
 0x23e   : > { %v4931_v18 = vpop.f32.mrb[96].mxu1  ;;  %v2467_v50 = vrot.slane %v2465_v39, 7  ;;  %v2336_v8 = vadd.f32 %v6338_v38, %v2297_v10  ;;  %v1797_v41 = vpop.f32.mrb[24].mxu0  ;;  %3660 = vmatprep.mubr.bf16.mxu1 %v2823_v24  ;;  %4064 = vmatprep.mubr.bf16.mxu0 %v2823_v24 }
 0x23f   : > { %v6433_v13 = vadd.f32 %v4931_v18, %v6312_v55  ;;  %v2209_v30 = vpop.f32.mrb[97].mxu1  ;;  %v2367_v22 = vmax.f32 %v2335_v4, 0.0  ;;  %v1799_v37 = vpop.f32.mrb[25].mxu0  ;;  %3661 = vmatmul.mubr.bf16.gmra.mrb[116].mxu1 %v6394_v9  ;;  %4065 = vmatmul.mubr.bf16.gmra.mrb[84].mxu0 %v6394_v9  ;;  %v2825_v9 = vshrl.u32 %v6423_v35, 16 }
 0x240   : > { %v6436_v26 = vadd.f32 %v2209_v30, %v6308_v6  ;;  %v4932_v31 = vpop.f32.mrb[98].mxu1  ;;  %v2470_v25 = vor.u32 %v2468_v56, %v2467_v50  ;;  %v2610_v55 = vsel %vm5856_vm6, %v2467_v50, %v2609_v45  ;;  %v2368_v57 = vmax.f32 %v2336_v8, 0.0  ;;  %v1801_v1 = vpop.f32.mrb[26].mxu0  ;;  %v6442_v36 = vld [vmem:[#allocation3 + $0x38] sm:$0x1] }
 0x241   : > { %v2266_v47 = vadd.f32 %v1799_v37, %v1787_v42  ;;  %v2212_v61 = vpop.f32.mrb[99].mxu1  ;;  %2611 = vst [vmem:[#allocation3 + $0x48] sm:$0x1] %v2610_v55  ;;  %v6445_v6 = vadd.f32 %v4932_v31, %v6314_v33  ;;  %v1803_v23 = vpop.f32.mrb[27].mxu0  ;;  %v2832_v0 = vshll.u32 %v6442_v36, 16  ;;  %v2830_v33 = vor.u32 %v2829_v3, %v2825_v9 }
 0x242   : > { %v6448_v17 = vadd.f32 %v2212_v61, %v6310_v11  ;;  %v6455_v42 = vsel %vm5850_vm5, %v2470_v25, %v6255_v19  ;;  %v2431_v15 = vpack.c.bf16 %v2368_v57, %v2367_v22  ;;  %v2267_v59 = vadd.f32 %v1803_v23, %v1791_v63 }
 0x243   : > { %v2298_v53 = vadd.f32 %v2266_v47, %v6354_v12  ;;  %2608 = vst [vmem:[#allocation3 + $0x40] sm:$0xff] %v6455_v42  ;;  %v2834_v58 = vrot.slane %v2832_v0, 1  ;;  %v2839_v11 = vshll.u32 %v6455_v42, 16 }
 0x244   : > { %v2472_v49 = vshrl.u32 %v2431_v15, 16  ;;  %v2299_v60 = vadd.f32 %v2267_v59, %v6362_v44  ;;  %v2475_v45 = vshll.u32 %v2431_v15, 16 }
 0x245   : > { %v2337_v2 = vadd.f32 %v6338_v38, %v2298_v53  ;;  %v2835_v4 = vsel %vm676_vm0, %v2830_v33, %v2834_v58  ;;  %v2841_v30 = vrot.slane %v2839_v11, 1  ;;  %v2621_v58 = vld [vmem:[#allocation3 + $0x68] sm:$0x1] }
 0x246   : > { %v4935_v39 = vpop.f32.mrb[100].mxu1  ;;  %v2474_v10 = vrot.slane %v2472_v49, 7  ;;  %v2338_v12 = vadd.f32 %v6338_v38, %v2299_v60  ;;  %v1807_v18 = vpop.f32.mrb[28].mxu0  ;;  %3670 = vmatprep.mubr.bf16.mxu1 %v2835_v4  ;;  %4072 = vmatprep.mubr.bf16.mxu0 %v2835_v4 }
 0x247   : > { %v6465_v63 = vadd.f32 %v4935_v39, %v6320_v54  ;;  %v2225_v24 = vpop.f32.mrb[101].mxu1  ;;  %v2369_v50 = vmax.f32 %v2337_v2, 0.0  ;;  %v1809_v44 = vpop.f32.mrb[29].mxu0  ;;  %3671 = vmatmul.mubr.bf16.gmra.mrb[120].mxu1 %v6423_v35  ;;  %4073 = vmatmul.mubr.bf16.gmra.mrb[88].mxu0 %v6423_v35  ;;  %v2837_v35 = vshrl.u32 %v6455_v42, 16 }
 0x248   : > { %v6468_v56 = vadd.f32 %v2225_v24, %v6316_v62  ;;  %v4936_v8 = vpop.f32.mrb[102].mxu1  ;;  %v2477_v22 = vor.u32 %v2475_v45, %v2474_v10  ;;  %v2616_v54 = vsel %vm5856_vm6, %v2474_v10, %v2615_v7  ;;  %v2370_v37 = vmax.f32 %v2338_v12, 0.0  ;;  %v1811_v3 = vpop.f32.mrb[30].mxu0  ;;  %v6474_v55 = vld [vmem:[#allocation3 + $0x48] sm:$0x1] }
 0x249   : > { %v2268_v31 = vadd.f32 %v1809_v44, %v1797_v41  ;;  %v2228_v25 = vpop.f32.mrb[103].mxu1  ;;  %2617 = vst [vmem:[#allocation3 + $0x58] sm:$0x1] %v2616_v54  ;;  %v6477_v62 = vadd.f32 %v4936_v8, %v6322_v28  ;;  %v1813_v47 = vpop.f32.mrb[31].mxu0  ;;  %v2844_v61 = vshll.u32 %v6474_v55, 16  ;;  %v2842_v28 = vor.u32 %v2841_v30, %v2837_v35 }
 0x24a   : > { %v6480_v57 = vadd.f32 %v2228_v25, %v6318_v27  ;;  %v6487_v41 = vsel %vm5850_vm5, %v2477_v22, %v6255_v19  ;;  %v2432_v23 = vpack.c.bf16 %v2370_v37, %v2369_v50  ;;  %v2269_v0 = vadd.f32 %v1813_v47, %v1801_v1 }
 0x24b   : > { %v2300_v9 = vadd.f32 %v2268_v31, %v6380_v48  ;;  %2614 = vst [vmem:[#allocation3 + $0x50] sm:$0xff] %v6487_v41  ;;  %v2846_v15 = vrot.slane %v2844_v61, 1  ;;  %v2851_v27 = vshll.u32 %v6487_v41, 16 }
 0x24c   : > { %v2479_v53 = vshrl.u32 %v2432_v23, 16  ;;  %v2301_v33 = vadd.f32 %v2269_v0, %v6388_v20  ;;  %v2482_v60 = vshll.u32 %v2432_v23, 16 }
 0x24d   : > { %v2339_v59 = vadd.f32 %v6338_v38, %v2300_v9  ;;  %v2847_v49 = vsel %vm676_vm0, %v2842_v28, %v2846_v15  ;;  %v2853_v12 = vrot.slane %v2851_v27, 1  ;;  %v2627_v28 = vld [vmem:[#allocation3 + $0x78] sm:$0x1] }
 0x24e   : > { %v4939_v11 = vpop.f32.mrb[104].mxu1  ;;  %v2481_v2 = vrot.slane %v2479_v53, 7  ;;  %v2340_v48 = vadd.f32 %v6338_v38, %v2301_v33  ;;  %v1817_v7 = vpop.f32.mrb[32].mxu0  ;;  %3680 = vmatprep.mubr.bf16.mxu1 %v2847_v49  ;;  %4080 = vmatprep.mubr.bf16.mxu0 %v2847_v49 }
 0x24f   : > { %v6497_v1 = vadd.f32 %v4939_v11, %v6328_v34  ;;  %v2241_v39 = vpop.f32.mrb[105].mxu1  ;;  %v2371_v4 = vmax.f32 %v2339_v59, 0.0  ;;  %v1819_v20 = vpop.f32.mrb[33].mxu0  ;;  %3681 = vmatmul.mubr.bf16.gmra.mrb[124].mxu1 %v6455_v42  ;;  %4081 = vmatmul.mubr.bf16.gmra.mrb[92].mxu0 %v6455_v42  ;;  %v2849_v42 = vshrl.u32 %v6487_v41, 16 }
 0x250   : > { %v6500_v10 = vadd.f32 %v2241_v39, %v6324_v16  ;;  %v4940_v45 = vpop.f32.mrb[106].mxu1  ;;  %v2484_v24 = vor.u32 %v2482_v60, %v2481_v2  ;;  %v2622_v34 = vsel %vm5856_vm6, %v2481_v2, %v2621_v58  ;;  %v2372_v50 = vmax.f32 %v2340_v48, 0.0  ;;  %v1821_v8 = vpop.f32.mrb[34].mxu0  ;;  %v6506_v22 = vld [vmem:[#allocation3 + $0x58] sm:$0x1] }
 0x251   : > { %v2270_v44 = vadd.f32 %v1819_v20, %v1807_v18  ;;  %v2244_v30 = vpop.f32.mrb[107].mxu1  ;;  %2623 = vst [vmem:[#allocation3 + $0x68] sm:$0x1] %v2622_v34  ;;  %v6509_v16 = vadd.f32 %v4940_v45, %v6330_v43  ;;  %v1823_v37 = vpop.f32.mrb[35].mxu0  ;;  %v2856_v31 = vshll.u32 %v6506_v22, 16  ;;  %v2854_v61 = vor.u32 %v2853_v12, %v2849_v42 }
 0x252   : > { %v6512_v54 = vadd.f32 %v2244_v30, %v6326_v32  ;;  %v2619_v18 = vsel %vm5850_vm5, %v2484_v24, %v6255_v19  ;;  %v2433_v25 = vpack.c.bf16 %v2372_v50, %v2371_v4  ;;  %v2271_v35 = vadd.f32 %v1823_v37, %v1811_v3  ;;  %v2633_v42 = vld [vmem:[#allocation3 + $0x88] sm:$0x1] }
 0x253   : > { %v2302_v47 = vadd.f32 %v2270_v44, %v6377_v5  ;;  %2620 = vst [vmem:[#allocation3 + $0x60] sm:$0xff] %v2619_v18  ;;  %v2858_v43 = vrot.slane %v2856_v31, 1  ;;  %v2863_v23 = vshll.u32 %v2619_v18, 16  ;;  %v2861_v4 = vshrl.u32 %v2619_v18, 16 }
 0x254   : > { %v2486_v9 = vshrl.u32 %v2433_v25, 16  ;;  %v2303_v0 = vadd.f32 %v2271_v35, %v6385_v40  ;;  %v2489_v53 = vshll.u32 %v2433_v25, 16 }
 0x255   : > { %v2341_v32 = vadd.f32 %v6338_v38, %v2302_v47  ;;  %v2859_v15 = vsel %vm676_vm0, %v2854_v61, %v2858_v43  ;;  %v2865_v58 = vrot.slane %v2863_v23, 1 }
 0x256   : > { %v2488_v27 = vrot.slane %v2486_v9, 7  ;;  %v2342_v59 = vadd.f32 %v6338_v38, %v2303_v0  ;;  %v1827_v33 = vpop.f32.mrb[36].mxu0  ;;  %3690 = vmatprep.mubr.bf16.mxu1 %v2859_v15  ;;  %4088 = vmatprep.mubr.bf16.mxu0 %v2859_v15 }
 0x257   : > { %v2373_v5 = vmax.f32 %v2341_v32, 0.0  ;;  %v1829_v3 = vpop.f32.mrb[37].mxu0  ;;  %3691 = vmatmul.mubr.bf16.gmra.mrb[128].mxu1 %v6487_v41  ;;  %4089 = vmatmul.mubr.bf16.gmra.mrb[96].mxu0 %v6487_v41  ;;  %v2866_v34 = vor.u32 %v2865_v58, %v2861_v4 }
 0x258   : > { %v2491_v11 = vor.u32 %v2489_v53, %v2488_v27  ;;  %v2628_v40 = vsel %vm5856_vm6, %v2488_v27, %v2627_v28  ;;  %v2374_v49 = vmax.f32 %v2342_v59, 0.0  ;;  %v2272_v2 = vadd.f32 %v1829_v3, %v1817_v7  ;;  %v1831_v60 = vpop.f32.mrb[38].mxu0  ;;  %v6528_v48 = vld [vmem:[#allocation3 + $0x68] sm:$0x1] }
 0x259   : > { %2629 = vst [vmem:[#allocation3 + $0x78] sm:$0x1] %v2628_v40  ;;  %v1833_v39 = vpop.f32.mrb[39].mxu0  ;;  %v2868_v20 = vshll.u32 %v6528_v48, 16 }
 0x25a   : > { %v2625_v45 = vsel %vm5850_vm5, %v2491_v11, %v6255_v19  ;;  %v2434_v41 = vpack.c.bf16 %v2374_v49, %v2373_v5  ;;  %v2304_v12 = vadd.f32 %v2272_v2, %v6407_v14  ;;  %v2273_v24 = vadd.f32 %v1833_v39, %v1821_v8  ;;  %v2639_v39 = vld [vmem:[#allocation3 + $0x98] sm:$0x1] }
 0x25b   : > { %2626 = vst [vmem:[#allocation3 + $0x70] sm:$0xff] %v2625_v45  ;;  %v2870_v50 = vrot.slane %v2868_v20, 1  ;;  %v2875_v7 = vshll.u32 %v2625_v45, 16  ;;  %v2873_v27 = vshrl.u32 %v2625_v45, 16 }
 0x25c   : > { %v2493_v44 = vshrl.u32 %v2434_v41, 16  ;;  %v2343_v30 = vadd.f32 %v6338_v38, %v2304_v12  ;;  %v2305_v37 = vadd.f32 %v2273_v24, %v6417_v29  ;;  %v2496_v47 = vshll.u32 %v2434_v41, 16 }
 0x25d   : > { %v2871_v31 = vsel %vm676_vm0, %v2866_v34, %v2870_v50  ;;  %v2877_v43 = vrot.slane %v2875_v7, 1 }
 0x25e   : > { %v2495_v25 = vrot.slane %v2493_v44, 7  ;;  %v2344_v35 = vadd.f32 %v6338_v38, %v2305_v37  ;;  %v1837_v61 = vpop.f32.mrb[40].mxu0  ;;  %3700 = vmatprep.mubr.bf16.mxu1 %v2871_v31  ;;  %4096 = vmatprep.mubr.bf16.mxu0 %v2871_v31  ;;  %v2375_v14 = vmax.f32 %v2343_v30, 0.0 }
 0x25f   : > { %v1839_v8 = vpop.f32.mrb[41].mxu0  ;;  %3701 = vmatmul.mubr.bf16.gmra.mrb[132].mxu1 %v2619_v18  ;;  %4097 = vmatmul.mubr.bf16.gmra.mrb[100].mxu0 %v2619_v18  ;;  %v2878_v58 = vor.u32 %v2877_v43, %v2873_v27 }
 0x260   : > { %v2498_v23 = vor.u32 %v2496_v47, %v2495_v25  ;;  %v2634_v9 = vsel %vm5856_vm6, %v2495_v25, %v2633_v42  ;;  %v2376_v29 = vmax.f32 %v2344_v35, 0.0  ;;  %v2274_v32 = vadd.f32 %v1839_v8, %v1827_v33  ;;  %v1841_v0 = vpop.f32.mrb[42].mxu0  ;;  %v6541_v28 = vld [vmem:[#allocation3 + $0x78] sm:$0x1]  ;;  %v6557_v25 = vld [vmem:[#allocation2] sm:$0xff] }
 0x261   : > { %2635 = vst [vmem:[#allocation3 + $0x88] sm:$0x1] %v2634_v9  ;;  %v1843_v15 = vpop.f32.mrb[43].mxu0  ;;  %v2880_v53 = vshll.u32 %v6541_v28, 16 }
 0x262   : > { %v2631_v59 = vsel %vm5850_vm5, %v2498_v23, %v6255_v19  ;;  %v2435_v18 = vpack.c.bf16 %v2376_v29, %v2375_v14  ;;  %v2306_v5 = vadd.f32 %v2274_v32, %v6404_v21  ;;  %v2275_v3 = vadd.f32 %v1843_v15, %v1831_v60  ;;  %v2645_v32 = vld [vmem:[#allocation3 + $0xa8] sm:$0x1] }
 0x263   : > { %2632 = vst [vmem:[#allocation3 + $0x80] sm:$0xff] %v2631_v59  ;;  %v2882_v11 = vrot.slane %v2880_v53, 1  ;;  %v2887_v33 = vshll.u32 %v2631_v59, 16  ;;  %v2885_v42 = vshrl.u32 %v2631_v59, 16 }
 0x264   : > { %v2500_v40 = vshrl.u32 %v2435_v18, 16  ;;  %v2345_v49 = vadd.f32 %v6338_v38, %v2306_v5  ;;  %v2307_v2 = vadd.f32 %v2275_v3, %v6414_v46  ;;  %v2503_v41 = vshll.u32 %v2435_v18, 16 }
 0x265   : > { %v2883_v4 = vsel %vm676_vm0, %v2878_v58, %v2882_v11  ;;  %v2889_v24 = vrot.slane %v2887_v33, 1 }
 0x266   : > { %v2502_v20 = vrot.slane %v2500_v40, 7  ;;  %v2346_v19 = vadd.f32 %v6338_v38, %v2307_v2  ;;  %v1847_v12 = vpop.f32.mrb[44].mxu0  ;;  %3710 = vmatprep.mubr.bf16.mxu1 %v2883_v4  ;;  %4104 = vmatprep.mubr.bf16.mxu0 %v2883_v4  ;;  %v2377_v21 = vmax.f32 %v2345_v49, 0.0 }
 0x267   : > { %v1849_v60 = vpop.f32.mrb[45].mxu0  ;;  %3711 = vmatmul.mubr.bf16.gmra.mrb[136].mxu1 %v2625_v45  ;;  %4105 = vmatmul.mubr.bf16.gmra.mrb[104].mxu0 %v2625_v45 }
 0x268   : > { %v2505_v34 = vor.u32 %v2503_v41, %v2502_v20  ;;  %v2640_v50 = vsel %vm5856_vm6, %v2502_v20, %v2639_v39  ;;  %v2378_v46 = vmax.f32 %v2346_v19, 0.0  ;;  %v2276_v7 = vadd.f32 %v1849_v60, %v1837_v61  ;;  %v1851_v44 = vpop.f32.mrb[46].mxu0  ;;  %v6554_v30 = vld [vmem:[#allocation3 + $0x88] sm:$0x1] }
 0x269   : > { %2641 = vst [vmem:[#allocation3 + $0x98] sm:$0x1] %v2640_v50  ;;  %v1853_v37 = vpop.f32.mrb[47].mxu0  ;;  %v2892_v31 = vshll.u32 %v6554_v30, 16  ;;  %v2890_v61 = vor.u32 %v2889_v24, %v2885_v42 }
 0x26a   : > { %v2637_v45 = vsel %vm5850_vm5, %v2505_v34, %v6557_v25  ;;  %v2436_v47 = vpack.c.bf16 %v2378_v46, %v2377_v21  ;;  %v2308_v35 = vadd.f32 %v2276_v7, %v6436_v26  ;;  %v2277_v14 = vadd.f32 %v1853_v37, %v1841_v0  ;;  %v2651_v46 = vld [vmem:[#allocation3 + $0xb8] sm:$0x1] }
 0x26b   : > { %2638 = vst [vmem:[#allocation3 + $0x90] sm:$0xff] %v2637_v45  ;;  %v2894_v8 = vrot.slane %v2892_v31, 1  ;;  %v2899_v43 = vshll.u32 %v2637_v45, 16  ;;  %v2897_v39 = vshrl.u32 %v2637_v45, 16 }
 0x26c   : > { %v2507_v23 = vshrl.u32 %v2436_v47, 16  ;;  %v2347_v9 = vadd.f32 %v6338_v38, %v2308_v35  ;;  %v2309_v29 = vadd.f32 %v2277_v14, %v6448_v17  ;;  %v2510_v53 = vshll.u32 %v2436_v47, 16 }
 0x26d   : > { %v2895_v15 = vsel %vm676_vm0, %v2890_v61, %v2894_v8  ;;  %v2901_v3 = vrot.slane %v2899_v43, 1 }
 0x26e   : > { %v2509_v27 = vrot.slane %v2507_v23, 7  ;;  %v2348_v18 = vadd.f32 %v6338_v38, %v2309_v29  ;;  %v1857_v5 = vpop.f32.mrb[48].mxu0  ;;  %3720 = vmatprep.mubr.bf16.mxu1 %v2895_v15  ;;  %4112 = vmatprep.mubr.bf16.mxu0 %v2895_v15  ;;  %v2379_v26 = vmax.f32 %v2347_v9, 0.0 }
 0x26f   : > { %v1859_v0 = vpop.f32.mrb[49].mxu0  ;;  %3721 = vmatmul.mubr.bf16.gmra.mrb[140].mxu1 %v2631_v59  ;;  %4113 = vmatmul.mubr.bf16.gmra.mrb[108].mxu0 %v2631_v59  ;;  %v2902_v21 = vor.u32 %v2901_v3, %v2897_v39 }
 0x270   : > { %v2512_v58 = vor.u32 %v2510_v53, %v2509_v27  ;;  %v2646_v11 = vsel %vm5856_vm6, %v2509_v27, %v2645_v32  ;;  %v2380_v17 = vmax.f32 %v2348_v18, 0.0  ;;  %v2278_v33 = vadd.f32 %v1859_v0, %v1847_v12  ;;  %v1861_v40 = vpop.f32.mrb[50].mxu0  ;;  %v6569_v49 = vld [vmem:[#allocation3 + $0x98] sm:$0x1] }
 0x271   : > { %2647 = vst [vmem:[#allocation3 + $0xa8] sm:$0x1] %v2646_v11  ;;  %v1863_v2 = vpop.f32.mrb[51].mxu0  ;;  %v2904_v4 = vshll.u32 %v6569_v49, 16  ;;  %v2657_v11 = vld [vmem:[#allocation3 + $0xc8] sm:$0x1] }
 0x272   : > { %v2643_v20 = vsel %vm5850_vm5, %v2512_v58, %v6557_v25  ;;  %v2437_v59 = vpack.c.bf16 %v2380_v17, %v2379_v26  ;;  %v2310_v41 = vadd.f32 %v2278_v33, %v6433_v13  ;;  %v2279_v19 = vadd.f32 %v1863_v2, %v1851_v44 }
 0x273   : > { %2644 = vst [vmem:[#allocation3 + $0xa0] sm:$0xff] %v2643_v20  ;;  %v2906_v60 = vrot.slane %v2904_v4, 1  ;;  %v2911_v12 = vshll.u32 %v2643_v20, 16  ;;  %v2909_v29 = vshrl.u32 %v2643_v20, 16 }
 0x274   : > { %v2514_v24 = vshrl.u32 %v2437_v59, 16  ;;  %v2349_v34 = vadd.f32 %v6338_v38, %v2310_v41  ;;  %v2311_v50 = vadd.f32 %v2279_v19, %v6445_v6  ;;  %v2517_v42 = vshll.u32 %v2437_v59, 16 }
 0x275   : > { %v2907_v7 = vsel %vm676_vm0, %v2902_v21, %v2906_v60  ;;  %v2913_v35 = vrot.slane %v2911_v12, 1 }
 0x276   : > { %v2516_v37 = vrot.slane %v2514_v24, 7  ;;  %v2350_v31 = vadd.f32 %v6338_v38, %v2311_v50  ;;  %v1867_v47 = vpop.f32.mrb[52].mxu0  ;;  %3730 = vmatprep.mubr.bf16.mxu1 %v2907_v7  ;;  %4120 = vmatprep.mubr.bf16.mxu0 %v2907_v7  ;;  %v2381_v13 = vmax.f32 %v2349_v34, 0.0 }
 0x277   : > { %v1869_v44 = vpop.f32.mrb[53].mxu0  ;;  %3731 = vmatmul.mubr.bf16.gmra.mrb[144].mxu1 %v2637_v45  ;;  %4121 = vmatmul.mubr.bf16.gmra.mrb[112].mxu0 %v2637_v45  ;;  %v2914_v18 = vor.u32 %v2913_v35, %v2909_v29 }
 0x278   : > { %v2519_v14 = vor.u32 %v2517_v42, %v2516_v37  ;;  %v2652_v61 = vsel %vm5856_vm6, %v2516_v37, %v2651_v46  ;;  %v2382_v6 = vmax.f32 %v2350_v31, 0.0  ;;  %v2280_v8 = vadd.f32 %v1869_v44, %v1857_v5  ;;  %v1871_v43 = vpop.f32.mrb[54].mxu0  ;;  %v6582_v23 = vld [vmem:[#allocation3 + $0xa8] sm:$0x1] }
 0x279   : > { %2653 = vst [vmem:[#allocation3 + $0xb8] sm:$0x1] %v2652_v61  ;;  %v1873_v9 = vpop.f32.mrb[55].mxu0  ;;  %v2916_v32 = vshll.u32 %v6582_v23, 16 }
 0x27a   : > { %v2649_v15 = vsel %vm5850_vm5, %v2519_v14, %v6557_v25  ;;  %v2438_v45 = vpack.c.bf16 %v2382_v6, %v2381_v13  ;;  %v2312_v27 = vadd.f32 %v2280_v8, %v6468_v56  ;;  %v2281_v53 = vadd.f32 %v1873_v9, %v1861_v40  ;;  %v2663_v14 = vld [vmem:[#allocation3 + $0xd8] sm:$0x1] }
 0x27b   : > { %2650 = vst [vmem:[#allocation3 + $0xb0] sm:$0xff] %v2649_v15  ;;  %v2918_v26 = vrot.slane %v2916_v32, 1  ;;  %v2923_v5 = vshll.u32 %v2649_v15, 16  ;;  %v2921_v34 = vshrl.u32 %v2649_v15, 16 }
 0x27c   : > { %v2521_v0 = vshrl.u32 %v2438_v45, 16  ;;  %v2351_v3 = vadd.f32 %v6338_v38, %v2312_v27  ;;  %v2313_v58 = vadd.f32 %v2281_v53, %v6480_v57  ;;  %v2524_v2 = vshll.u32 %v2438_v45, 16 }
 0x27d   : > { %v2919_v17 = vsel %vm676_vm0, %v2914_v18, %v2918_v26  ;;  %v2925_v59 = vrot.slane %v2923_v5, 1 }
 0x27e   : > { %v2523_v33 = vrot.slane %v2521_v0, 7  ;;  %v2352_v39 = vadd.f32 %v6338_v38, %v2313_v58  ;;  %v1877_v4 = vpop.f32.mrb[56].mxu0  ;;  %3740 = vmatprep.mubr.bf16.mxu1 %v2919_v17  ;;  %4128 = vmatprep.mubr.bf16.mxu0 %v2919_v17  ;;  %v2383_v56 = vmax.f32 %v2351_v3, 0.0 }
 0x27f   : > { %v1879_v40 = vpop.f32.mrb[57].mxu0  ;;  %3741 = vmatmul.mubr.bf16.gmra.mrb[148].mxu1 %v2643_v20  ;;  %4129 = vmatmul.mubr.bf16.gmra.mrb[116].mxu0 %v2643_v20  ;;  %v2926_v42 = vor.u32 %v2925_v59, %v2921_v34  ;;  %v2669_v59 = vld [vmem:[#allocation3 + $0xe8] sm:$0x1] }
 0x280   : > { %v2526_v41 = vor.u32 %v2524_v2, %v2523_v33  ;;  %v2658_v19 = vsel %vm5856_vm6, %v2523_v33, %v2657_v11  ;;  %v2384_v57 = vmax.f32 %v2352_v39, 0.0  ;;  %v2282_v21 = vadd.f32 %v1879_v40, %v1867_v47  ;;  %v1881_v60 = vpop.f32.mrb[58].mxu0  ;;  %v6595_v12 = vld [vmem:[#allocation3 + $0xb8] sm:$0x1] }
 0x281   : > { %2659 = vst [vmem:[#allocation3 + $0xc8] sm:$0x1] %v2658_v19  ;;  %v1883_v24 = vpop.f32.mrb[59].mxu0  ;;  %v2928_v50 = vshll.u32 %v6595_v12, 16 }
 0x282   : > { %v2655_v46 = vsel %vm5850_vm5, %v2526_v41, %v6557_v25  ;;  %v2439_v20 = vpack.c.bf16 %v2384_v57, %v2383_v56  ;;  %v2314_v7 = vadd.f32 %v2282_v21, %v6465_v63  ;;  %v2283_v37 = vadd.f32 %v1883_v24, %v1871_v43 }
 0x283   : > { %2656 = vst [vmem:[#allocation3 + $0xc0] sm:$0xff] %v2655_v46  ;;  %v2930_v31 = vrot.slane %v2928_v50, 1  ;;  %v2935_v47 = vshll.u32 %v2655_v46, 16 }
 0x284   : > { %v2528_v13 = vshrl.u32 %v2439_v20, 16  ;;  %v2353_v44 = vadd.f32 %v6338_v38, %v2314_v7  ;;  %v2315_v35 = vadd.f32 %v2283_v37, %v6477_v62  ;;  %v2531_v8 = vshll.u32 %v2439_v20, 16 }
 0x285   : > { %v2931_v61 = vsel %vm676_vm0, %v2926_v42, %v2930_v31  ;;  %v2937_v32 = vrot.slane %v2935_v47, 1 }
 0x286   : > { %v2530_v6 = vrot.slane %v2528_v13, 7  ;;  %v2354_v9 = vadd.f32 %v6338_v38, %v2315_v35  ;;  %v1887_v29 = vpop.f32.mrb[60].mxu0  ;;  %3750 = vmatprep.mubr.bf16.mxu1 %v2931_v61  ;;  %4136 = vmatprep.mubr.bf16.mxu0 %v2931_v61  ;;  %v2385_v63 = vmax.f32 %v2353_v44, 0.0  ;;  %v2933_v38 = vshrl.u32 %v2655_v46, 16 }
 0x287   : > { %v1889_v43 = vpop.f32.mrb[61].mxu0  ;;  %3751 = vmatmul.mubr.bf16.gmra.mrb[152].mxu1 %v2649_v15  ;;  %4137 = vmatmul.mubr.bf16.gmra.mrb[120].mxu0 %v2649_v15 }
 0x288   : > { %v2533_v45 = vor.u32 %v2531_v8, %v2530_v6  ;;  %v2664_v27 = vsel %vm5856_vm6, %v2530_v6, %v2663_v14  ;;  %v2386_v62 = vmax.f32 %v2354_v9, 0.0  ;;  %v2284_v53 = vadd.f32 %v1889_v43, %v1877_v4  ;;  %v1891_v18 = vpop.f32.mrb[62].mxu0  ;;  %v6608_v26 = vld [vmem:[#allocation3 + $0xc8] sm:$0x1]  ;;  %v5400_v4 = vld [vmem:[%s7038_s2] ss:$0 sm:$0xff] }
 0x289   : > { %2665 = vst [vmem:[#allocation3 + $0xd8] sm:$0x1] %v2664_v27  ;;  %v1893_v5 = vpop.f32.mrb[63].mxu0  ;;  %v2940_v0 = vshll.u32 %v6608_v26, 16  ;;  %v2938_v17 = vor.u32 %v2937_v32, %v2933_v38  ;;  %v2675_v43 = vld [vmem:[#allocation3 + $0xf8] sm:$0x1] }
 0x28a   : > { %v2661_v3 = vsel %vm5850_vm5, %v2533_v45, %v6557_v25  ;;  %v2440_v15 = vpack.c.bf16 %v2386_v62, %v2385_v63  ;;  %v2316_v58 = vadd.f32 %v2284_v53, %v6500_v10  ;;  %v2285_v11 = vadd.f32 %v1893_v5, %v1881_v60 }
 0x28b   : > { %2662 = vst [vmem:[#allocation3 + $0xd0] sm:$0xff] %v2661_v3  ;;  %v2942_v33 = vrot.slane %v2940_v0, 1  ;;  %v2947_v2 = vshll.u32 %v2661_v3, 16  ;;  %v2945_v47 = vshrl.u32 %v2661_v3, 16 }
 0x28c   : > { %v2535_v39 = vshrl.u32 %v2440_v15, 16  ;;  %v2355_v56 = vadd.f32 %v5400_v4, %v2316_v58  ;;  %v2317_v40 = vadd.f32 %v2285_v11, %v6512_v54  ;;  %v2538_v57 = vshll.u32 %v2440_v15, 16 }
 0x28d   : > { %v2943_v41 = vsel %vm676_vm0, %v2938_v17, %v2942_v33  ;;  %v2949_v34 = vrot.slane %v2947_v2, 1 }
 0x28e   : > { %v2537_v19 = vrot.slane %v2535_v39, 7  ;;  %v2356_v21 = vadd.f32 %v5400_v4, %v2317_v40  ;;  %v1897_v10 = vpop.f32.mrb[64].mxu0  ;;  %3760 = vmatprep.mubr.bf16.mxu1 %v2943_v41  ;;  %4144 = vmatprep.mubr.bf16.mxu0 %v2943_v41  ;;  %v2387_v60 = vmax.f32 %v2355_v56, 0.0 }
 0x28f   : > { %v1898_v24 = vpop.f32.mrb[65].mxu0  ;;  %3761 = vmatmul.mubr.bf16.gmra.mrb[156].mxu1 %v2655_v46  ;;  %4145 = vmatmul.mubr.bf16.gmra.mrb[124].mxu0 %v2655_v46  ;;  %v2950_v61 = vor.u32 %v2949_v34, %v2945_v47 }
 0x290   : > { %v2540_v50 = vor.u32 %v2538_v57, %v2537_v19  ;;  %v2670_v20 = vsel %vm5856_vm6, %v2537_v19, %v2669_v59  ;;  %v2388_v7 = vmax.f32 %v2356_v21, 0.0  ;;  %v2286_v54 = vadd.f32 %v1898_v24, %v1887_v29  ;;  %v1900_v37 = vpop.f32.mrb[66].mxu0  ;;  %v6622_v42 = vld [vmem:[#allocation3 + $0xd8] sm:$0x1]  ;;  %v2681_v59 = vld [vmem:[#allocation3 + $0x108] sm:$0x1] }
 0x291   : > { %2671 = vst [vmem:[#allocation3 + $0xe8] sm:$0x1] %v2670_v20  ;;  %v1901_v31 = vpop.f32.mrb[67].mxu0  ;;  %v2952_v13 = vshll.u32 %v6622_v42, 16  ;;  %v2995_v37 = vshll.u32 %v6557_v25, 16 }
 0x292   : > { %v2667_v44 = vsel %vm5850_vm5, %v2540_v50, %v6557_v25  ;;  %v2441_v46 = vpack.c.bf16 %v2388_v7, %v2387_v60  ;;  %v2318_v35 = vadd.f32 %v2286_v54, %v6497_v1  ;;  %v2287_v14 = vadd.f32 %v1901_v31, %v1891_v18 }
 0x293   : > { %2668 = vst [vmem:[#allocation3 + $0xe0] sm:$0xff] %v2667_v44  ;;  %v2954_v6 = vrot.slane %v2952_v13, 1  ;;  %v2959_v8 = vshll.u32 %v2667_v44, 16  ;;  %v2957_v11 = vshrl.u32 %v2667_v44, 16  ;;  %v6649_v13 = vld [vmem:[#allocation3 + $0x118] sm:$0x1] }
 0x294   : > { %v2542_v9 = vshrl.u32 %v2441_v46, 16  ;;  %v2357_v29 = vadd.f32 %v5400_v4, %v2318_v35  ;;  %v2319_v63 = vadd.f32 %v2287_v14, %v6509_v16  ;;  %v2545_v27 = vshll.u32 %v2441_v46, 16 }
 0x295   : > { %v2955_v32 = vsel %vm676_vm0, %v2950_v61, %v2954_v6  ;;  %v2961_v1 = vrot.slane %v2959_v8, 1  ;;  %v2993_v14 = vshrl.u32 %v6557_v25, 16  ;;  %v2997_v61 = vrot.slane %v2995_v37, 1  ;;  %v2777_v37 = vld [vmem:[#allocation3 + $0x70] sm:$0xfe] }
 0x296   : > { %v2544_v45 = vrot.slane %v2542_v9, 7  ;;  %v2358_v62 = vadd.f32 %v5400_v4, %v2319_v63  ;;  %3770 = vmatprep.mubr.bf16.mxu1 %v2955_v32  ;;  %4152 = vmatprep.mubr.bf16.mxu0 %v2955_v32  ;;  %v1905_v53 = vpop.f32.mrb[72].mxu0  ;;  %v2389_v0 = vmax.f32 %v2357_v29, 0.0  ;;  %v3000_v6 = vshll.u32 %v6649_v13, 16 }
 0x297   : > { %3771 = vmatmul.mubr.bf16.gmra.mrb[160].mxu1 %v2661_v3  ;;  %4153 = vmatmul.mubr.bf16.gmra.mrb[128].mxu0 %v2661_v3  ;;  %v1906_v18 = vpop.f32.mrb[73].mxu0  ;;  %v2962_v39 = vor.u32 %v2961_v1, %v2957_v11  ;;  %v2998_v63 = vor.u32 %v2997_v61, %v2993_v14  ;;  %v2770_v53 = vld [vmem:[#allocation3] sm:$0xfe] }
 0x298   : > { %v2547_v5 = vor.u32 %v2545_v27, %v2544_v45  ;;  %v2676_v38 = vsel %vm5856_vm6, %v2544_v45, %v2675_v43  ;;  %v2390_v15 = vmax.f32 %v2358_v62, 0.0  ;;  %v6633_v16 = vld [vmem:[#allocation3 + $0xe8] sm:$0x1]  ;;  %v1907_v58 = vpop.f32.mrb[74].mxu0  ;;  %v3002_v43 = vrot.slane %v3000_v6, 1 }
 0x299   : > { %2677 = vst [vmem:[#allocation3 + $0xf8] sm:$0x1] %v2676_v38  ;;  %v2964_v17 = vshll.u32 %v6633_v16, 16  ;;  %v1908_v33 = vpop.f32.mrb[75].mxu0  ;;  %v3058_v1 = vrot.slane %v2770_v53, 1 }
 0x29a   : > { %v2673_v3 = vsel %vm5850_vm5, %v2547_v5, %v6557_v25  ;;  %v2442_v2 = vpack.c.bf16 %v2390_v15, %v2389_v0  ;;  %v3003_v62 = vsel %vm676_vm0, %v2998_v63, %v3002_v43  ;;  %v5401_v18 = vld [vmem:[#allocation3 + $0x8] sm:$0x1]  ;;  %v2771_v0 = vld [vmem:[#allocation3 + $0x10] sm:$0xfe]  ;;  %v2772_v15 = vld [vmem:[#allocation3 + $0x20] sm:$0xfe] }
 0x29b   : > { %2674 = vst [vmem:[#allocation3 + $0xf0] sm:$0xff] %v2673_v3  ;;  %v2966_v4 = vrot.slane %v2964_v17, 1  ;;  %v2971_v56 = vshll.u32 %v2673_v3, 16  ;;  %v2969_v7 = vshrl.u32 %v2673_v3, 16  ;;  %v3059_v5 = vrot.slane %v5401_v18, 1 }
 0x29c   : > { %v2549_v40 = vshrl.u32 %v2442_v2, 16  ;;  %v2552_v57 = vshll.u32 %v2442_v2, 16  ;;  %v3061_v58 = vrot.slane %v2771_v0, 1  ;;  %v3064_v11 = vrot.slane %v2772_v15, 1  ;;  %v5402_v17 = vld [vmem:[#allocation3 + $0x18] sm:$0x1] }
 0x29d   : > { %v2967_v41 = vsel %vm676_vm0, %v2962_v39, %v2966_v4  ;;  %v2973_v10 = vrot.slane %v2971_v56, 1  ;;  %v3060_v38 = vsel %vm947_vm7, %v3058_v1, %v3059_v5  ;;  %v3062_v33 = vrot.slane %v5402_v17, 1  ;;  %v2773_v56 = vld [vmem:[#allocation3 + $0x30] sm:$0xfe]  ;;  %v2780_v14 = vld [vmem:[#allocation3 + $0xa0] sm:$0xfe] }
 0x29e   : > { %v2551_v19 = vrot.slane %v2549_v40, 7  ;;  %3780 = vmatprep.mubr.bf16.mxu1 %v2967_v41  ;;  %4160 = vmatprep.mubr.bf16.mxu0 %v2967_v41  ;;  %v4054_v21 = vpop.f32.mrb[76].mxu0  ;;  %v2774_v40 = vld [vmem:[#allocation3 + $0x40] sm:$0xfe]  ;;  %v3088_v6 = vrot.slane %v2780_v14, 1  ;;  %v3098_v5 = vrot.slane %v6622_v42, 1 }
 0x29f   : > { %3781 = vmatmul.mubr.bf16.gmra.mrb[164].mxu1 %v2667_v44  ;;  %4161 = vmatmul.mubr.bf16.gmra.mrb[132].mxu0 %v2667_v44  ;;  %v4055_v60 = vpop.f32.mrb[77].mxu0  ;;  %v2974_v44 = vor.u32 %v2973_v10, %v2969_v7  ;;  %v3063_v39 = vsel %vm947_vm7, %v3061_v58, %v3062_v33  ;;  %v3070_v41 = vrot.slane %v2774_v40, 1  ;;  %v3074_v7 = vrot.slane %v6506_v22, 1  ;;  %v2782_v63 = vld [vmem:[#allocation3 + $0xc0] sm:$0xfe] }
 0x2a0   : > { %v2554_v24 = vor.u32 %v2552_v57, %v2551_v19  ;;  %v2682_v34 = vsel %vm5856_vm6, %v2551_v19, %v2681_v59  ;;  %v6642_v50 = vld [vmem:[#allocation3 + $0xf8] sm:$0x1]  ;;  %v4056_v20 = vpop.f32.mrb[78].mxu0  ;;  %v3067_v59 = vrot.slane %v2773_v56, 1  ;;  %v3068_v19 = vrot.slane %v6442_v36, 1 }
 0x2a1   : > { %2683 = vst [vmem:[#allocation3 + $0x108] sm:$0x1] %v2682_v34  ;;  %v2976_v54 = vshll.u32 %v6642_v50, 16  ;;  %v4057_v31 = vpop.f32.mrb[79].mxu0  ;;  %v3071_v57 = vrot.slane %v6474_v55, 1  ;;  %v3104_v17 = vrot.slane %v6642_v50, 1 }
 0x2a2   : > { %v2679_v47 = vsel %vm5850_vm5, %v2554_v24, %v6557_v25  ;;  %v3069_v21 = vsel %vm947_vm7, %v3067_v59, %v3068_v19  ;;  %v2775_v60 = vld [vmem:[#allocation3 + $0x50] sm:$0xfe]  ;;  %v2776_v24 = vld [vmem:[#allocation3 + $0x60] sm:$0xfe] }
 0x2a3   : > { %2680 = vst [vmem:[#allocation3 + $0x100] sm:$0xff] %v2679_v47  ;;  %v2978_v52 = vrot.slane %v2976_v54, 1  ;;  %v2983_v46 = vshll.u32 %v2679_v47, 16  ;;  %v2981_v9 = vshrl.u32 %v2679_v47, 16  ;;  %v3072_v10 = vsel %vm947_vm7, %v3070_v41, %v3071_v57  ;;  %v2778_v31 = vld [vmem:[#allocation3 + $0x80] sm:$0xfe] }
 0x2a4   : > { %v3073_v34 = vrot.slane %v2775_v60, 1  ;;  %v3076_v20 = vrot.slane %v2776_v24, 1  ;;  %v3077_v54 = vrot.slane %v6528_v48, 1  ;;  %v2784_v53 = vld [vmem:[#allocation3 + $0xe0] sm:$0xfe] }
 0x2a5   : > { %v2979_v35 = vsel %vm676_vm0, %v2974_v44, %v2978_v52  ;;  %v2985_v8 = vrot.slane %v2983_v46, 1  ;;  %v3082_v44 = vrot.slane %v2778_v31, 1  ;;  %v3080_v52 = vrot.slane %v6541_v28, 1  ;;  %v2785_v0 = vld [vmem:[#allocation3 + $0xf0] sm:$0xfe] }
 0x2a6   : > { %3790 = vmatprep.mubr.bf16.mxu1 %v2979_v35  ;;  %4168 = vmatprep.mubr.bf16.mxu0 %v2979_v35  ;;  %v3075_v36 = vsel %vm947_vm7, %v3073_v34, %v3074_v7  ;;  %v3078_v55 = vsel %vm947_vm7, %v3076_v20, %v3077_v54  ;;  %v3083_v46 = vrot.slane %v6554_v30, 1  ;;  %v2779_v35 = vld [vmem:[#allocation3 + $0x90] sm:$0xfe]  ;;  %v3100_v18 = vrot.slane %v2784_v53, 1 }
 0x2a7   : > { %3791 = vmatmul.mubr.bf16.gmra.mrb[168].mxu1 %v2673_v3  ;;  %4169 = vmatmul.mubr.bf16.gmra.mrb[136].mxu0 %v2673_v3  ;;  %v2986_v32 = vor.u32 %v2985_v8, %v2981_v9  ;;  %v5403_v3 = vld [vmem:[#allocation3 + $0x28] sm:$0x1]  ;;  %v3085_v61 = vrot.slane %v2779_v35, 1  ;;  %v3086_v8 = vrot.slane %v6569_v49, 1  ;;  %v3089_v9 = vrot.slane %v6582_v23, 1 }
 0x2a8   : > { %v6654_v51 = vld [vmem:[#allocation3 + $0x108] sm:$0x1]  ;;  %v3065_v2 = vrot.slane %v5403_v3, 1  ;;  %v3084_v48 = vsel %vm947_vm7, %v3082_v44, %v3083_v46  ;;  %v3103_v58 = vrot.slane %v2785_v0, 1  ;;  %v2787_v42 = vld [vmem:[#allocation3 + $0x110] sm:$0xfe] }
 0x2a9   : > { %v2988_v29 = vshll.u32 %v6654_v51, 16  ;;  %v3087_v28 = vsel %vm947_vm7, %v3085_v61, %v3086_v8  ;;  %v3090_v30 = vsel %vm947_vm7, %v3088_v6, %v3089_v9  ;;  %v3107_v33 = vrot.slane %v6654_v51, 1 }
 0x2aa   : > { %v3066_v4 = vsel %vm947_vm7, %v3064_v11, %v3065_v2  ;;  %v2786_v15 = vld [vmem:[#allocation3 + $0x100] sm:$0xfe]  ;;  %v3109_v2 = vrot.slane %v2787_v42, 1 }
 0x2ab   : > { %v2990_v45 = vrot.slane %v2988_v29, 1  ;;  %v2781_v29 = vld [vmem:[#allocation3 + $0xb0] sm:$0xfe]  ;;  %v3106_v11 = vrot.slane %v2786_v15, 1 }
 0x2ac   : > { %v3091_v43 = vrot.slane %v2781_v29, 1 }
 0x2ad   : > { %v2991_v27 = vsel %vm676_vm0, %v2986_v32, %v2990_v45  ;;  %v3094_v32 = vrot.slane %v2782_v63, 1  ;;  %v3092_v45 = vrot.slane %v6595_v12, 1  ;;  %v3108_v3 = vsel %vm947_vm7, %v3106_v11, %v3107_v33 }
 0x2ae   : > { %3800 = vmatprep.mubr.bf16.mxu1 %v2991_v27  ;;  %4176 = vmatprep.mubr.bf16.mxu0 %v2991_v27  ;;  %v3095_v27 = vrot.slane %v6608_v26, 1 }
 0x2af   : > { %3801 = vmatmul.mubr.bf16.gmra.mrb[172].mxu1 %v2679_v47  ;;  %4177 = vmatmul.mubr.bf16.gmra.mrb[140].mxu0 %v2679_v47  ;;  %v3079_v47 = vrot.slane %v2777_v37, 1  ;;  %v3093_v49 = vsel %vm947_vm7, %v3091_v43, %v3092_v45 }
 0x2b0   : > { %3808 = vmatprep.mubr.bf16.mxu1 %v3003_v62  ;;  %4184 = vmatprep.mubr.bf16.mxu0 %v3003_v62  ;;  %v3096_v23 = vsel %vm947_vm7, %v3094_v32, %v3095_v27  ;;  %v2783_v62 = vld [vmem:[#allocation3 + $0xd0] sm:$0xfe] }
 0x2b1   : > { %v3081_v22 = vsel %vm947_vm7, %v3079_v47, %v3080_v52  ;;  %v3097_v1 = vrot.slane %v2783_v62, 1 }
 0x2b3   : > { %v3099_v12 = vsel %vm947_vm7, %v3097_v1, %v3098_v5 }
 0x2b7   : > { %3809 = vmatmul.mubr.bf16.gmra.mrb[176].mxu1 %v6557_v25  ;;  %4185 = vmatmul.mubr.bf16.gmra.mrb[144].mxu0 %v6557_v25 }
 0x2b8   : > { %3847 = vmatprep.mubr.bf16.mxu1 %v6557_v25  ;;  %4957 = vmatprep.mubr.bf16.mxu0 %v3060_v38 }
 0x2bf   : > { %3848 = vmatmul.mubr.bf16.vlgmr.msra.gmra.mrb[108].mxu1 %v3060_v38  ;;  %4958 = vmatmul.mubr.bf16.vlgmr.msra.gmra.mrb[148].mxu0 %v3063_v39  ;;  %v3101_v38 = vrot.slane %v6633_v16, 1  ;;  %v3105_v16 = vsel %vm947_vm7, %v3103_v58, %v3104_v17 }
 0x2c0   : > { %4961 = vmatprep.mubr.bf16.mxu0 %v3066_v4  ;;  %3855 = vmatprep.mubr.bf16.mxu1 %v6557_v25 }
 0x2c1   : > { %v3102_v26 = vsel %vm947_vm7, %v3100_v18, %v3101_v38 }
 0x2c7   : > { %3856 = vmatmul.mubr.bf16.gmra.mrb[112].mxu1 %v3063_v39  ;;  %4962 = vmatmul.mubr.bf16.gmra.mrb[152].mxu0 %v3069_v21  ;;  %v3110_v39 = vrot.slane %v6649_v13, 1 }
 0x2c8   : > { %4965 = vmatprep.mubr.bf16.mxu0 %v3072_v10  ;;  %3865 = vmatprep.mubr.bf16.mxu1 %v6557_v25 }
 0x2cf   : > { %3866 = vmatmul.mubr.bf16.gmra.mrb[116].mxu1 %v3066_v4  ;;  %4966 = vmatmul.mubr.bf16.gmra.mrb[156].mxu0 %v3075_v36  ;;  %v3111_v4 = vsel %vm947_vm7, %v3109_v2, %v3110_v39 }
 0x2d0   : > { %4969 = vmatprep.mubr.bf16.mxu0 %v3078_v55  ;;  %3875 = vmatprep.mubr.bf16.mxu1 %v6557_v25 }
 0x2d7   : > { %3876 = vmatmul.mubr.bf16.gmra.mrb[120].mxu1 %v3069_v21  ;;  %4970 = vmatmul.mubr.bf16.gmra.mrb[160].mxu0 %v3081_v22 }
 0x2d8   : > { %4973 = vmatprep.mubr.bf16.mxu0 %v3084_v48  ;;  %3885 = vmatprep.mubr.bf16.mxu1 %v6557_v25 }
 0x2df   : > { %3886 = vmatmul.mubr.bf16.gmra.mrb[124].mxu1 %v3072_v10  ;;  %4974 = vmatmul.mubr.bf16.gmra.mrb[164].mxu0 %v3087_v28 }
 0x2e0   : > { %4977 = vmatprep.mubr.bf16.mxu0 %v3090_v30  ;;  %3895 = vmatprep.mubr.bf16.mxu1 %v6557_v25 }
 0x2e7   : > { %3896 = vmatmul.mubr.bf16.gmra.mrb[128].mxu1 %v3075_v36  ;;  %4978 = vmatmul.mubr.bf16.gmra.mrb[168].mxu0 %v3093_v49 }
 0x2e8   : > { %4981 = vmatprep.mubr.bf16.mxu0 %v3096_v23  ;;  %3905 = vmatprep.mubr.bf16.mxu1 %v6557_v25 }
 0x2ef   : > { %3906 = vmatmul.mubr.bf16.gmra.mrb[132].mxu1 %v3078_v55  ;;  %4982 = vmatmul.mubr.bf16.gmra.mrb[172].mxu0 %v3099_v12 }
 0x2f0   : > { %4985 = vmatprep.mubr.bf16.mxu0 %v3102_v26  ;;  %3915 = vmatprep.mubr.bf16.mxu1 %v6557_v25 }
 0x2f7   : > { %3916 = vmatmul.mubr.bf16.gmra.mrb[136].mxu1 %v3081_v22  ;;  %4986 = vmatmul.mubr.bf16.gmra.mrb[176].mxu0 %v3105_v16 }
 0x2f8   : > { %4989 = vmatprep.mubr.bf16.mxu0 %v3108_v3  ;;  %3925 = vmatprep.mubr.bf16.mxu1 %v6557_v25 }
 0x2ff   : > { %3926 = vmatmul.mubr.bf16.gmra.mrb[140].mxu1 %v3084_v48  ;;  %4990 = vmatmul.mubr.bf16.gmra.mrb[180].mxu0 %v3111_v4 }
 0x300   : > { %3935 = vmatprep.mubr.bf16.mxu1 %v6557_v25 }
 0x307   : > { %3936 = vmatmul.mubr.bf16.gmra.mrb[144].mxu1 %v3087_v28 }
 0x308   : > { %3945 = vmatprep.mubr.bf16.mxu1 %v6557_v25 }
 0x30a   : > { %v4060_v50 = vpop.f32.mrb[80].mxu0 }
 0x30b   : > { %v4061_v51 = vpop.f32.mrb[81].mxu0 }
 0x30c   : > { %v4062_v56 = vpop.f32.mrb[82].mxu0 }
 0x30d   : > { %v4063_v40 = vpop.f32.mrb[83].mxu0 }
 0x30f   : > { %3946 = vmatmul.mubr.bf16.gmra.mrb[148].mxu1 %v3090_v30 }
 0x310   : > { %3955 = vmatprep.mubr.bf16.mxu1 %v6557_v25 }
 0x312   : > { %v6706_v59 = vpop.f32.mrb[84].mxu0 }
 0x313   : > { %v4068_v41 = vpop.f32.mrb[85].mxu0 }
 0x314   : > { %v6708_v13 = vpop.f32.mrb[86].mxu0 }
 0x315   : > { %v4071_v19 = vpop.f32.mrb[87].mxu0 }
 0x317   : > { %3956 = vmatmul.mubr.bf16.gmra.mrb[152].mxu1 %v3093_v49 }
 0x318   : > { %3965 = vmatprep.mubr.bf16.mxu1 %v6557_v25 }
 0x31a   : > { %v6711_v57 = vpop.f32.mrb[88].mxu0 }
 0x31b   : > { %v4076_v21 = vpop.f32.mrb[89].mxu0 }
 0x31c   : > { %v6713_v10 = vpop.f32.mrb[90].mxu0 }
 0x31d   : > { %v4079_v60 = vpop.f32.mrb[91].mxu0 }
 0x31f   : > { %3966 = vmatmul.mubr.bf16.gmra.mrb[156].mxu1 %v3096_v23 }
 0x320   : > { %3975 = vmatprep.mubr.bf16.mxu1 %v6557_v25 }
 0x322   : > { %v6716_v24 = vpop.f32.mrb[92].mxu0 }
 0x323   : > { %v4084_v34 = vpop.f32.mrb[93].mxu0 }
 0x324   : > { %v6718_v20 = vpop.f32.mrb[94].mxu0 }
 0x325   : > { %v4087_v7 = vpop.f32.mrb[95].mxu0 }
 0x327   : > { %3976 = vmatmul.mubr.bf16.gmra.mrb[160].mxu1 %v3099_v12 }
 0x328   : > { %3985 = vmatprep.mubr.bf16.mxu1 %v6557_v25 }
 0x32a   : > { %v6721_v54 = vpop.f32.mrb[96].mxu0 }
 0x32b   : > { %v4092_v36 = vpop.f32.mrb[97].mxu0 }
 0x32c   : > { %v6723_v55 = vpop.f32.mrb[98].mxu0 }
 0x32d   : > { %v4095_v37 = vpop.f32.mrb[99].mxu0 }
 0x32f   : > { %3986 = vmatmul.mubr.bf16.gmra.mrb[164].mxu1 %v3102_v26 }
 0x330   : > { %3995 = vmatprep.mubr.bf16.mxu1 %v6557_v25 }
 0x332   : > { %v6726_v31 = vpop.f32.mrb[100].mxu0 }
 0x333   : > { %v4100_v47 = vpop.f32.mrb[101].mxu0 }
 0x334   : > { %v6728_v44 = vpop.f32.mrb[102].mxu0 }
 0x335   : > { %v4103_v52 = vpop.f32.mrb[103].mxu0 }
 0x337   : > { %3996 = vmatmul.mubr.bf16.gmra.mrb[168].mxu1 %v3105_v16 }
 0x338   : > { %4005 = vmatprep.mubr.bf16.mxu1 %v6557_v25 }
 0x33a   : > { %v6731_v46 = vpop.f32.mrb[104].mxu0 }
 0x33b   : > { %v4108_v22 = vpop.f32.mrb[105].mxu0 }
 0x33c   : > { %v6733_v48 = vpop.f32.mrb[106].mxu0 }
 0x33d   : > { %v4111_v35 = vpop.f32.mrb[107].mxu0 }
 0x33f   : > { %4006 = vmatmul.mubr.bf16.gmra.mrb[172].mxu1 %v3108_v3 }
 0x340   : > { %4013 = vmatprep.mubr.bf16.mxu1 %v6557_v25 }
 0x342   : > { %v6736_v14 = vpop.f32.mrb[108].mxu0 }
 0x343   : > { %v4116_v61 = vpop.f32.mrb[109].mxu0 }
 0x344   : > { %v6738_v6 = vpop.f32.mrb[110].mxu0 }
 0x345   : > { %v4119_v8 = vpop.f32.mrb[111].mxu0 }
 0x347   : > { %4014 = vmatmul.mubr.bf16.gmra.mrb[180].mxu1 %v3111_v4 }
 0x34a   : > { %v6740_v9 = vpop.f32.mrb[112].mxu0 }
 0x34b   : > { %v4124_v28 = vpop.f32.mrb[113].mxu0 }
 0x34c   : > { %v6742_v30 = vpop.f32.mrb[114].mxu0 }
 0x34d   : > { %v4127_v29 = vpop.f32.mrb[115].mxu0 }
 0x352   : > { %v6744_v63 = vpop.f32.mrb[116].mxu0 }
 0x353   : > { %v4132_v43 = vpop.f32.mrb[117].mxu0 }
 0x354   : > { %v6746_v32 = vpop.f32.mrb[118].mxu0 }
 0x355   : > { %v4135_v45 = vpop.f32.mrb[119].mxu0 }
 0x35a   : > { %v6748_v25 = vpop.f32.mrb[120].mxu0 }
 0x35b   : > { %v4140_v27 = vpop.f32.mrb[121].mxu0 }
 0x35c   : > { %v6750_v49 = vpop.f32.mrb[122].mxu0 }
 0x35d   : > { %v4143_v23 = vpop.f32.mrb[123].mxu0 }
 0x362   : > { %v6752_v62 = vpop.f32.mrb[124].mxu0 }
 0x363   : > { %v4148_v53 = vpop.f32.mrb[125].mxu0 }
 0x364   : > { %v6754_v1 = vpop.f32.mrb[126].mxu0 }
 0x365   : > { %v4151_v18 = vpop.f32.mrb[127].mxu0 }
 0x366   : > { %v6781_v18 = vld [vmem:[%s7040_s4] ss:$0 sm:$0xff] }
 0x36a   : > { %v6756_v5 = vpop.f32.mrb[128].mxu0 }
 0x36b   : > { %v4156_v38 = vpop.f32.mrb[129].mxu0 }
 0x36c   : > { %v6758_v12 = vpop.f32.mrb[130].mxu0 }
 0x36d   : > { %v4159_v26 = vpop.f32.mrb[131].mxu0 }
 0x372   : > { %v6760_v0 = vpop.f32.mrb[132].mxu0 }
 0x373   : > { %v4164_v15 = vpop.f32.mrb[133].mxu0 }
 0x374   : > { %v6762_v58 = vpop.f32.mrb[134].mxu0 }
 0x375   : > { %v4167_v11 = vpop.f32.mrb[135].mxu0 }
 0x37a   : > { %v6764_v17 = vpop.f32.mrb[136].mxu0 }
 0x37b   : > { %v4172_v33 = vpop.f32.mrb[137].mxu0 }
 0x37c   : > { %v6766_v42 = vpop.f32.mrb[138].mxu0 }
 0x37d   : > { %v4175_v16 = vpop.f32.mrb[139].mxu0 }
 0x37e   : > { %v2684_v16 = vld [vmem:[%s5781_s6] sm:$0xff] }
 0x382   : > { %v6768_v3 = vpop.f32.mrb[140].mxu0 }
 0x383   : > { %v4180_v2 = vpop.f32.mrb[141].mxu0 }
 0x384   : > { %v6770_v39 = vpop.f32.mrb[142].mxu0 }
 0x385   : > { %v4183_v4 = vpop.f32.mrb[143].mxu0 }
 0x38a   : > { %v3810_v50 = vpop.f32.mrb[176].mxu1  ;;  %v6772_v51 = vpop.f32.mrb[144].mxu0 }
 0x38b   : > { %v3811_v56 = vpop.f32.mrb[177].mxu1  ;;  %v4188_v40 = vpop.f32.mrb[145].mxu0 }
 0x38c   : > { %v3812_v41 = vpop.f32.mrb[178].mxu1  ;;  %v6774_v19 = vpop.f32.mrb[146].mxu0 }
 0x38d   : > { %v3813_v21 = vpop.f32.mrb[179].mxu1  ;;  %v4191_v60 = vpop.f32.mrb[147].mxu0 }
 0x392   : > { %v3849_v34 = vpop.f32.mrb[108].mxu1  ;;  %v4959_v7 = vpop.f32.mrb[148].mxu0 }
 0x393   : > { %v3851_v36 = vpop.f32.mrb[109].mxu1  ;;  %v4227_v37 = vpop.f32.mrb[149].mxu0 }
 0x394   : > { %v3852_v47 = vpop.f32.mrb[110].mxu1  ;;  %v4960_v52 = vpop.f32.mrb[150].mxu0 }
 0x395   : > { %v3854_v22 = vpop.f32.mrb[111].mxu1  ;;  %v4229_v35 = vpop.f32.mrb[151].mxu0 }
 0x39a   : > { %v3857_v61 = vpop.f32.mrb[112].mxu1  ;;  %v4963_v8 = vpop.f32.mrb[152].mxu0 }
 0x39b   : > { %v4248_v28 = vadd.f32 %v4963_v8, %v6711_v57  ;;  %v3859_v29 = vpop.f32.mrb[113].mxu1  ;;  %v4239_v43 = vpop.f32.mrb[153].mxu0 }
 0x39c   : > { %v4366_v45 = vadd.f32 %v3859_v29, %v3849_v34  ;;  %v4240_v27 = vadd.f32 %v4239_v43, %v6706_v59  ;;  %v3861_v23 = vpop.f32.mrb[114].mxu1  ;;  %v4964_v53 = vpop.f32.mrb[154].mxu0  ;;  %v2685_v59 = vld [vmem:[%s5781_s6 + $0x8] sm:$0xff] }
 0x39d   : > { %v4251_v38 = vadd.f32 %v4964_v53, %v6713_v10  ;;  %v3863_v26 = vpop.f32.mrb[115].mxu1  ;;  %v4242_v15 = vpop.f32.mrb[155].mxu0 }
 0x39e   : > { %v4398_v11 = vadd.f32 %v4366_v45, %v4240_v27  ;;  %v4367_v33 = vadd.f32 %v3863_v26, %v3852_v47  ;;  %v4243_v57 = vadd.f32 %v4242_v15, %v6708_v13 }
 0x3a0   : > { %v4437_v2 = vadd.f32 %v6781_v18, %v4398_v11  ;;  %v4399_v4 = vadd.f32 %v4367_v33, %v4243_v57 }
 0x3a2   : > { %v4469_v50 = vadd.f32 %v4437_v2, %v2684_v16  ;;  %v4438_v56 = vadd.f32 %v6781_v18, %v4399_v4  ;;  %v3867_v40 = vpop.f32.mrb[116].mxu1  ;;  %v4967_v41 = vpop.f32.mrb[156].mxu0 }
 0x3a3   : > { %v6790_v21 = vadd.f32 %v4967_v41, %v6721_v54  ;;  %v3869_v10 = vpop.f32.mrb[117].mxu1  ;;  %v4255_v60 = vpop.f32.mrb[157].mxu0 }
 0x3a4   : > { %v4501_v34 = vmax.f32 %v4469_v50, 0.0  ;;  %v4470_v7 = vadd.f32 %v4438_v56, %v2685_v59  ;;  %v4368_v13 = vadd.f32 %v3869_v10, %v3857_v61  ;;  %v4256_v36 = vadd.f32 %v4255_v60, %v6716_v24  ;;  %v3871_v37 = vpop.f32.mrb[118].mxu1  ;;  %v4968_v47 = vpop.f32.mrb[158].mxu0  ;;  %v2686_v24 = vld [vmem:[%s5781_s6 + $0x10] sm:$0xff]  ;;  %v2688_v60 = vld [vmem:[%s5781_s6 + $0x20] sm:$0xff] }
 0x3a5   : > { %v6794_v52 = vadd.f32 %v4968_v47, %v6723_v55  ;;  %v3873_v22 = vpop.f32.mrb[119].mxu1  ;;  %v4258_v35 = vpop.f32.mrb[159].mxu0  ;;  %v2687_v55 = vld [vmem:[%s5781_s6 + $0x18] sm:$0xff] }
 0x3a6   : > { %4533 = vst [vmem:[%s6798_s30] sm:$0xff] %v4501_v34  ;;  %v4502_v54 = vmax.f32 %v4470_v7, 0.0  ;;  %v4400_v8 = vadd.f32 %v4368_v13, %v4248_v28  ;;  %v4369_v29 = vadd.f32 %v3873_v22, %v3861_v23  ;;  %v4259_v61 = vadd.f32 %v4258_v35, %v6718_v20  ;;  %v2689_v7 = vld [vmem:[%s5781_s6 + $0x28] sm:$0xff] }
 0x3a8   : > { %4534 = vst [vmem:[%s6798_s30 + $0x8] sm:$0xff] %v4502_v54  ;;  %v4439_v43 = vadd.f32 %v6781_v18, %v4400_v8  ;;  %v4401_v45 = vadd.f32 %v4369_v29, %v4251_v38 }
 0x3aa   : > { %v4471_v27 = vadd.f32 %v4439_v43, %v2686_v24  ;;  %v4440_v53 = vadd.f32 %v6781_v18, %v4401_v45  ;;  %v3877_v26 = vpop.f32.mrb[120].mxu1  ;;  %v4971_v15 = vpop.f32.mrb[160].mxu0 }
 0x3ab   : > { %v6808_v11 = vadd.f32 %v4971_v15, %v6731_v46  ;;  %v3879_v33 = vpop.f32.mrb[121].mxu1  ;;  %v4271_v28 = vpop.f32.mrb[161].mxu0 }
 0x3ac   : > { %v4503_v20 = vmax.f32 %v4471_v27, 0.0  ;;  %v4472_v23 = vadd.f32 %v4440_v53, %v2687_v55  ;;  %v4370_v57 = vadd.f32 %v3879_v33, %v3867_v40  ;;  %v4272_v38 = vadd.f32 %v4271_v28, %v6726_v31  ;;  %v3881_v16 = vpop.f32.mrb[122].mxu1  ;;  %v4972_v2 = vpop.f32.mrb[162].mxu0  ;;  %v2691_v33 = vld [vmem:[%s5781_s6 + $0x38] sm:$0xff] }
 0x3ad   : > { %v6812_v4 = vadd.f32 %v4972_v2, %v6733_v48  ;;  %v3883_v59 = vpop.f32.mrb[123].mxu1  ;;  %v4274_v50 = vpop.f32.mrb[163].mxu0 }
 0x3ae   : > { %4535 = vst [vmem:[%s6798_s30 + $0x10] sm:$0xff] %v4503_v20  ;;  %v4504_v46 = vmax.f32 %v4472_v23, 0.0  ;;  %v4402_v56 = vadd.f32 %v4370_v57, %v4256_v36  ;;  %v4371_v41 = vadd.f32 %v3883_v59, %v3871_v37  ;;  %v4275_v10 = vadd.f32 %v4274_v50, %v6728_v44 }
 0x3b0   : > { %4536 = vst [vmem:[%s6798_s30 + $0x18] sm:$0xff] %v4504_v46  ;;  %v4441_v40 = vadd.f32 %v6781_v18, %v4402_v56  ;;  %v4403_v34 = vadd.f32 %v4371_v41, %v4259_v61 }
 0x3b2   : > { %v4473_v31 = vadd.f32 %v4441_v40, %v2688_v60  ;;  %v4442_v13 = vadd.f32 %v6781_v18, %v4403_v34  ;;  %v3887_v48 = vpop.f32.mrb[124].mxu1  ;;  %v4975_v47 = vpop.f32.mrb[164].mxu0 }
 0x3b3   : > { %v6822_v22 = vadd.f32 %v4975_v47, %v6740_v9  ;;  %v3889_v35 = vpop.f32.mrb[125].mxu1  ;;  %v4287_v36 = vpop.f32.mrb[165].mxu0 }
 0x3b4   : > { %v4505_v44 = vmax.f32 %v4473_v31, 0.0  ;;  %v4474_v37 = vadd.f32 %v4442_v13, %v2689_v7  ;;  %v4372_v54 = vadd.f32 %v3889_v35, %v3877_v26  ;;  %v6825_v8 = vadd.f32 %v4287_v36, %v6736_v14  ;;  %v3891_v29 = vpop.f32.mrb[126].mxu1  ;;  %v4976_v61 = vpop.f32.mrb[166].mxu0  ;;  %v2690_v26 = vld [vmem:[%s5781_s6 + $0x30] sm:$0xff]  ;;  %v2692_v31 = vld [vmem:[%s5781_s6 + $0x40] sm:$0xff] }
 0x3b5   : > { %v6828_v24 = vadd.f32 %v4976_v61, %v6742_v30  ;;  %v3893_v43 = vpop.f32.mrb[127].mxu1  ;;  %v4290_v45 = vpop.f32.mrb[167].mxu0 }
 0x3b6   : > { %4537 = vst [vmem:[%s6798_s30 + $0x20] sm:$0xff] %v4505_v44  ;;  %v4506_v9 = vmax.f32 %v4474_v37, 0.0  ;;  %v4404_v55 = vadd.f32 %v4372_v54, %v6790_v21  ;;  %v4373_v27 = vadd.f32 %v3893_v43, %v3881_v16  ;;  %v6833_v53 = vadd.f32 %v4290_v45, %v6738_v6 }
 0x3b8   : > { %4538 = vst [vmem:[%s6798_s30 + $0x28] sm:$0xff] %v4506_v9  ;;  %v4443_v14 = vadd.f32 %v6781_v18, %v4404_v55  ;;  %v4405_v15 = vadd.f32 %v4373_v27, %v6794_v52 }
 0x3ba   : > { %v4475_v28 = vadd.f32 %v4443_v14, %v2690_v26  ;;  %v4444_v30 = vadd.f32 %v6781_v18, %v4405_v15  ;;  %v3897_v20 = vpop.f32.mrb[128].mxu1  ;;  %v4979_v23 = vpop.f32.mrb[168].mxu0  ;;  %v2694_v15 = vld [vmem:[%s5781_s6 + $0x50] sm:$0xff] }
 0x3bb   : > { %v6842_v57 = vadd.f32 %v4979_v23, %v6748_v25  ;;  %v3899_v21 = vpop.f32.mrb[129].mxu1  ;;  %v4303_v6 = vpop.f32.mrb[169].mxu0 }
 0x3bc   : > { %v4507_v16 = vmax.f32 %v4475_v28, 0.0  ;;  %v4476_v2 = vadd.f32 %v4444_v30, %v2691_v33  ;;  %v4374_v59 = vadd.f32 %v3899_v21, %v3887_v48  ;;  %v6845_v52 = vadd.f32 %v4303_v6, %v6744_v63  ;;  %v3901_v50 = vpop.f32.mrb[130].mxu1  ;;  %v4980_v46 = vpop.f32.mrb[170].mxu0  ;;  %v2693_v48 = vld [vmem:[%s5781_s6 + $0x48] sm:$0xff]  ;;  %v2695_v28 = vld [vmem:[%s5781_s6 + $0x58] sm:$0xff] }
 0x3bd   : > { %v6848_v56 = vadd.f32 %v4980_v46, %v6750_v49  ;;  %v3903_v41 = vpop.f32.mrb[131].mxu1  ;;  %v4306_v60 = vpop.f32.mrb[171].mxu0 }
 0x3be   : > { %4539 = vst [vmem:[%s6798_s30 + $0x30] sm:$0xff] %v4507_v16  ;;  %v4508_v25 = vmax.f32 %v4476_v2, 0.0  ;;  %v4406_v40 = vadd.f32 %v4374_v59, %v4272_v38  ;;  %v4375_v34 = vadd.f32 %v3903_v41, %v3891_v29  ;;  %v6852_v7 = vadd.f32 %v4306_v60, %v6746_v32 }
 0x3c0   : > { %4540 = vst [vmem:[%s6798_s30 + $0x38] sm:$0xff] %v4508_v25  ;;  %v4445_v13 = vadd.f32 %v6781_v18, %v4406_v40  ;;  %v4407_v63 = vadd.f32 %v4375_v34, %v4275_v10 }
 0x3c2   : > { %v4477_v47 = vadd.f32 %v4445_v13, %v2692_v31  ;;  %v4446_v49 = vadd.f32 %v6781_v18, %v4407_v63  ;;  %v3907_v35 = vpop.f32.mrb[132].mxu1  ;;  %v4983_v36 = vpop.f32.mrb[172].mxu0  ;;  %v2696_v31 = vld [vmem:[%s5781_s6 + $0x60] sm:$0xff]  ;;  %v2697_v63 = vld [vmem:[%s5781_s6 + $0x68] sm:$0xff] }
 0x3c3   : > { %v6860_v44 = vadd.f32 %v4983_v36, %v6756_v5  ;;  %v3909_v38 = vpop.f32.mrb[133].mxu1  ;;  %v4319_v37 = vpop.f32.mrb[173].mxu0 }
 0x3c4   : > { %v4509_v32 = vmax.f32 %v4477_v47, 0.0  ;;  %v4478_v54 = vadd.f32 %v4446_v49, %v2693_v48  ;;  %v4376_v29 = vadd.f32 %v3909_v38, %v3897_v20  ;;  %v6863_v10 = vadd.f32 %v4319_v37, %v6752_v62  ;;  %v3911_v61 = vpop.f32.mrb[134].mxu1  ;;  %v4984_v43 = vpop.f32.mrb[174].mxu0 }
 0x3c5   : > { %v6866_v45 = vadd.f32 %v4984_v43, %v6758_v12  ;;  %v3913_v9 = vpop.f32.mrb[135].mxu1  ;;  %v4322_v55 = vpop.f32.mrb[175].mxu0 }
 0x3c6   : > { %4541 = vst [vmem:[%s6798_s30 + $0x40] sm:$0xff] %v4509_v32  ;;  %v4510_v5 = vmax.f32 %v4478_v54, 0.0  ;;  %v4408_v27 = vadd.f32 %v4376_v29, %v6808_v11  ;;  %v4377_v26 = vadd.f32 %v3913_v9, %v3901_v50  ;;  %v6871_v14 = vadd.f32 %v4322_v55, %v6754_v1 }
 0x3c8   : > { %4542 = vst [vmem:[%s6798_s30 + $0x48] sm:$0xff] %v4510_v5  ;;  %v4447_v62 = vadd.f32 %v6781_v18, %v4408_v27  ;;  %v4409_v33 = vadd.f32 %v4377_v26, %v6812_v4  ;;  %v2698_v27 = vld [vmem:[%s5781_s6 + $0x70] sm:$0xff] }
 0x3ca   : > { %v4479_v30 = vadd.f32 %v4447_v62, %v2694_v15  ;;  %v4448_v12 = vadd.f32 %v6781_v18, %v4409_v33  ;;  %v3917_v20 = vpop.f32.mrb[136].mxu1  ;;  %v4987_v23 = vpop.f32.mrb[176].mxu0 }
 0x3cb   : > { %v6880_v21 = vadd.f32 %v4987_v23, %v6764_v17  ;;  %v3919_v11 = vpop.f32.mrb[137].mxu1  ;;  %v4335_v1 = vpop.f32.mrb[177].mxu0 }
 0x3cc   : > { %v4511_v6 = vmax.f32 %v4479_v30, 0.0  ;;  %v4480_v16 = vadd.f32 %v4448_v12, %v2695_v28  ;;  %v4378_v2 = vadd.f32 %v3919_v11, %v3907_v35  ;;  %v6883_v4 = vadd.f32 %v4335_v1, %v6760_v0  ;;  %v3921_v59 = vpop.f32.mrb[138].mxu1  ;;  %v4988_v50 = vpop.f32.mrb[178].mxu0 }
 0x3cd   : > { %v6886_v46 = vadd.f32 %v4988_v50, %v6766_v42  ;;  %v3923_v41 = vpop.f32.mrb[139].mxu1  ;;  %v4338_v60 = vpop.f32.mrb[179].mxu0 }
 0x3ce   : > { %4543 = vst [vmem:[%s6798_s30 + $0x50] sm:$0xff] %v4511_v6  ;;  %v4512_v17 = vmax.f32 %v4480_v16, 0.0  ;;  %v4410_v25 = vadd.f32 %v4378_v2, %v6825_v8  ;;  %v4379_v40 = vadd.f32 %v3923_v41, %v3911_v61  ;;  %v6891_v34 = vadd.f32 %v4338_v60, %v6762_v58  ;;  %v2701_v2 = vld [vmem:[%s5781_s6 + $0x88] sm:$0xff] }
 0x3d0   : > { %4544 = vst [vmem:[%s6798_s30 + $0x58] sm:$0xff] %v4512_v17  ;;  %v4449_v0 = vadd.f32 %v6781_v18, %v4410_v25  ;;  %v4411_v13 = vadd.f32 %v4379_v40, %v6833_v53 }
 0x3d2   : > { %v4481_v48 = vadd.f32 %v4449_v0, %v2696_v31  ;;  %v4450_v42 = vadd.f32 %v6781_v18, %v4411_v13  ;;  %v3927_v47 = vpop.f32.mrb[140].mxu1  ;;  %v4991_v49 = vpop.f32.mrb[180].mxu0 }
 0x3d3   : > { %v6900_v35 = vadd.f32 %v4991_v49, %v6772_v51  ;;  %v3929_v8 = vpop.f32.mrb[141].mxu1  ;;  %v4351_v58 = vpop.f32.mrb[181].mxu0 }
 0x3d4   : > { %v4513_v36 = vmax.f32 %v4481_v48, 0.0  ;;  %v4482_v38 = vadd.f32 %v4450_v42, %v2697_v63  ;;  %v4380_v37 = vadd.f32 %v3929_v8, %v3917_v20  ;;  %v6903_v53 = vadd.f32 %v4351_v58, %v6768_v3  ;;  %v3931_v32 = vpop.f32.mrb[142].mxu1  ;;  %v4992_v54 = vpop.f32.mrb[182].mxu0 }
 0x3d5   : > { %v6906_v29 = vadd.f32 %v4992_v54, %v6774_v19  ;;  %v3933_v61 = vpop.f32.mrb[143].mxu1  ;;  %v4354_v43 = vpop.f32.mrb[183].mxu0  ;;  %v2699_v19 = vld [vmem:[%s5781_s6 + $0x78] sm:$0xff] }
 0x3d6   : > { %4545 = vst [vmem:[%s6798_s30 + $0x60] sm:$0xff] %v4513_v36  ;;  %v4514_v51 = vmax.f32 %v4482_v38, 0.0  ;;  %v4412_v9 = vadd.f32 %v4380_v37, %v6822_v22  ;;  %v4381_v55 = vadd.f32 %v3933_v61, %v3921_v59  ;;  %v6911_v5 = vadd.f32 %v4354_v43, %v6770_v39 }
 0x3d8   : > { %4546 = vst [vmem:[%s6798_s30 + $0x68] sm:$0xff] %v4514_v51  ;;  %v4451_v3 = vadd.f32 %v6781_v18, %v4412_v9  ;;  %v4413_v26 = vadd.f32 %v4381_v55, %v6828_v24  ;;  %v2700_v24 = vld [vmem:[%s5781_s6 + $0x80] sm:$0xff] }
 0x3da   : > { %v4483_v15 = vadd.f32 %v4451_v3, %v2698_v27  ;;  %v4452_v62 = vadd.f32 %v6781_v18, %v4413_v26  ;;  %v3937_v33 = vpop.f32.mrb[144].mxu1  ;;  %v2705_v27 = vld [vmem:[%s5781_s6 + $0xa8] sm:$0xff] }
 0x3db   : > { %v3939_v22 = vpop.f32.mrb[145].mxu1 }
 0x3dc   : > { %v4515_v28 = vmax.f32 %v4483_v15, 0.0  ;;  %v4484_v30 = vadd.f32 %v4452_v62, %v2699_v19  ;;  %v4382_v12 = vadd.f32 %v3939_v22, %v3927_v47  ;;  %v3941_v39 = vpop.f32.mrb[146].mxu1  ;;  %v2703_v47 = vld [vmem:[%s5781_s6 + $0x98] sm:$0xff] }
 0x3dd   : > { %v3943_v20 = vpop.f32.mrb[147].mxu1 }
 0x3de   : > { %4547 = vst [vmem:[%s6798_s30 + $0x70] sm:$0xff] %v4515_v28  ;;  %v4516_v23 = vmax.f32 %v4484_v30, 0.0  ;;  %v4414_v11 = vadd.f32 %v4382_v12, %v6845_v52  ;;  %v4383_v1 = vadd.f32 %v3943_v20, %v3931_v32 }
 0x3e0   : > { %4548 = vst [vmem:[%s6798_s30 + $0x78] sm:$0xff] %v4516_v23  ;;  %v4453_v6 = vadd.f32 %v6781_v18, %v4414_v11  ;;  %v4415_v16 = vadd.f32 %v4383_v1, %v6852_v7  ;;  %v2702_v7 = vld [vmem:[%s5781_s6 + $0x90] sm:$0xff]  ;;  %v2707_v11 = vld [vmem:[%s5781_s6 + $0xb8] sm:$0xff] }
 0x3e2   : > { %v4485_v59 = vadd.f32 %v4453_v6, %v2700_v24  ;;  %v4454_v50 = vadd.f32 %v6781_v18, %v4415_v16  ;;  %v3947_v41 = vpop.f32.mrb[148].mxu1 }
 0x3e3   : > { %v3949_v60 = vpop.f32.mrb[149].mxu1 }
 0x3e4   : > { %v4517_v17 = vmax.f32 %v4485_v59, 0.0  ;;  %v4486_v25 = vadd.f32 %v4454_v50, %v2701_v2  ;;  %v4384_v52 = vadd.f32 %v3949_v60, %v3937_v33  ;;  %v3951_v40 = vpop.f32.mrb[150].mxu1 }
 0x3e5   : > { %v3953_v31 = vpop.f32.mrb[151].mxu1 }
 0x3e6   : > { %4549 = vst [vmem:[%s6798_s30 + $0x80] sm:$0xff] %v4517_v17  ;;  %v4518_v0 = vmax.f32 %v4486_v25, 0.0  ;;  %v4416_v13 = vadd.f32 %v4384_v52, %v6842_v57  ;;  %v4385_v63 = vadd.f32 %v3953_v31, %v3941_v39  ;;  %v2709_v31 = vld [vmem:[%s5781_s6 + $0xc8] sm:$0xff] }
 0x3e8   : > { %4550 = vst [vmem:[%s6798_s30 + $0x88] sm:$0xff] %v4518_v0  ;;  %v4455_v48 = vadd.f32 %v6781_v18, %v4416_v13  ;;  %v4417_v42 = vadd.f32 %v4385_v63, %v6848_v56  ;;  %v2704_v56 = vld [vmem:[%s5781_s6 + $0xa0] sm:$0xff] }
 0x3ea   : > { %v4487_v49 = vadd.f32 %v4455_v48, %v2702_v7  ;;  %v4456_v8 = vadd.f32 %v6781_v18, %v4417_v42  ;;  %v3957_v58 = vpop.f32.mrb[152].mxu1 }
 0x3eb   : > { %v3959_v36 = vpop.f32.mrb[153].mxu1 }
 0x3ec   : > { %v4519_v38 = vmax.f32 %v4487_v49, 0.0  ;;  %v4488_v37 = vadd.f32 %v4456_v8, %v2703_v47  ;;  %v4386_v57 = vadd.f32 %v3959_v36, %v3947_v41  ;;  %v3961_v32 = vpop.f32.mrb[154].mxu1 }
 0x3ed   : > { %v3963_v54 = vpop.f32.mrb[155].mxu1 }
 0x3ee   : > { %4551 = vst [vmem:[%s6798_s30 + $0x90] sm:$0xff] %v4519_v38  ;;  %v4520_v61 = vmax.f32 %v4488_v37, 0.0  ;;  %v4418_v43 = vadd.f32 %v4386_v57, %v6863_v10  ;;  %v4387_v51 = vadd.f32 %v3963_v54, %v3951_v40  ;;  %v2711_v57 = vld [vmem:[%s5781_s6 + $0xd8] sm:$0xff] }
 0x3f0   : > { %4552 = vst [vmem:[%s6798_s30 + $0x98] sm:$0xff] %v4520_v61  ;;  %v4457_v9 = vadd.f32 %v6781_v18, %v4418_v43  ;;  %v4419_v55 = vadd.f32 %v4387_v51, %v6871_v14  ;;  %v2706_v14 = vld [vmem:[%s5781_s6 + $0xb0] sm:$0xff] }
 0x3f2   : > { %v4489_v3 = vadd.f32 %v4457_v9, %v2704_v56  ;;  %v4458_v26 = vadd.f32 %v6781_v18, %v4419_v55  ;;  %v3967_v19 = vpop.f32.mrb[156].mxu1 }
 0x3f3   : > { %v3969_v15 = vpop.f32.mrb[157].mxu1 }
 0x3f4   : > { %v4521_v62 = vmax.f32 %v4489_v3, 0.0  ;;  %v4490_v33 = vadd.f32 %v4458_v26, %v2705_v27  ;;  %v4388_v10 = vadd.f32 %v3969_v15, %v3957_v58  ;;  %v3971_v22 = vpop.f32.mrb[158].mxu1 }
 0x3f5   : > { %v3973_v28 = vpop.f32.mrb[159].mxu1 }
 0x3f6   : > { %4553 = vst [vmem:[%s6798_s30 + $0xa0] sm:$0xff] %v4521_v62  ;;  %v4522_v30 = vmax.f32 %v4490_v33, 0.0  ;;  %v4420_v12 = vadd.f32 %v4388_v10, %v6860_v44  ;;  %v4389_v39 = vadd.f32 %v3973_v28, %v3961_v32  ;;  %v2713_v62 = vld [vmem:[%s5781_s6 + $0xe8] sm:$0xff] }
 0x3f8   : > { %4554 = vst [vmem:[%s6798_s30 + $0xa8] sm:$0xff] %v4522_v30  ;;  %v4459_v20 = vadd.f32 %v6781_v18, %v4420_v12  ;;  %v4421_v23 = vadd.f32 %v4389_v39, %v6866_v45  ;;  %v2708_v45 = vld [vmem:[%s5781_s6 + $0xc0] sm:$0xff] }
 0x3fa   : > { %v4491_v1 = vadd.f32 %v4459_v20, %v2706_v14  ;;  %v4460_v24 = vadd.f32 %v6781_v18, %v4421_v23  ;;  %v3977_v6 = vpop.f32.mrb[160].mxu1 }
 0x3fb   : > { %v3979_v16 = vpop.f32.mrb[161].mxu1 }
 0x3fc   : > { %v4523_v2 = vmax.f32 %v4491_v1, 0.0  ;;  %v4492_v59 = vadd.f32 %v4460_v24, %v2707_v11  ;;  %v4390_v44 = vadd.f32 %v3979_v16, %v3967_v19  ;;  %v3981_v50 = vpop.f32.mrb[162].mxu1  ;;  %v2714_v11 = vld [vmem:[%s5781_s6 + $0xf0] sm:$0xff] }
 0x3fd   : > { %v3983_v41 = vpop.f32.mrb[163].mxu1 }
 0x3fe   : > { %4555 = vst [vmem:[%s6798_s30 + $0xb0] sm:$0xff] %v4523_v2  ;;  %v4524_v60 = vmax.f32 %v4492_v59, 0.0  ;;  %v4422_v17 = vadd.f32 %v4390_v44, %v6883_v4  ;;  %v4391_v25 = vadd.f32 %v3983_v41, %v3971_v22 }
 0x400   : > { %4556 = vst [vmem:[%s6798_s30 + $0xb8] sm:$0xff] %v4524_v60  ;;  %v4461_v52 = vadd.f32 %v6781_v18, %v4422_v17  ;;  %v4423_v40 = vadd.f32 %v4391_v25, %v6891_v34  ;;  %v2710_v34 = vld [vmem:[%s5781_s6 + $0xd0] sm:$0xff] }
 0x402   : > { %v4493_v0 = vadd.f32 %v4461_v52, %v2708_v45  ;;  %v4462_v13 = vadd.f32 %v6781_v18, %v4423_v40  ;;  %v3987_v63 = vpop.f32.mrb[164].mxu1 }
 0x403   : > { %v3989_v7 = vpop.f32.mrb[165].mxu1 }
 0x404   : > { %v4525_v48 = vmax.f32 %v4493_v0, 0.0  ;;  %v4494_v42 = vadd.f32 %v4462_v13, %v2709_v31  ;;  %v4392_v4 = vadd.f32 %v3989_v7, %v3977_v6  ;;  %v3991_v47 = vpop.f32.mrb[166].mxu1  ;;  %v2715_v6 = vld [vmem:[%s5781_s6 + $0xf8] sm:$0xff] }
 0x405   : > { %v3993_v49 = vpop.f32.mrb[167].mxu1 }
 0x406   : > { %4557 = vst [vmem:[%s6798_s30 + $0xc0] sm:$0xff] %v4525_v48  ;;  %v4526_v8 = vmax.f32 %v4494_v42, 0.0  ;;  %v4424_v58 = vadd.f32 %v4392_v4, %v6880_v21  ;;  %v4393_v36 = vadd.f32 %v3993_v49, %v3981_v50 }
 0x408   : > { %4558 = vst [vmem:[%s6798_s30 + $0xc8] sm:$0xff] %v4526_v8  ;;  %v4463_v38 = vadd.f32 %v6781_v18, %v4424_v58  ;;  %v4425_v37 = vadd.f32 %v4393_v36, %v6886_v46  ;;  %v2712_v46 = vld [vmem:[%s5781_s6 + $0xe0] sm:$0xff]  ;;  %s5494_s6 = sshll.u32 %s5570_s7, 4  ;;  %s5495_s6 = int_to_ptr.vmem [resolvable:$false] %s5494_s6 }
 0x409   : > { %s5496_s24 = scalar_lea.vmem %s5495_s6, 8192  ;;  %p5497_p7 = scmp.lt.s32.totalorder %s6990_s16, %s5495_s6 }
 0x40a   : > { %v4495_v32 = vadd.f32 %v4463_v38, %v2710_v34  ;;  %v4464_v54 = vadd.f32 %v6781_v18, %v4425_v37  ;;  %v3997_v61 = vpop.f32.mrb[168].mxu1  ;;  %p5498_p9 = scmp.lt.s32.totalorder %s5496_s24, %s5490_s17 }
 0x40b   : > { %v3999_v43 = vpop.f32.mrb[169].mxu1 }
 0x40c   : > { %v4527_v51 = vmax.f32 %v4495_v32, 0.0  ;;  %v4496_v56 = vadd.f32 %v4464_v54, %v2711_v57  ;;  %v4394_v21 = vadd.f32 %v3999_v43, %v3987_v63  ;;  %v4001_v9 = vpop.f32.mrb[170].mxu1  ;;  %p5499_p12 = por %p5498_p9, %p5497_p7 }
 0x40d   : > { %v4003_v55 = vpop.f32.mrb[171].mxu1 }
 0x40e   : > { %4559 = vst [vmem:[%s6798_s30 + $0xd0] sm:$0xff] %v4527_v51  ;;  %v4528_v27 = vmax.f32 %v4496_v56, 0.0  ;;  %v4426_v3 = vadd.f32 %v4394_v21, %v6903_v53  ;;  %v4395_v26 = vadd.f32 %v4003_v55, %v3991_v47  ;;  %p5500_p2 = pnand %p5499_p12, %p5493_p3 }
 0x410   : > { %4560 = vst [vmem:[%s6798_s30 + $0xd8] sm:$0xff] %v4528_v27  ;;  %v4465_v19 = vadd.f32 %v6781_v18, %v4426_v3  ;;  %v4427_v15 = vadd.f32 %v4395_v26, %v6911_v5 }
 0x412   : > { %v4497_v33 = vadd.f32 %v4465_v19, %v2712_v46  ;;  %v4466_v10 = vadd.f32 %v6781_v18, %v4427_v15  ;;  %v4007_v22 = vpop.f32.mrb[172].mxu1 }
 0x413   : > { %v4008_v28 = vpop.f32.mrb[173].mxu1 }
 0x414   : > { %v4529_v30 = vmax.f32 %v4497_v33, 0.0  ;;  %v4498_v12 = vadd.f32 %v4466_v10, %v2713_v62  ;;  %v4396_v53 = vadd.f32 %v4008_v28, %v3997_v61  ;;  %v4010_v39 = vpop.f32.mrb[174].mxu1 }
 0x415   : > { %v4011_v14 = vpop.f32.mrb[175].mxu1 }
 0x416   : > { %4561 = vst [vmem:[%s6798_s30 + $0xe0] sm:$0xff] %v4529_v30  ;;  %v4530_v20 = vmax.f32 %v4498_v12, 0.0  ;;  %v4428_v23 = vadd.f32 %v4396_v53, %v6900_v35  ;;  %v4397_v5 = vadd.f32 %v4011_v14, %v4001_v9 }
 0x418   : > { %4562 = vst [vmem:[%s6798_s30 + $0xe8] sm:$0xff] %v4530_v20  ;;  %v4467_v1 = vadd.f32 %v6781_v18, %v4428_v23  ;;  %v4429_v24 = vadd.f32 %v4397_v5, %v6906_v29 }
 0x41a   : > { %v4499_v16 = vadd.f32 %v4467_v1, %v2714_v11  ;;  %v4468_v2 = vadd.f32 %v6781_v18, %v4429_v24  ;;  %v4015_v59 = vpop.f32.mrb[180].mxu1 }
 0x41b   : > { %v4016_v44 = vpop.f32.mrb[181].mxu1 }
 0x41c   : > { %v4531_v35 = vmax.f32 %v4499_v16, 0.0  ;;  %v4500_v50 = vadd.f32 %v4468_v2, %v2715_v6  ;;  %v4017_v41 = vpop.f32.mrb[182].mxu1 }
 0x41d   : > { %v4018_v60 = vpop.f32.mrb[183].mxu1 }
 0x41e   : > { %4563 = vst [vmem:[%s6798_s30 + $0xf0] sm:$0xff] %v4531_v35  ;;  %v4532_v18 = vmax.f32 %v4500_v50, 0.0 }
 0x420   : > { %4564 = vst [vmem:[%s6798_s30 + $0xf8] sm:$0xff] %v4532_v18 }
 0x421   : > { %5503 = shalt.err (!%p5500_p2)
}
 0x422   : > { %s5504_s26 = scalar_lea.hbm %s6988_s13, 4096  ;;  %s5508_s11 = scalar_lea.hbm %s7041_s5, 8192 }
 0x423   : > { %p5505_p13 = scmp.ne.s32.totalorder %s6988_s13, %s5504_s26  ;;  %p5509_p4 = scmp.lt.u32.totalorder %s6988_s13, %s7041_s5 }
 0x424   : > { %p5510_p5 = scmp.lt.u32.totalorder %s5508_s11, %s5504_s26  ;;  %p5512_p11 = scmp.lt.u32.totalorder %s5504_s26, %s6988_s13 }
 0x425   : > { %p5506_p6 = pnand %p5505_p13, %p7059_p0 }
 0x426   : > { %p5511_p8 = por %p5510_p5, %p5509_p4 }
 0x427   : > { %p5507_p10 = pneg %p5506_p6 }
 0x428   : > { %p5513_p1 = por %p5512_p11, %p5511_p8 }
 0x42a   : > { %p5514_p3 = pnand %p5513_p1, %p5507_p10 }
 0x42c   : > { %5517 = shalt.err (!%p5514_p3)
}
 0x42d   : > { %s5571_s15 = smov 128   ;;  %s5572_s9 = smov 8  }
 0x42e   : > { %5139 = dma.vmem_to_hbm [thread:$0]  (%p7059_p0), %s6990_s16, 4096, %s6988_s13, %s4566_s22, %s5571_s15, %s5571_s15, %s5572_s9  }
 0x42f PF: > { %s4594_s12 = sand.u32 1, %s5548_s18   ;;  %p7060_p7 = scmp.ne.s32.totalorder %s7046_s25, 0 }
 0x430   : > { %p7061_p9 = scmp.ge.s32.totalorder %s5560_s21, 2  ;;  %s4595_s17 = scalar_lea.sflag [#allocation6], %s4594_s12 }
 0x432   : > { %p5153_p12 = pnand %p7061_p9, %p7060_p7 }
 0x434   : > { %5543 = dma.done.wait (!%p5153_p12), %s4595_s17, 4096  }
 0x435   : > { %5545 = vsyncadd (!%p5153_p12), %s4595_s17, 4294963200  ;;  %p19_p2 = scmp.ge.s32.totalorder %s5713_s14, 4   ;;  %s7062_s18 = smov %s5552_s19 }
 0x436   : > { %s7063_s19 = smov %s5556_s20  ;;  %s7064_s20 = smov %s5729_s27 }
 0x437   : > { %s7065_s21 = smov %s5713_s14  ;;  %21 = sbr.rel (!%p19_p2) target bundleno = 6 (0x6), region = 95 }
 0x43e   :  { %4600 = vsyncpa [#allocation5], 1 }
 0x43f   :  { %4602 = vsyncpa [#allocation5 + $0x1], 1 }
 0x440   :  { %4603 = vsyncpa [#allocation8], 1 }
 0x441   :  { %4604 = vsyncpa [#allocation6], 1 }
 0x442   :  { %4606 = vsyncpa [#allocation6 + $0x1], 1 }

</bundles_post_ra>
